<compile_context>
chip_gen: v7x
topology: tpu7x:2x2x1
jax: 0.10.0
libtpu: 0.0.40
codegen_flags: <defaults>
</compile_context>

<pallas_src>
import jax
import jax.numpy as jnp
from jax.experimental import pallas as pl
from jax.experimental.pallas import tpu as pltpu


# ---------------------------------------------------------------------------
# Pallas kernel
# ---------------------------------------------------------------------------
def _silu(v):
    return v * jax.nn.sigmoid(v)


def make_equivariant_block_kernel(num_layers, num_edges, hidden, attention,
                                  use_tanh, tanh_coords_range,
                                  normalization_factor, norm_constant):
    E = num_edges
    H = hidden
    inv_norm = 1.0 / normalization_factor

    def kernel(x_ref, pos_ref, ea_ref, gcat_ref, mask_ref,
               wx1_ref, eb1_ref, ew2_ref, eb2_ref, aw_ref, ab_ref,
               nw1x_ref, nw1a_ref, nb1_ref, nw2_ref, nb2_ref,
               cwx1_ref, cb1_ref, cw2_ref, cb2_ref, cw3_ref, cb3_ref,
               ew_ref,
               xo_ref, po_ref):
        f32 = jnp.float32
        x = x_ref[...]                                  # [N, H]
        pos = pos_ref[...]                              # [N, 3]
        mask = mask_ref[...]                            # [N, 1]
        # Stacked one-hot gather matrix (rows 0:E = target i, E:2E = source j),
        # stored bf16 (0/1 exact), promoted once to f32 for exact gathers.
        gcat = gcat_ref[...].astype(f32)                # [2E, N]
        gi = gcat[0:E]                                  # [E, N]

        def dot(a, b):
            return jnp.dot(a, b, preferred_element_type=f32)

        def scatter_add(m):
            # sum over edges onto target nodes: gi^T @ m, expressed as a
            # transposed contraction (no explicit [N, E] operand needed).
            return jax.lax.dot_general(gi, m, (((0,), (0,)), ((), ())),
                                       preferred_element_type=f32)

        # --- edge geometry from the *input* positions (as in the reference) --
        pcat = dot(gcat, pos)                           # [2E, 3]  pos_i / pos_j
        diff = pcat[0:E] - pcat[E:]                     # [E, 3]
        sqd = jnp.sum(diff * diff, axis=-1, keepdims=True)          # [E, 1]
        efeat = jnp.concatenate([sqd, ea_ref[...]], axis=-1)        # [E, F+1]
        # All (constant) edge-feature projections at once: L GCL layers + the
        # coordinate block, column-stacked into a single weight.
        eproj = dot(efeat, ew_ref[...])                 # [E, (L+1)*H]

        # --- num_layers x GCL ------------------------------------------------
        for l in range(num_layers):
            xcat = dot(gcat, x)                         # [2E, H]  x_i / x_j
            hp = dot(xcat, wx1_ref[l])                  # [2E, 2H]
            h = _silu(hp[0:E, 0:H] + hp[E:, H:2 * H]
                      + eproj[:, l * H:(l + 1) * H] + eb1_ref[l])
            m = _silu(dot(h, ew2_ref[l]) + eb2_ref[l])
            if attention:
                m = m * jax.nn.sigmoid(dot(m, aw_ref[l]) + ab_ref[l])
            agg = scatter_add(m) * inv_norm             # [N, H]
            u = _silu(dot(x, nw1x_ref[l]) + dot(agg, nw1a_ref[l]) + nb1_ref[l])
            x = x + dot(u, nw2_ref[l]) + nb2_ref[l]

        # --- EquivariantGCL coordinate update --------------------------------
        xcat = dot(gcat, x)
        hp = dot(xcat, cwx1_ref[...])                   # [2E, 2H]
        h = _silu(hp[0:E, 0:H] + hp[E:, H:2 * H]
                  + eproj[:, num_layers * H:] + cb1_ref[...])
        h = _silu(dot(h, cw2_ref[...]) + cb2_ref[...])
        w = dot(h, cw3_ref[...]) + cb3_ref[...]                      # [E, 1]
        if use_tanh:
            w = jnp.tanh(w) * tanh_coords_range
        dist = jnp.sqrt(sqd)
        inv_d = pl.reciprocal(dist + norm_constant, approx=True)     # EUP slot
        trans = diff * (inv_d * w)                                   # [E, 3]
        po_ref[...] = pos + (scatter_add(trans) * inv_norm) * mask
        xo_ref[...] = x

    return kernel


# ---------------------------------------------------------------------------
# Wrapper
# ---------------------------------------------------------------------------
def equivariant_block(params, x, pos, edge_index, mask, edge_attr, *,
                      num_layers, attention=False, use_tanh=False,
                      tanh_coords_range=15.0, normalization_factor=100.0,
                      norm_constant=1.0):
    N, H = x.shape
    E = edge_index.shape[1]
    F1 = edge_attr.shape[1] + 1
    src = edge_index[0]   # j (source)
    tgt = edge_index[1]   # i (target) -- messages aggregated at target
    # Single stacked one-hot gather operand, bf16 (0/1 exact) for half the DMA.
    gcat = jnp.concatenate(
        [jax.nn.one_hot(tgt, N, dtype=jnp.float32),
         jax.nn.one_hot(src, N, dtype=jnp.float32)], axis=0
    ).astype(jnp.bfloat16)                                            # [2E, N]

    # Column-stack the x_i / x_j first-layer weights of every edge MLP so the
    # in-kernel projection is one matmul per layer on the stacked gather.
    wx1 = jnp.concatenate([params["ew1xi"], params["ew1xj"]], axis=-1)  # [L,H,2H]
    cwx1 = jnp.concatenate([params["cw1xi"], params["cw1xj"]], axis=-1)  # [H,2H]
    # Column-stack all constant edge-feature projection weights (L GCL layers
    # + coordinate block) into one operand, applied once in the kernel.
    ew_all = jnp.concatenate(
        [params["ew1e"][l] for l in range(num_layers)] + [params["cw1e"]],
        axis=1)                                                      # [F1,(L+1)H]

    kernel = make_equivariant_block_kernel(
        num_layers, E, H, attention, use_tanh, tanh_coords_range,
        normalization_factor, norm_constant)

    inputs = (x, pos, edge_attr, gcat, mask,
              wx1, params["eb1"], params["ew2"], params["eb2"],
              params["aw"], params["ab"],
              params["nw1x"], params["nw1a"], params["nb1"], params["nw2"],
              params["nb2"],
              cwx1, params["cb1"], params["cw2"], params["cb2"],
              params["cw3"], params["cb3"],
              ew_all)

    # Advisory cost estimate for the XLA scheduler.
    gathers = 2 * (2 * E) * N * (3 + (num_layers + 1) * H)
    scatters = 2 * E * N * (num_layers * H + 3)
    edge_mlps = ((num_layers + 1) * (2 * (2 * E) * H * (2 * H)
                                     + 2 * E * H * H)
                 + 2 * E * F1 * (num_layers + 1) * H + 2 * E * H)
    node_mlps = num_layers * 2 * N * (H * (2 * H) + H * H)
    flops = gathers + scatters + edge_mlps + node_mlps
    transcend = (2 * num_layers + 3) * E * H + 2 * num_layers * N * H + 3 * E
    bytes_in = sum(int(a.size) * a.dtype.itemsize for a in inputs)
    bytes_out = N * H * 4 + N * 3 * 4

    vmem = pl.BlockSpec(memory_space=pltpu.MemorySpace.VMEM)
    out = pl.pallas_call(
        kernel,
        out_shape=(jax.ShapeDtypeStruct((N, H), jnp.float32),
                   jax.ShapeDtypeStruct((N, 3), jnp.float32)),
        in_specs=[vmem] * len(inputs),
        out_specs=(vmem, vmem),
        compiler_params=pltpu.CompilerParams(
            vmem_limit_bytes=32 * 1024 * 1024),
        cost_estimate=pl.CostEstimate(flops=int(flops),
                                      transcendentals=int(transcend),
                                      bytes_accessed=int(bytes_in + bytes_out)),
    )(*inputs)
    return out


# ---------------------------------------------------------------------------
# Pure-JAX reference (same math, gather/scatter via indexing) for verification
# ---------------------------------------------------------------------------
def reference_forward(params, x, pos, edge_index, mask, edge_attr, *,
                      num_layers, attention=False, use_tanh=False,
                      tanh_coords_range=15.0, normalization_factor=100.0,
                      norm_constant=1.0):
    N, H = x.shape
    src, tgt = edge_index[0], edge_index[1]
    diff = pos[tgt] - pos[src]
    sqd = jnp.sum(diff * diff, axis=-1, keepdims=True)
    ea = jnp.concatenate([sqd, edge_attr], axis=-1)

    def silu(v):
        return v * jax.nn.sigmoid(v)

    for l in range(num_layers):
        xi, xj = x[tgt], x[src]
        w1 = jnp.concatenate([params["ew1xi"][l], params["ew1xj"][l],
                              params["ew1e"][l]], axis=0)
        h = silu(jnp.concatenate([xi, xj, ea], -1) @ w1 + params["eb1"][l][0])
        m = silu(h @ params["ew2"][l] + params["eb2"][l][0])
        if attention:
            m = m * jax.nn.sigmoid(m @ params["aw"][l] + params["ab"][l][0])
        agg = jnp.zeros((N, H), jnp.float32).at[tgt].add(m) / normalization_factor
        u = silu(jnp.concatenate([x, agg], -1)
                 @ jnp.concatenate([params["nw1x"][l], params["nw1a"][l]], 0)
                 + params["nb1"][l][0])
        x = x + u @ params["nw2"][l] + params["nb2"][l][0]

    xi, xj = x[tgt], x[src]
    cw1 = jnp.concatenate([params["cw1xi"], params["cw1xj"], params["cw1e"]], 0)
    h = silu(jnp.concatenate([xi, xj, ea], -1) @ cw1 + params["cb1"][0])
    h = silu(h @ params["cw2"] + params["cb2"][0])
    w = h @ params["cw3"] + params["cb3"][0]
    if use_tanh:
        w = jnp.tanh(w) * tanh_coords_range
    dist = jnp.sqrt(sqd)
    trans = (diff / (dist + norm_constant)) * w
    agg_pos = jnp.zeros((N, 3), jnp.float32).at[tgt].add(trans) / normalization_factor
    pos = pos + agg_pos * mask
    return x, pos


# ---------------------------------------------------------------------------
# Deterministic parameter init
# ---------------------------------------------------------------------------
def init_params(key, hidden, edge_features, num_layers):
    F1 = edge_features + 1
    shapes = dict(
        ew1xi=(num_layers, hidden, hidden), ew1xj=(num_layers, hidden, hidden),
        ew1e=(num_layers, F1, hidden), eb1=(num_layers, 1, hidden),
        ew2=(num_layers, hidden, hidden), eb2=(num_layers, 1, hidden),
        aw=(num_layers, hidden, 1), ab=(num_layers, 1, 1),
        nw1x=(num_layers, hidden, hidden), nw1a=(num_layers, hidden, hidden),
        nb1=(num_layers, 1, hidden),
        nw2=(num_layers, hidden, hidden), nb2=(num_layers, 1, hidden),
        cw1xi=(hidden, hidden), cw1xj=(hidden, hidden),
        cw1e=(F1, hidden), cb1=(1, hidden),
        cw2=(hidden, hidden), cb2=(1, hidden),
        cw3=(hidden, 1), cb3=(1, 1),
    )
    params = {}
    keys = jax.random.split(key, len(shapes))
    for k, (name, shp) in zip(keys, sorted(shapes.items())):
        scale = 0.05
        if name == "cw3":           # mimic small-gain init of last coord layer
            scale = 0.001
        params[name] = scale * jax.random.normal(k, shp, jnp.float32)
    return params


# ---------------------------------------------------------------------------
if __name__ == "__main__":
    N, H, F, E, L = 32, 32, 3, 64, 2   # nodes, hidden, edge_features, edges, layers

    key = jax.random.PRNGKey(0)
    kx, kp, ke, kea, km, kw = jax.random.split(key, 6)

    x = jax.random.normal(kx, (N, H), jnp.float32)
    pos = jax.random.normal(kp, (N, 3), jnp.float32)
    edge_index = jax.random.randint(ke, (2, E), 0, N, dtype=jnp.int32)
    edge_attr = jax.random.normal(kea, (E, F), jnp.float32)
    mask = (jax.random.uniform(km, (N, 1)) > 0.5).astype(jnp.float32)
    params = init_params(kw, H, F, L)

    cfg = dict(num_layers=L, attention=False, use_tanh=False,
               tanh_coords_range=15.0, normalization_factor=100.0,
               norm_constant=1.0)

    x_out, pos_out = equivariant_block(params, x, pos, edge_index, mask,
                                       edge_attr, **cfg)
    jax.block_until_ready((x_out, pos_out))

    x_ref, pos_ref = reference_forward(params, x, pos, edge_index, mask,
                                       edge_attr, **cfg)
    assert jnp.allclose(x_out, x_ref, atol=1e-3, rtol=1e-3), "x mismatch"
    assert jnp.allclose(pos_out, pos_ref, atol=1e-3, rtol=1e-3), "pos mismatch"

    # TODO(synk): GCL/EquivariantGCL sources were not provided; standard EGNN
    # semantics (residual node update, 'add' aggregation divided by
    # normalization_factor, mask gating the coordinate update) were assumed.
    print("KERNEL_OK")
</pallas_src>

<mosaic_0001>
module attributes {stable_mosaic.version = 11 : i64} {
  func.func @kernel(%arg0: memref<32x32xf32, #tpu.memory_space<vmem>>, %arg1: memref<32x3xf32, #tpu.memory_space<vmem>>, %arg2: memref<64x3xf32, #tpu.memory_space<vmem>>, %arg3: memref<128x32xbf16, #tpu.memory_space<vmem>>, %arg4: memref<32x1xf32, #tpu.memory_space<vmem>>, %arg5: memref<2x32x64xf32, #tpu.memory_space<vmem>>, %arg6: memref<2x1x32xf32, #tpu.memory_space<vmem>>, %arg7: memref<2x32x32xf32, #tpu.memory_space<vmem>>, %arg8: memref<2x1x32xf32, #tpu.memory_space<vmem>>, %arg9: memref<2x32x1xf32, #tpu.memory_space<vmem>>, %arg10: memref<2x1x1xf32, #tpu.memory_space<vmem>>, %arg11: memref<2x32x32xf32, #tpu.memory_space<vmem>>, %arg12: memref<2x32x32xf32, #tpu.memory_space<vmem>>, %arg13: memref<2x1x32xf32, #tpu.memory_space<vmem>>, %arg14: memref<2x32x32xf32, #tpu.memory_space<vmem>>, %arg15: memref<2x1x32xf32, #tpu.memory_space<vmem>>, %arg16: memref<32x64xf32, #tpu.memory_space<vmem>>, %arg17: memref<1x32xf32, #tpu.memory_space<vmem>>, %arg18: memref<32x32xf32, #tpu.memory_space<vmem>>, %arg19: memref<1x32xf32, #tpu.memory_space<vmem>>, %arg20: memref<32x1xf32, #tpu.memory_space<vmem>>, %arg21: memref<1x1xf32, #tpu.memory_space<vmem>>, %arg22: memref<4x96xf32, #tpu.memory_space<vmem>>, %arg23: memref<32x32xf32, #tpu.memory_space<vmem>>, %arg24: memref<32x3xf32, #tpu.memory_space<vmem>>) attributes {dimension_semantics = [], scalar_prefetch = 0 : i64, scratch_operands = 0 : i64, tpu.core_type = #tpu.core_type<tc>} {
    %c0 = arith.constant 0 : index
    %c0_0 = arith.constant 0 : index
    %0 = vector.load %arg0[%c0, %c0_0] : memref<32x32xf32, #tpu.memory_space<vmem>>, vector<32x32xf32>
    %c0_1 = arith.constant 0 : index
    %c0_2 = arith.constant 0 : index
    %1 = vector.load %arg1[%c0_1, %c0_2] : memref<32x3xf32, #tpu.memory_space<vmem>>, vector<32x3xf32>
    %c0_3 = arith.constant 0 : index
    %c0_4 = arith.constant 0 : index
    %2 = vector.load %arg4[%c0_3, %c0_4] : memref<32x1xf32, #tpu.memory_space<vmem>>, vector<32x1xf32>
    %c0_5 = arith.constant 0 : index
    %c0_6 = arith.constant 0 : index
    %3 = vector.load %arg3[%c0_5, %c0_6] : memref<128x32xbf16, #tpu.memory_space<vmem>>, vector<128x32xbf16>
    %4 = arith.extf %3 : vector<128x32xbf16> to vector<128x32xf32>
    %5 = vector.extract_strided_slice %4 {offsets = [0, 0], sizes = [64, 32], strides = [1, 1]} : vector<128x32xf32> to vector<64x32xf32>
    %cst = arith.constant dense<0.000000e+00> : vector<128x3xf32>
    %6 = tpu.matmul %4, %1, %cst {dimension_numbers = #tpu.dot_dimension_numbers<[1], [0], [0], [1], [0, 0, 1, 1], [], []>} : vector<128x32xf32>, vector<32x3xf32>, vector<128x3xf32> -> vector<128x3xf32>
    %7 = vector.extract_strided_slice %6 {offsets = [0, 0], sizes = [64, 3], strides = [1, 1]} : vector<128x3xf32> to vector<64x3xf32>
    %8 = vector.extract_strided_slice %6 {offsets = [64, 0], sizes = [64, 3], strides = [1, 1]} : vector<128x3xf32> to vector<64x3xf32>
    %9 = arith.subf %7, %8 : vector<64x3xf32>
    %10 = arith.mulf %9, %9 : vector<64x3xf32>
    %cst_7 = arith.constant dense<0.000000e+00> : vector<64xf32>
    %11 = vector.multi_reduction <add>, %10, %cst_7 [1] : vector<64x3xf32> to vector<64xf32>
    %12 = vector.shape_cast %11 : vector<64xf32> to vector<64x1xf32>
    %c0_8 = arith.constant 0 : index
    %c0_9 = arith.constant 0 : index
    %13 = vector.load %arg2[%c0_8, %c0_9] : memref<64x3xf32, #tpu.memory_space<vmem>>, vector<64x3xf32>
    %14 = tpu.concatenate %12, %13 in 1 : vector<64x1xf32>, vector<64x3xf32> -> vector<64x4xf32>
    %c0_10 = arith.constant 0 : index
    %c0_11 = arith.constant 0 : index
    %15 = vector.load %arg22[%c0_10, %c0_11] : memref<4x96xf32, #tpu.memory_space<vmem>>, vector<4x96xf32>
    %cst_12 = arith.constant dense<0.000000e+00> : vector<64x96xf32>
    %16 = tpu.matmul %14, %15, %cst_12 {dimension_numbers = #tpu.dot_dimension_numbers<[1], [0], [0], [1], [0, 0, 1, 1], [], []>} : vector<64x4xf32>, vector<4x96xf32>, vector<64x96xf32> -> vector<64x96xf32>
    %cst_13 = arith.constant dense<0.000000e+00> : vector<128x32xf32>
    %17 = tpu.matmul %4, %0, %cst_13 {dimension_numbers = #tpu.dot_dimension_numbers<[1], [0], [0], [1], [0, 0, 1, 1], [], []>} : vector<128x32xf32>, vector<32x32xf32>, vector<128x32xf32> -> vector<128x32xf32>
    %c0_14 = arith.constant 0 : index
    %c0_15 = arith.constant 0 : index
    %c0_16 = arith.constant 0 : index
    %18 = vector.load %arg5[%c0_14, %c0_15, %c0_16] : memref<2x32x64xf32, #tpu.memory_space<vmem>>, vector<1x32x64xf32>
    %19 = vector.shape_cast %18 : vector<1x32x64xf32> to vector<32x64xf32>
    %cst_17 = arith.constant dense<0.000000e+00> : vector<128x64xf32>
    %20 = tpu.matmul %17, %19, %cst_17 {dimension_numbers = #tpu.dot_dimension_numbers<[1], [0], [0], [1], [0, 0, 1, 1], [], []>} : vector<128x32xf32>, vector<32x64xf32>, vector<128x64xf32> -> vector<128x64xf32>
    %21 = vector.extract_strided_slice %20 {offsets = [0, 0], sizes = [64, 32], strides = [1, 1]} : vector<128x64xf32> to vector<64x32xf32>
    %22 = vector.extract_strided_slice %20 {offsets = [64, 32], sizes = [64, 32], strides = [1, 1]} : vector<128x64xf32> to vector<64x32xf32>
    %23 = arith.addf %21, %22 : vector<64x32xf32>
    %24 = vector.extract_strided_slice %16 {offsets = [0, 0], sizes = [64, 32], strides = [1, 1]} : vector<64x96xf32> to vector<64x32xf32>
    %25 = arith.addf %23, %24 : vector<64x32xf32>
    %c0_18 = arith.constant 0 : index
    %c0_19 = arith.constant 0 : index
    %c0_20 = arith.constant 0 : index
    %26 = vector.load %arg6[%c0_18, %c0_19, %c0_20] : memref<2x1x32xf32, #tpu.memory_space<vmem>>, vector<1x1x32xf32>
    %27 = vector.shape_cast %26 : vector<1x1x32xf32> to vector<1x32xf32>
    %28 = vector.broadcast %27 : vector<1x32xf32> to vector<64x32xf32>
    %29 = arith.addf %25, %28 : vector<64x32xf32>
    %30 = arith.negf %29 : vector<64x32xf32>
    %31 = math.exp %30 : vector<64x32xf32>
    %cst_21 = arith.constant 1.000000e+00 : f32
    %32 = vector.broadcast %cst_21 : f32 to vector<64x32xf32>
    %33 = arith.addf %32, %31 : vector<64x32xf32>
    %34 = arith.divf %32, %33 : vector<64x32xf32>
    %35 = arith.mulf %29, %34 : vector<64x32xf32>
    %c0_22 = arith.constant 0 : index
    %c0_23 = arith.constant 0 : index
    %c0_24 = arith.constant 0 : index
    %36 = vector.load %arg7[%c0_22, %c0_23, %c0_24] : memref<2x32x32xf32, #tpu.memory_space<vmem>>, vector<1x32x32xf32>
    %37 = vector.shape_cast %36 : vector<1x32x32xf32> to vector<32x32xf32>
    %cst_25 = arith.constant dense<0.000000e+00> : vector<64x32xf32>
    %38 = tpu.matmul %35, %37, %cst_25 {dimension_numbers = #tpu.dot_dimension_numbers<[1], [0], [0], [1], [0, 0, 1, 1], [], []>} : vector<64x32xf32>, vector<32x32xf32>, vector<64x32xf32> -> vector<64x32xf32>
    %c0_26 = arith.constant 0 : index
    %c0_27 = arith.constant 0 : index
    %c0_28 = arith.constant 0 : index
    %39 = vector.load %arg8[%c0_26, %c0_27, %c0_28] : memref<2x1x32xf32, #tpu.memory_space<vmem>>, vector<1x1x32xf32>
    %40 = vector.shape_cast %39 : vector<1x1x32xf32> to vector<1x32xf32>
    %41 = vector.broadcast %40 : vector<1x32xf32> to vector<64x32xf32>
    %42 = arith.addf %38, %41 : vector<64x32xf32>
    %43 = arith.negf %42 : vector<64x32xf32>
    %44 = math.exp %43 : vector<64x32xf32>
    %cst_29 = arith.constant 1.000000e+00 : f32
    %45 = vector.broadcast %cst_29 : f32 to vector<64x32xf32>
    %46 = arith.addf %45, %44 : vector<64x32xf32>
    %47 = arith.divf %45, %46 : vector<64x32xf32>
    %48 = arith.mulf %42, %47 : vector<64x32xf32>
    %cst_30 = arith.constant dense<0.000000e+00> : vector<32x32xf32>
    %49 = tpu.matmul %5, %48, %cst_30 {dimension_numbers = #tpu.dot_dimension_numbers<[0], [0], [1], [1], [0, 1, 1, 1], [], []>} : vector<64x32xf32>, vector<64x32xf32>, vector<32x32xf32> -> vector<32x32xf32>
    %cst_31 = arith.constant 0.00999999977 : f32
    %50 = vector.broadcast %cst_31 : f32 to vector<32x32xf32>
    %51 = arith.mulf %49, %50 : vector<32x32xf32>
    %c0_32 = arith.constant 0 : index
    %c0_33 = arith.constant 0 : index
    %c0_34 = arith.constant 0 : index
    %52 = vector.load %arg11[%c0_32, %c0_33, %c0_34] : memref<2x32x32xf32, #tpu.memory_space<vmem>>, vector<1x32x32xf32>
    %53 = vector.shape_cast %52 : vector<1x32x32xf32> to vector<32x32xf32>
    %cst_35 = arith.constant dense<0.000000e+00> : vector<32x32xf32>
    %54 = tpu.matmul %0, %53, %cst_35 {dimension_numbers = #tpu.dot_dimension_numbers<[1], [0], [0], [1], [0, 0, 1, 1], [], []>} : vector<32x32xf32>, vector<32x32xf32>, vector<32x32xf32> -> vector<32x32xf32>
    %c0_36 = arith.constant 0 : index
    %c0_37 = arith.constant 0 : index
    %c0_38 = arith.constant 0 : index
    %55 = vector.load %arg12[%c0_36, %c0_37, %c0_38] : memref<2x32x32xf32, #tpu.memory_space<vmem>>, vector<1x32x32xf32>
    %56 = vector.shape_cast %55 : vector<1x32x32xf32> to vector<32x32xf32>
    %cst_39 = arith.constant dense<0.000000e+00> : vector<32x32xf32>
    %57 = tpu.matmul %51, %56, %cst_39 {dimension_numbers = #tpu.dot_dimension_numbers<[1], [0], [0], [1], [0, 0, 1, 1], [], []>} : vector<32x32xf32>, vector<32x32xf32>, vector<32x32xf32> -> vector<32x32xf32>
    %58 = arith.addf %54, %57 : vector<32x32xf32>
    %c0_40 = arith.constant 0 : index
    %c0_41 = arith.constant 0 : index
    %c0_42 = arith.constant 0 : index
    %59 = vector.load %arg13[%c0_40, %c0_41, %c0_42] : memref<2x1x32xf32, #tpu.memory_space<vmem>>, vector<1x1x32xf32>
    %60 = vector.shape_cast %59 : vector<1x1x32xf32> to vector<1x32xf32>
    %61 = vector.broadcast %60 : vector<1x32xf32> to vector<32x32xf32>
    %62 = arith.addf %58, %61 : vector<32x32xf32>
    %63 = arith.negf %62 : vector<32x32xf32>
    %64 = math.exp %63 : vector<32x32xf32>
    %cst_43 = arith.constant 1.000000e+00 : f32
    %65 = vector.broadcast %cst_43 : f32 to vector<32x32xf32>
    %66 = arith.addf %65, %64 : vector<32x32xf32>
    %67 = arith.divf %65, %66 : vector<32x32xf32>
    %68 = arith.mulf %62, %67 : vector<32x32xf32>
    %c0_44 = arith.constant 0 : index
    %c0_45 = arith.constant 0 : index
    %c0_46 = arith.constant 0 : index
    %69 = vector.load %arg14[%c0_44, %c0_45, %c0_46] : memref<2x32x32xf32, #tpu.memory_space<vmem>>, vector<1x32x32xf32>
    %70 = vector.shape_cast %69 : vector<1x32x32xf32> to vector<32x32xf32>
    %cst_47 = arith.constant dense<0.000000e+00> : vector<32x32xf32>
    %71 = tpu.matmul %68, %70, %cst_47 {dimension_numbers = #tpu.dot_dimension_numbers<[1], [0], [0], [1], [0, 0, 1, 1], [], []>} : vector<32x32xf32>, vector<32x32xf32>, vector<32x32xf32> -> vector<32x32xf32>
    %72 = arith.addf %0, %71 : vector<32x32xf32>
    %c0_48 = arith.constant 0 : index
    %c0_49 = arith.constant 0 : index
    %c0_50 = arith.constant 0 : index
    %73 = vector.load %arg15[%c0_48, %c0_49, %c0_50] : memref<2x1x32xf32, #tpu.memory_space<vmem>>, vector<1x1x32xf32>
    %74 = vector.shape_cast %73 : vector<1x1x32xf32> to vector<1x32xf32>
    %75 = vector.broadcast %74 : vector<1x32xf32> to vector<32x32xf32>
    %76 = arith.addf %72, %75 : vector<32x32xf32>
    %cst_51 = arith.constant dense<0.000000e+00> : vector<128x32xf32>
    %77 = tpu.matmul %4, %76, %cst_51 {dimension_numbers = #tpu.dot_dimension_numbers<[1], [0], [0], [1], [0, 0, 1, 1], [], []>} : vector<128x32xf32>, vector<32x32xf32>, vector<128x32xf32> -> vector<128x32xf32>
    %c1 = arith.constant 1 : index
    %c0_52 = arith.constant 0 : index
    %c0_53 = arith.constant 0 : index
    %78 = vector.load %arg5[%c1, %c0_52, %c0_53] : memref<2x32x64xf32, #tpu.memory_space<vmem>>, vector<1x32x64xf32>
    %79 = vector.shape_cast %78 : vector<1x32x64xf32> to vector<32x64xf32>
    %cst_54 = arith.constant dense<0.000000e+00> : vector<128x64xf32>
    %80 = tpu.matmul %77, %79, %cst_54 {dimension_numbers = #tpu.dot_dimension_numbers<[1], [0], [0], [1], [0, 0, 1, 1], [], []>} : vector<128x32xf32>, vector<32x64xf32>, vector<128x64xf32> -> vector<128x64xf32>
    %81 = vector.extract_strided_slice %80 {offsets = [0, 0], sizes = [64, 32], strides = [1, 1]} : vector<128x64xf32> to vector<64x32xf32>
    %82 = vector.extract_strided_slice %80 {offsets = [64, 32], sizes = [64, 32], strides = [1, 1]} : vector<128x64xf32> to vector<64x32xf32>
    %83 = arith.addf %81, %82 : vector<64x32xf32>
    %84 = vector.extract_strided_slice %16 {offsets = [0, 32], sizes = [64, 32], strides = [1, 1]} : vector<64x96xf32> to vector<64x32xf32>
    %85 = arith.addf %83, %84 : vector<64x32xf32>
    %c1_55 = arith.constant 1 : index
    %c0_56 = arith.constant 0 : index
    %c0_57 = arith.constant 0 : index
    %86 = vector.load %arg6[%c1_55, %c0_56, %c0_57] : memref<2x1x32xf32, #tpu.memory_space<vmem>>, vector<1x1x32xf32>
    %87 = vector.shape_cast %86 : vector<1x1x32xf32> to vector<1x32xf32>
    %88 = vector.broadcast %87 : vector<1x32xf32> to vector<64x32xf32>
    %89 = arith.addf %85, %88 : vector<64x32xf32>
    %90 = arith.negf %89 : vector<64x32xf32>
    %91 = math.exp %90 : vector<64x32xf32>
    %cst_58 = arith.constant 1.000000e+00 : f32
    %92 = vector.broadcast %cst_58 : f32 to vector<64x32xf32>
    %93 = arith.addf %92, %91 : vector<64x32xf32>
    %94 = arith.divf %92, %93 : vector<64x32xf32>
    %95 = arith.mulf %89, %94 : vector<64x32xf32>
    %c1_59 = arith.constant 1 : index
    %c0_60 = arith.constant 0 : index
    %c0_61 = arith.constant 0 : index
    %96 = vector.load %arg7[%c1_59, %c0_60, %c0_61] : memref<2x32x32xf32, #tpu.memory_space<vmem>>, vector<1x32x32xf32>
    %97 = vector.shape_cast %96 : vector<1x32x32xf32> to vector<32x32xf32>
    %cst_62 = arith.constant dense<0.000000e+00> : vector<64x32xf32>
    %98 = tpu.matmul %95, %97, %cst_62 {dimension_numbers = #tpu.dot_dimension_numbers<[1], [0], [0], [1], [0, 0, 1, 1], [], []>} : vector<64x32xf32>, vector<32x32xf32>, vector<64x32xf32> -> vector<64x32xf32>
    %c1_63 = arith.constant 1 : index
    %c0_64 = arith.constant 0 : index
    %c0_65 = arith.constant 0 : index
    %99 = vector.load %arg8[%c1_63, %c0_64, %c0_65] : memref<2x1x32xf32, #tpu.memory_space<vmem>>, vector<1x1x32xf32>
    %100 = vector.shape_cast %99 : vector<1x1x32xf32> to vector<1x32xf32>
    %101 = vector.broadcast %100 : vector<1x32xf32> to vector<64x32xf32>
    %102 = arith.addf %98, %101 : vector<64x32xf32>
    %103 = arith.negf %102 : vector<64x32xf32>
    %104 = math.exp %103 : vector<64x32xf32>
    %cst_66 = arith.constant 1.000000e+00 : f32
    %105 = vector.broadcast %cst_66 : f32 to vector<64x32xf32>
    %106 = arith.addf %105, %104 : vector<64x32xf32>
    %107 = arith.divf %105, %106 : vector<64x32xf32>
    %108 = arith.mulf %102, %107 : vector<64x32xf32>
    %cst_67 = arith.constant dense<0.000000e+00> : vector<32x32xf32>
    %109 = tpu.matmul %5, %108, %cst_67 {dimension_numbers = #tpu.dot_dimension_numbers<[0], [0], [1], [1], [0, 1, 1, 1], [], []>} : vector<64x32xf32>, vector<64x32xf32>, vector<32x32xf32> -> vector<32x32xf32>
    %cst_68 = arith.constant 0.00999999977 : f32
    %110 = vector.broadcast %cst_68 : f32 to vector<32x32xf32>
    %111 = arith.mulf %109, %110 : vector<32x32xf32>
    %c1_69 = arith.constant 1 : index
    %c0_70 = arith.constant 0 : index
    %c0_71 = arith.constant 0 : index
    %112 = vector.load %arg11[%c1_69, %c0_70, %c0_71] : memref<2x32x32xf32, #tpu.memory_space<vmem>>, vector<1x32x32xf32>
    %113 = vector.shape_cast %112 : vector<1x32x32xf32> to vector<32x32xf32>
    %cst_72 = arith.constant dense<0.000000e+00> : vector<32x32xf32>
    %114 = tpu.matmul %76, %113, %cst_72 {dimension_numbers = #tpu.dot_dimension_numbers<[1], [0], [0], [1], [0, 0, 1, 1], [], []>} : vector<32x32xf32>, vector<32x32xf32>, vector<32x32xf32> -> vector<32x32xf32>
    %c1_73 = arith.constant 1 : index
    %c0_74 = arith.constant 0 : index
    %c0_75 = arith.constant 0 : index
    %115 = vector.load %arg12[%c1_73, %c0_74, %c0_75] : memref<2x32x32xf32, #tpu.memory_space<vmem>>, vector<1x32x32xf32>
    %116 = vector.shape_cast %115 : vector<1x32x32xf32> to vector<32x32xf32>
    %cst_76 = arith.constant dense<0.000000e+00> : vector<32x32xf32>
    %117 = tpu.matmul %111, %116, %cst_76 {dimension_numbers = #tpu.dot_dimension_numbers<[1], [0], [0], [1], [0, 0, 1, 1], [], []>} : vector<32x32xf32>, vector<32x32xf32>, vector<32x32xf32> -> vector<32x32xf32>
    %118 = arith.addf %114, %117 : vector<32x32xf32>
    %c1_77 = arith.constant 1 : index
    %c0_78 = arith.constant 0 : index
    %c0_79 = arith.constant 0 : index
    %119 = vector.load %arg13[%c1_77, %c0_78, %c0_79] : memref<2x1x32xf32, #tpu.memory_space<vmem>>, vector<1x1x32xf32>
    %120 = vector.shape_cast %119 : vector<1x1x32xf32> to vector<1x32xf32>
    %121 = vector.broadcast %120 : vector<1x32xf32> to vector<32x32xf32>
    %122 = arith.addf %118, %121 : vector<32x32xf32>
    %123 = arith.negf %122 : vector<32x32xf32>
    %124 = math.exp %123 : vector<32x32xf32>
    %cst_80 = arith.constant 1.000000e+00 : f32
    %125 = vector.broadcast %cst_80 : f32 to vector<32x32xf32>
    %126 = arith.addf %125, %124 : vector<32x32xf32>
    %127 = arith.divf %125, %126 : vector<32x32xf32>
    %128 = arith.mulf %122, %127 : vector<32x32xf32>
    %c1_81 = arith.constant 1 : index
    %c0_82 = arith.constant 0 : index
    %c0_83 = arith.constant 0 : index
    %129 = vector.load %arg14[%c1_81, %c0_82, %c0_83] : memref<2x32x32xf32, #tpu.memory_space<vmem>>, vector<1x32x32xf32>
    %130 = vector.shape_cast %129 : vector<1x32x32xf32> to vector<32x32xf32>
    %cst_84 = arith.constant dense<0.000000e+00> : vector<32x32xf32>
    %131 = tpu.matmul %128, %130, %cst_84 {dimension_numbers = #tpu.dot_dimension_numbers<[1], [0], [0], [1], [0, 0, 1, 1], [], []>} : vector<32x32xf32>, vector<32x32xf32>, vector<32x32xf32> -> vector<32x32xf32>
    %132 = arith.addf %76, %131 : vector<32x32xf32>
    %c1_85 = arith.constant 1 : index
    %c0_86 = arith.constant 0 : index
    %c0_87 = arith.constant 0 : index
    %133 = vector.load %arg15[%c1_85, %c0_86, %c0_87] : memref<2x1x32xf32, #tpu.memory_space<vmem>>, vector<1x1x32xf32>
    %134 = vector.shape_cast %133 : vector<1x1x32xf32> to vector<1x32xf32>
    %135 = vector.broadcast %134 : vector<1x32xf32> to vector<32x32xf32>
    %136 = arith.addf %132, %135 : vector<32x32xf32>
    %cst_88 = arith.constant dense<0.000000e+00> : vector<128x32xf32>
    %137 = tpu.matmul %4, %136, %cst_88 {dimension_numbers = #tpu.dot_dimension_numbers<[1], [0], [0], [1], [0, 0, 1, 1], [], []>} : vector<128x32xf32>, vector<32x32xf32>, vector<128x32xf32> -> vector<128x32xf32>
    %c0_89 = arith.constant 0 : index
    %c0_90 = arith.constant 0 : index
    %138 = vector.load %arg16[%c0_89, %c0_90] : memref<32x64xf32, #tpu.memory_space<vmem>>, vector<32x64xf32>
    %cst_91 = arith.constant dense<0.000000e+00> : vector<128x64xf32>
    %139 = tpu.matmul %137, %138, %cst_91 {dimension_numbers = #tpu.dot_dimension_numbers<[1], [0], [0], [1], [0, 0, 1, 1], [], []>} : vector<128x32xf32>, vector<32x64xf32>, vector<128x64xf32> -> vector<128x64xf32>
    %140 = vector.extract_strided_slice %139 {offsets = [0, 0], sizes = [64, 32], strides = [1, 1]} : vector<128x64xf32> to vector<64x32xf32>
    %141 = vector.extract_strided_slice %139 {offsets = [64, 32], sizes = [64, 32], strides = [1, 1]} : vector<128x64xf32> to vector<64x32xf32>
    %142 = arith.addf %140, %141 : vector<64x32xf32>
    %143 = vector.extract_strided_slice %16 {offsets = [0, 64], sizes = [64, 32], strides = [1, 1]} : vector<64x96xf32> to vector<64x32xf32>
    %144 = arith.addf %142, %143 : vector<64x32xf32>
    %c0_92 = arith.constant 0 : index
    %c0_93 = arith.constant 0 : index
    %145 = vector.load %arg17[%c0_92, %c0_93] : memref<1x32xf32, #tpu.memory_space<vmem>>, vector<1x32xf32>
    %146 = vector.broadcast %145 : vector<1x32xf32> to vector<64x32xf32>
    %147 = arith.addf %144, %146 : vector<64x32xf32>
    %148 = arith.negf %147 : vector<64x32xf32>
    %149 = math.exp %148 : vector<64x32xf32>
    %cst_94 = arith.constant 1.000000e+00 : f32
    %150 = vector.broadcast %cst_94 : f32 to vector<64x32xf32>
    %151 = arith.addf %150, %149 : vector<64x32xf32>
    %152 = arith.divf %150, %151 : vector<64x32xf32>
    %153 = arith.mulf %147, %152 : vector<64x32xf32>
    %c0_95 = arith.constant 0 : index
    %c0_96 = arith.constant 0 : index
    %154 = vector.load %arg18[%c0_95, %c0_96] : memref<32x32xf32, #tpu.memory_space<vmem>>, vector<32x32xf32>
    %cst_97 = arith.constant dense<0.000000e+00> : vector<64x32xf32>
    %155 = tpu.matmul %153, %154, %cst_97 {dimension_numbers = #tpu.dot_dimension_numbers<[1], [0], [0], [1], [0, 0, 1, 1], [], []>} : vector<64x32xf32>, vector<32x32xf32>, vector<64x32xf32> -> vector<64x32xf32>
    %c0_98 = arith.constant 0 : index
    %c0_99 = arith.constant 0 : index
    %156 = vector.load %arg19[%c0_98, %c0_99] : memref<1x32xf32, #tpu.memory_space<vmem>>, vector<1x32xf32>
    %157 = vector.broadcast %156 : vector<1x32xf32> to vector<64x32xf32>
    %158 = arith.addf %155, %157 : vector<64x32xf32>
    %159 = arith.negf %158 : vector<64x32xf32>
    %160 = math.exp %159 : vector<64x32xf32>
    %cst_100 = arith.constant 1.000000e+00 : f32
    %161 = vector.broadcast %cst_100 : f32 to vector<64x32xf32>
    %162 = arith.addf %161, %160 : vector<64x32xf32>
    %163 = arith.divf %161, %162 : vector<64x32xf32>
    %164 = arith.mulf %158, %163 : vector<64x32xf32>
    %c0_101 = arith.constant 0 : index
    %c0_102 = arith.constant 0 : index
    %165 = vector.load %arg20[%c0_101, %c0_102] : memref<32x1xf32, #tpu.memory_space<vmem>>, vector<32x1xf32>
    %cst_103 = arith.constant dense<0.000000e+00> : vector<64x1xf32>
    %166 = tpu.matmul %164, %165, %cst_103 {dimension_numbers = #tpu.dot_dimension_numbers<[1], [0], [0], [1], [0, 0, 1, 1], [], []>} : vector<64x32xf32>, vector<32x1xf32>, vector<64x1xf32> -> vector<64x1xf32>
    %c0_104 = arith.constant 0 : index
    %c0_105 = arith.constant 0 : index
    %167 = vector.load %arg21[%c0_104, %c0_105] : memref<1x1xf32, #tpu.memory_space<vmem>>, vector<1x1xf32>
    %168 = vector.broadcast %167 : vector<1x1xf32> to vector<64x1xf32>
    %169 = arith.addf %166, %168 : vector<64x1xf32>
    %170 = math.sqrt %12 : vector<64x1xf32>
    %cst_106 = arith.constant 1.000000e+00 : f32
    %171 = vector.broadcast %cst_106 : f32 to vector<64x1xf32>
    %172 = arith.addf %170, %171 : vector<64x1xf32>
    %173 = tpu.reciprocal %172 {approx = true} : vector<64x1xf32> -> vector<64x1xf32>
    %174 = arith.mulf %173, %169 : vector<64x1xf32>
    %175 = vector.broadcast %174 : vector<64x1xf32> to vector<64x3xf32>
    %176 = arith.mulf %9, %175 : vector<64x3xf32>
    %cst_107 = arith.constant dense<0.000000e+00> : vector<32x3xf32>
    %177 = tpu.matmul %5, %176, %cst_107 {dimension_numbers = #tpu.dot_dimension_numbers<[0], [0], [1], [1], [0, 1, 1, 1], [], []>} : vector<64x32xf32>, vector<64x3xf32>, vector<32x3xf32> -> vector<32x3xf32>
    %cst_108 = arith.constant 0.00999999977 : f32
    %178 = vector.broadcast %cst_108 : f32 to vector<32x3xf32>
    %179 = arith.mulf %177, %178 : vector<32x3xf32>
    %180 = vector.broadcast %2 : vector<32x1xf32> to vector<32x3xf32>
    %181 = arith.mulf %179, %180 : vector<32x3xf32>
    %182 = arith.addf %1, %181 : vector<32x3xf32>
    %c0_109 = arith.constant 0 : index
    %c0_110 = arith.constant 0 : index
    %183 = vector.load %arg24[%c0_109, %c0_110] : memref<32x3xf32, #tpu.memory_space<vmem>>, vector<32x3xf32>
    tpu.vector_store %arg24[%c0_109, %c0_110], %182 {strides = array<i32>} : memref<32x3xf32, #tpu.memory_space<vmem>>, vector<32x3xf32>,
    %c0_111 = arith.constant 0 : index
    %c0_112 = arith.constant 0 : index
    %184 = vector.load %arg23[%c0_111, %c0_112] : memref<32x32xf32, #tpu.memory_space<vmem>>, vector<32x32xf32>
    tpu.vector_store %arg23[%c0_111, %c0_112], %136 {strides = array<i32>} : memref<32x32xf32, #tpu.memory_space<vmem>>, vector<32x32xf32>,
    return
  }
}

</mosaic_0001>

<bundles_post_ra>
// kernel: tpu_custom_call.1
= control target key start
LH: loop header
LB: loop body
LE: loop exit
PB: predicated region body
PF: predicated region fallthrough
CT: control target
= control target key end

     0   :  { %s6837_s0 = inlined_call_operand.hbm [shape: f32[32,32], index: 0, kind: input, shape index: {}]   ;;  %s6838_s1 = inlined_call_operand.vmem [shape: f32[32,3], index: 1, kind: input, shape index: {}]   ;;  %s6839_s2 = inlined_call_operand.vmem [shape: f32[64,3], index: 2, kind: input, shape index: {}]   ;;  %s6840_s3 = inlined_call_operand.vmem [shape: bf16[128,32], index: 3, kind: input, shape index: {}]   ;;  %s6841_s4 = inlined_call_operand.vmem [shape: f32[32,1], index: 4, kind: input, shape index: {}]   ;;  %s6842_s5 = inlined_call_operand.vmem [shape: f32[2,32,64], index: 5, kind: input, shape index: {}]   ;;  %s6843_s6 = inlined_call_operand.hbm [shape: f32[2,1,32], index: 6, kind: input, shape index: {}]   ;;  %s6844_s7 = inlined_call_operand.vmem [shape: f32[2,32,32], index: 7, kind: input, shape index: {}]   ;;  %s6845_s8 = inlined_call_operand.hbm [shape: f32[2,1,32], index: 8, kind: input, shape index: {}]   ;;  %s6846_s9 = inlined_call_operand.vmem [shape: f32[2,32,1], index: 9, kind: input, shape index: {}]   ;;  %s6847_s10 = inlined_call_operand.vmem [shape: f32[2,1,1], index: 10, kind: input, shape index: {}]   ;;  %s6848_s11 = inlined_call_operand.vmem [shape: f32[2,32,32], index: 11, kind: input, shape index: {}]   ;;  %s6849_s12 = inlined_call_operand.vmem [shape: f32[2,32,32], index: 12, kind: input, shape index: {}]   ;;  %s6850_s13 = inlined_call_operand.hbm [shape: f32[2,1,32], index: 13, kind: input, shape index: {}]   ;;  %s6851_s14 = inlined_call_operand.vmem [shape: f32[2,32,32], index: 14, kind: input, shape index: {}]   ;;  %s6852_s15 = inlined_call_operand.hbm [shape: f32[2,1,32], index: 15, kind: input, shape index: {}]   ;;  %s6853_s16 = inlined_call_operand.vmem [shape: f32[32,64], index: 16, kind: input, shape index: {}]   ;;  %s6854_s17 = inlined_call_operand.hbm [shape: f32[1,32], index: 17, kind: input, shape index: {}]   ;;  %s6855_s18 = inlined_call_operand.vmem [shape: f32[32,32], index: 18, kind: input, shape index: {}]   ;;  %s6856_s19 = inlined_call_operand.vmem [shape: f32[1,32], index: 19, kind: input, shape index: {}]   ;;  %s6857_s20 = inlined_call_operand.vmem [shape: f32[32,1], index: 20, kind: input, shape index: {}]   ;;  %s6858_s21 = inlined_call_operand.<no memory space> [shape: f32[1,1], index: 21, kind: input, shape index: {}]   ;;  %s6859_s22 = inlined_call_operand.vmem [shape: f32[4,96], index: 22, kind: input, shape index: {}]   ;;  %s6860_s23 = inlined_call_operand.hbm [shape: f32[32,32], index: 23, kind: output, shape index: {0}]   ;;  %s6861_s24 = inlined_call_operand.vmem [shape: f32[32,3], index: 24, kind: output, shape index: {1}]  }
   0x1   :  { %6887 = sst [smem:[#allocation31_spill]] %s6837_s0  ;;  %v30_v0 = vstv %s6858_s21 }
   0x2   :  { %6888 = sst [smem:[#allocation32_spill]] %s6838_s1  ;;  %31 = vst [vmem:[#allocation2] sm:$0x1] %v30_v0 }
   0x3   :  { %6889 = sst [smem:[#allocation33_spill]] %s6839_s2 }
   0x4   :  { %6890 = sst [smem:[#allocation34_spill]] %s6840_s3 }
   0x5   :  { %6891 = sst [smem:[#allocation35_spill]] %s6841_s4 }
   0x6   :  { %6892 = sst [smem:[#allocation36_spill]] %s6842_s5 }
   0x7   :  { %6893 = sst [smem:[#allocation37_spill]] %s6843_s6 }
   0x8   :  { %6894 = sst [smem:[#allocation38_spill]] %s6844_s7 }
   0x9   :  { %6895 = sst [smem:[#allocation39_spill]] %s6845_s8 }
   0xa   :  { %32 = vsyncpa [#allocation4], 0 }
   0xb   :  { %33 = vsyncpa [#allocation7], 0 }
   0xc   :  { %34 = vsyncpa [#allocation10], 0 }
   0xd   :  { %35 = vsyncpa [#allocation13], 0 }
   0xe   :  { %36 = vsyncpa [#allocation5], 0  ;;  %s5709_s5 = smov [#allocation6]   ;;  %s6896_s6 = sld [smem:[#allocation37_spill]] }
   0xf   :  { %s64_s10 = sshll.u32 %s5709_s5, 4  ;;  %s65_s10 = int_to_ptr.vmem [resolvable:$true] %s64_s10 }
  0x14   :  { %s5545_s27 = scalar_lea.hbm %s6896_s6, 32 }
  0x15   :  { %p5546_p0 = scmp.ne.s32.totalorder %s6896_s6, %s5545_s27  ;;  %p5549_p1 = scmp.lt.u32.totalorder %s5545_s27, %s6896_s6 }
  0x17   :  { %p5551_p2 = pnand %p5549_p1, %p5546_p0 }
  0x19   :  { %5554 = shalt.err (!%p5551_p2)
}
  0x1a   :  { %s5555_s21 = scalar_lea.vmem %s65_s10, 32  ;;  %p5560_p4 = scmp.lt.s32.totalorder %s65_s10, %s65_s10 }
  0x1b   :  { %p5556_p3 = scmp.ne.s32.totalorder %s65_s10, %s5555_s21  ;;  %p5561_p5 = scmp.lt.s32.totalorder %s5555_s21, %s5555_s21 }
  0x1d   :  { %p5562_p6 = por %p5561_p5, %p5560_p4 }
  0x1f   :  { %p5563_p7 = pnand %p5562_p6, %p5556_p3 }
  0x21   :  { %5566 = shalt.err (!%p5563_p7)
}
  0x22   :  { %s6871_s0 = smov 16   ;;  %s5711_s30 = smov 1  }
  0x23   :  { %70 = dma.hbm_to_vmem [thread:$0]  %s6896_s6, 32, %s65_s10, [#allocation7], %s6871_s0, %s6871_s0, %s5711_s30  }
  0x24   :  { %s5712_s25 = smov [#allocation9]   ;;  %s5713_s9 = smov [#allocation3]  }
  0x25   :  { %s98_s4 = sshll.u32 %s5712_s25, 4  ;;  %s42_s5 = sshll.u32 %s5713_s9, 4  ;;  %s99_s4 = int_to_ptr.vmem [resolvable:$true] %s98_s4  ;;  %s43_s5 = int_to_ptr.vmem [resolvable:$true] %s42_s5 }
  0x26   :  { %s5567_s27 = scalar_lea.hbm %s6850_s13, 32 }
  0x27   :  { %p5568_p8 = scmp.ne.s32.totalorder %s6850_s13, %s5567_s27  ;;  %p5571_p9 = scmp.lt.u32.totalorder %s5567_s27, %s6850_s13 }
  0x29   :  { %p5573_p10 = pnand %p5571_p9, %p5568_p8 }
  0x2b   :  { %5576 = shalt.err (!%p5573_p10)
}
  0x2c   :  { %s5577_s10 = scalar_lea.vmem %s99_s4, 32  ;;  %p5582_p12 = scmp.lt.s32.totalorder %s99_s4, %s99_s4 }
  0x2d   :  { %p5578_p11 = scmp.ne.s32.totalorder %s99_s4, %s5577_s10  ;;  %p5583_p13 = scmp.lt.s32.totalorder %s5577_s10, %s5577_s10 }
  0x2f   :  { %p5584_p0 = por %p5583_p13, %p5582_p12 }
  0x31   :  { %p5585_p1 = pnand %p5584_p0, %p5578_p11 }
  0x33   :  { %5588 = shalt.err (!%p5585_p1)
}
  0x34   :  { %104 = dma.hbm_to_vmem [thread:$0]  %s6850_s13, 32, %s99_s4, [#allocation10], %s6871_s0, %s6871_s0, %s5711_s30  }
  0x35   :  { %s6897_s25 = sld [smem:[#allocation31_spill]] }
  0x3b   :  { %s5589_s9 = scalar_lea.hbm %s6897_s25, 512 }
  0x3c   :  { %p5590_p2 = scmp.ne.s32.totalorder %s6897_s25, %s5589_s9  ;;  %p5593_p3 = scmp.lt.u32.totalorder %s5589_s9, %s6897_s25 }
  0x3e   :  { %p5595_p4 = pnand %p5593_p3, %p5590_p2 }
  0x40   :  { %5598 = shalt.err (!%p5595_p4)
}
  0x41   :  { %s5599_s2 = scalar_lea.vmem %s43_s5, 512  ;;  %p5604_p6 = scmp.lt.s32.totalorder %s43_s5, %s43_s5 }
  0x42   :  { %p5600_p5 = scmp.ne.s32.totalorder %s43_s5, %s5599_s2  ;;  %p5605_p7 = scmp.lt.s32.totalorder %s5599_s2, %s5599_s2 }
  0x44   :  { %p5606_p8 = por %p5605_p7, %p5604_p6 }
  0x46   :  { %p5607_p9 = pnand %p5606_p8, %p5600_p5 }
  0x48   :  { %5610 = shalt.err (!%p5607_p9)
}
  0x49   :  { %s5714_s13 = smov 128   ;;  %s5715_s4 = smov 8  }
  0x4a   :  { %48 = dma.hbm_to_vmem [thread:$0]  %s6897_s25, 512, %s43_s5, [#allocation4], %s5714_s13, %s5714_s13, %s5715_s4  }
  0x4b   :  { %s5716_s10 = smov [#allocation8]   ;;  %s5717_s21 = smov [#allocation11]  }
  0x4c   :  { %s78_s6 = sshll.u32 %s5716_s10, 4  ;;  %s112_s8 = sshll.u32 %s5717_s21, 4  ;;  %s79_s6 = int_to_ptr.vmem [resolvable:$true] %s78_s6  ;;  %s113_s8 = int_to_ptr.vmem [resolvable:$true] %s112_s8 }
  0x4d   :  { %s6898_s1 = sld [smem:[#allocation39_spill]] }
  0x53   :  { %s5611_s26 = scalar_lea.hbm %s6898_s1, 32 }
  0x54   :  { %p5612_p10 = scmp.ne.s32.totalorder %s6898_s1, %s5611_s26  ;;  %p5615_p11 = scmp.lt.u32.totalorder %s5611_s26, %s6898_s1 }
  0x56   :  { %p5617_p12 = pnand %p5615_p11, %p5612_p10 }
  0x58   :  { %5620 = shalt.err (!%p5617_p12)
}
  0x59   :  { %s5621_s5 = scalar_lea.vmem %s79_s6, 32  ;;  %p5626_p0 = scmp.lt.s32.totalorder %s79_s6, %s79_s6 }
  0x5a   :  { %p5622_p13 = scmp.ne.s32.totalorder %s79_s6, %s5621_s5  ;;  %p5627_p1 = scmp.lt.s32.totalorder %s5621_s5, %s5621_s5 }
  0x5c   :  { %p5628_p2 = por %p5627_p1, %p5626_p0 }
  0x5e   :  { %p5629_p3 = pnand %p5628_p2, %p5622_p13 }
  0x60   :  { %5632 = shalt.err (!%p5629_p3)
}
  0x61   :  { %s6899_s25 = smov 16   ;;  %s5633_s21 = scalar_lea.hbm %s6852_s15, 32 }
  0x62   :  { %84 = dma.hbm_to_vmem [thread:$0]  %s6898_s1, 32, %s79_s6, [#allocation7], %s6899_s25, %s6899_s25, %s5711_s30  }
  0x63   :  { %p5634_p4 = scmp.ne.s32.totalorder %s6852_s15, %s5633_s21  ;;  %p5637_p5 = scmp.lt.u32.totalorder %s5633_s21, %s6852_s15 }
  0x65   :  { %p5639_p6 = pnand %p5637_p5, %p5634_p4 }
  0x67   :  { %5642 = shalt.err (!%p5639_p6)
}
  0x68   :  { %s5643_s28 = scalar_lea.vmem %s113_s8, 32  ;;  %p5648_p8 = scmp.lt.s32.totalorder %s113_s8, %s113_s8 }
  0x69   :  { %p5644_p7 = scmp.ne.s32.totalorder %s113_s8, %s5643_s28  ;;  %p5649_p9 = scmp.lt.s32.totalorder %s5643_s28, %s5643_s28 }
  0x6b   :  { %p5650_p10 = por %p5649_p9, %p5648_p8 }
  0x6d   :  { %p5651_p11 = pnand %p5650_p10, %p5644_p7 }
  0x6f   :  { %5654 = shalt.err (!%p5651_p11)
}
  0x70   :  { %118 = dma.hbm_to_vmem [thread:$0]  %s6852_s15, 32, %s113_s8, [#allocation10], %s6899_s25, %s6899_s25, %s5711_s30  }
  0x71   :  { %s5718_s2 = smov [#allocation12]   ;;  %s5655_s10 = scalar_lea.hbm %s6854_s17, 16 }
  0x72   :  { %s127_s5 = sshll.u32 %s5718_s2, 4  ;;  %p5656_p12 = scmp.ne.s32.totalorder %s6854_s17, %s5655_s10  ;;  %s128_s5 = int_to_ptr.vmem [resolvable:$true] %s127_s5 }
  0x73   :  { %p5659_p13 = scmp.lt.u32.totalorder %s5655_s10, %s6854_s17 }
  0x75   :  { %p5661_p0 = pnand %p5659_p13, %p5656_p12 }
  0x77   :  { %5664 = shalt.err (!%p5661_p0)
}
  0x78   :  { %s5665_s26 = scalar_lea.vmem %s128_s5, 16  ;;  %s5669_s15 = scalar_lea.vmem %s128_s5, 32 }
  0x79   :  { %p5666_p1 = scmp.ne.s32.totalorder %s128_s5, %s5665_s26  ;;  %p5670_p2 = scmp.lt.s32.totalorder %s128_s5, %s128_s5 }
  0x7a   :  { %p5671_p3 = scmp.lt.s32.totalorder %s5669_s15, %s5665_s26 }
  0x7c   :  { %p5672_p4 = por %p5671_p3, %p5670_p2 }
  0x7e   :  { %p5673_p5 = pnand %p5672_p4, %p5666_p1 }
  0x80   :  { %5676 = shalt.err (!%p5673_p5)
}
  0x81   :  { %130 = dma.hbm_to_vmem [thread:$0]  %s6854_s17, 16, %s128_s5, [#allocation13]  }
  0x82   :  { %5699 = dma.done.wait [#allocation4], 512  }
  0x83   :  { %5700 = vsyncadd [#allocation4], 4294966784 }
  0x84   :  { %5701 = dma.done.wait [#allocation7], 64  }
  0x85   :  { %5702 = vsyncadd [#allocation7], 4294967232 }
  0x86   :  { %5703 = dma.done.wait [#allocation10], 64  }
  0x87   :  { %5704 = vsyncadd [#allocation10], 4294967232 }
  0x88   :  { %5705 = dma.done.wait [#allocation13], 16  }
  0x89   :  { %5706 = vsyncadd [#allocation13], 4294967280  ;;  %s6900_s6 = sld [smem:[#allocation32_spill]]  ;;  %s6901_s21 = sld [smem:[#allocation34_spill]]  ;;  %vm203_vm0 = vcmask 261120   ;;  %vm413_vm1 = vcmask 23552  }
  0x8a   :  { %s6902_s26 = sld [smem:[#allocation33_spill]]  ;;  %vm513_vm2 = vcmask 1043456   ;;  %s6911_s15 = sld [smem:[#allocation36_spill]]  ;;  %vm478_vm3 = vcmask 7168   ;;  %vm488_vm4 = vcmask 31744   ;;  %vm1311_vm5 = vcmask 523264  }
  0x8b   :  { %s5719_s1 = smov 96   ;;  %s6915_s29 = sld [smem:[#allocation38_spill]] }
  0x8c   :  { %s6919_s3 = sld [smem:[#allocation35_spill]] }
  0x8f   :  { %v163_v1 = vld [vmem:[%s6900_s6] sm:$0xff]  ;;  %v164_v2 = vld [vmem:[%s6900_s6 + $0x8] sm:$0xff]  ;;  %v165_v3 = vld [vmem:[%s6900_s6 + $0x10] sm:$0xff] }
  0x90   :  { %v5076_v4 = vpack.c.bf16 %v164_v2, %v163_v1  ;;  %v166_v5 = vld [vmem:[%s6900_s6 + $0x18] sm:$0xff]  ;;  %v4289_v6 = vld [vmem:[%s6901_s21] sm:$0xff]   ;;  %v439_v9 = vld [vmem:[%s6902_s26 + $0x8] sm:$0xff] }
  0x91   :  { %v5080_v7 = vpack.c.bf16 %v166_v5, %v165_v3  ;;  %v5953_v8 = vunpack.c.l.bf16 %v4289_v6  ;;  %v4320_v10 = vld [vmem:[%s6901_s21 + $0x8] sm:$0xff]   ;;  %456 = vrot.lane.b32.xlu1 %v439_v9, %s5711_s30  ;;  %v438_v11 = vld [vmem:[%s6902_s26] sm:$0xff]  ;;  %v440_v12 = vld [vmem:[%s6902_s26 + $0x10] sm:$0xff]  ;;  %v5971_v13 = vunpack.c.h.bf16 %v4289_v6 }
  0x92   :  { %5077 = vmatprep.subr.bf16.mxu0 %v5076_v4  ;;  %454 = vrot.lane.b32.xlu0 %v438_v11, %s5711_s30  ;;  %v442_v14 = vld [vmem:[%s6902_s26 + $0x20] sm:$0xff]  ;;  %v5976_v15 = vunpack.c.l.bf16 %v4320_v10  ;;  %v4321_v16 = vld [vmem:[%s6901_s21 + $0x10] sm:$0xff]   ;;  %v441_v17 = vld [vmem:[%s6902_s26 + $0x18] sm:$0xff]  ;;  %v5988_v18 = vunpack.c.h.bf16 %v4320_v10 }
  0x93   :  { %5079 = vmatpush3.bf16.msra.mxu0 %v5076_v4  ;;  %4616 = vmatprep.mubr.msk.f32.mxu0 %vm203_vm0, %v5953_v8  ;;  %v5992_v19 = vunpack.c.l.bf16 %v4321_v16  ;;  %v4322_v20 = vld [vmem:[%s6901_s21 + $0x18] sm:$0xff]   ;;  %v443_v21 = vld [vmem:[%s6902_s26 + $0x28] sm:$0xff]  ;;  %v6003_v22 = vunpack.c.h.bf16 %v4321_v16  ;;  %v4323_v24 = vld [vmem:[%s6901_s21 + $0x20] sm:$0xff]  }
  0x94   :  { %5081 = vmatprep.subr.bf16.mxu0 %v5080_v7  ;;  %v6007_v23 = vunpack.c.l.bf16 %v4322_v20  ;;  %v6015_v25 = vunpack.c.h.bf16 %v4322_v20  ;;  %v6019_v26 = vunpack.c.l.bf16 %v4323_v24  ;;  %v4324_v27 = vld [vmem:[%s6901_s21 + $0x28] sm:$0xff]   ;;  %v6026_v28 = vunpack.c.h.bf16 %v4323_v24  ;;  %v4325_v30 = vld [vmem:[%s6901_s21 + $0x30] sm:$0xff]   ;;  %v4326_v33 = vld [vmem:[%s6901_s21 + $0x38] sm:$0xff]  }
  0x95   :  { %458 = vrot.lane.b32.xlu1 %v440_v12, %s5711_s30  ;;  %v6030_v29 = vunpack.c.l.bf16 %v4324_v27  ;;  %v6037_v31 = vunpack.c.h.bf16 %v4324_v27  ;;  %v6041_v32 = vunpack.c.l.bf16 %v4325_v30  ;;  %v6048_v34 = vunpack.c.h.bf16 %v4325_v30  ;;  %v487_v16 = vld [vmem:[%s6859_s22] sm:$0xf]  ;;  %v444_v27 = vld [vmem:[%s6902_s26 + $0x30] sm:$0xff]  ;;  %s5720_s22 = smov 64  }
  0x96   :  { %462 = vrot.lane.b32.xlu0 %v442_v14, %s5711_s30  ;;  %v6052_v35 = vunpack.c.l.bf16 %v4326_v33  ;;  %v6056_v36 = vunpack.c.h.bf16 %v4326_v33  ;;  %4640 = vmatprep.subr.msk.mxu1 %vm513_vm2, %v487_v16  ;;  %v6108_v20 = vld [vmem:[#allocation3] sm:$0xff] }
  0x97   :  { %5083 = vmatpush3.bf16.msra.mxu0 %v5080_v7  ;;  %4641 = vmatpush3.msk.msra.mxu1 %vm513_vm2, %v487_v16  ;;  %v767_v30 = vld [vmem:[%s6911_s15] sm:$0xff]  ;;  %v768_v33 = vld [vmem:[%s6911_s15 + $0x8] sm:$0xff] }
  0x99   :  { %460 = vrot.lane.b32.xlu1 %v441_v17, %s5711_s30  ;;  %v445_v17 = vld [vmem:[%s6902_s26 + $0x38] sm:$0xff]  ;;  %s5722_s26 = smov [#allocation14]  }
  0x9a   :  { %4617 = vmatmul.mubr.msk.f32.vlgmr.msra.gmra.mrb[0].mxu0 %vm203_vm0, %v5971_v13  ;;  %s3993_s27 = sshll.u32 %s5722_s26, 4  ;;  %s3994_s27 = int_to_ptr.vmem [resolvable:$true] %s3993_s27 }
  0x9b   :  { %4619 = vmatprep.mubr.msk.f32.mxu0 %vm203_vm0, %v5976_v15  ;;  %s5677_s28 = scalar_lea.vmem %s3994_s27, 512  ;;  %p5682_p7 = scmp.lt.s32.totalorder %s3994_s27, %s3994_s27 }
  0x9c   :  { %p5678_p6 = scmp.ne.s32.totalorder %s3994_s27, %s5677_s28  ;;  %p5683_p8 = scmp.lt.s32.totalorder %s5677_s28, %s5677_s28 }
  0x9d   :  { %464 = vrot.lane.b32.xlu1 %v443_v21, %s5711_s30  ;;  %v6110_v21 = vld [vmem:[#allocation3 + $0x8] sm:$0xff] }
  0x9e   :  { %4620 = vmatmul.mubr.msk.f32.gmra.mrb[2].mxu0 %vm203_vm0, %v5988_v18  ;;  %v5084_v24 = vpack.c.bf16 %v6110_v21, %v6108_v20  ;;  %p5684_p9 = por %p5683_p8, %p5682_p7 }
  0x9f   :  { %4622 = vmatprep.mubr.msk.f32.mxu0 %vm203_vm0, %v5992_v19 }
  0xa0   :  { %5085 = vmatprep.subr.bf16.mxu1 %v5084_v24  ;;  %p5685_p10 = pnand %p5684_p9, %p5678_p6 }
  0xa2   :  { %4623 = vmatmul.mubr.msk.f32.gmra.mrb[4].mxu0 %vm203_vm0, %v6003_v22 }
  0xa3   :  { %4625 = vmatprep.mubr.msk.f32.mxu0 %vm203_vm0, %v6007_v23 }
  0xa6   :  { %4626 = vmatmul.mubr.msk.f32.gmra.mrb[6].mxu0 %vm203_vm0, %v6015_v25 }
  0xa7   :  { %4628 = vmatprep.mubr.msk.f32.mxu0 %vm203_vm0, %v6019_v26 }
  0xaa   :  { %4629 = vmatmul.mubr.msk.f32.gmra.mrb[8].mxu0 %vm203_vm0, %v6026_v28 }
  0xab   :  { %4631 = vmatprep.mubr.msk.f32.mxu0 %vm203_vm0, %v6030_v29 }
  0xae   :  { %4632 = vmatmul.mubr.msk.f32.gmra.mrb[10].mxu0 %vm203_vm0, %v6037_v31 }
  0xaf   :  { %4634 = vmatprep.mubr.msk.f32.mxu0 %vm203_vm0, %v6041_v32 }
  0xb2   :  { %4635 = vmatmul.mubr.msk.f32.gmra.mrb[12].mxu0 %vm203_vm0, %v6048_v34 }
  0xb3   :  { %4637 = vmatprep.mubr.msk.f32.mxu0 %vm203_vm0, %v6052_v35 }
  0xb6   :  { %4638 = vmatmul.mubr.msk.f32.gmra.mrb[14].mxu0 %vm203_vm0, %v6056_v36 }
 0x16d   :  { %v4618_v37 = vpop.f32.mrb[0].mxu0 }
 0x16e   :  { %v318_v38 = vpop.f32.mrb[1].mxu0 }
 0x171   :  { %v4621_v39 = vpop.f32.mrb[2].mxu0 }
 0x172   :  { %v328_v40 = vpop.f32.mrb[3].mxu0 }
 0x175   :  { %v4624_v41 = vpop.f32.mrb[4].mxu0 }
 0x176   :  { %v338_v42 = vpop.f32.mrb[5].mxu0 }
 0x179   :  { %v4627_v43 = vpop.f32.mrb[6].mxu0 }
 0x17a   :  { %v348_v44 = vpop.f32.mrb[7].mxu0 }
 0x17d   :  { %v4630_v45 = vpop.f32.mrb[8].mxu0 }
 0x17e   :  { %v6062_v46 = vsub.f32 %v4618_v37, %v4630_v45  ;;  %v358_v47 = vpop.f32.mrb[9].mxu0  ;;  %v5092_v37 = vpack.c.bf16 %v768_v33, %v767_v30 }
 0x17f   :  { %v6064_v48 = vsub.f32 %v318_v38, %v358_v47  ;;  %v457_v38 = vpop.permute.xlu1 %456 }
 0x180   :  { %6903 = vst [vmem:[#allocation20_spill] sm:$0xff] %v6062_v46  ;;  %v406_v49 = vmul.f32 %v6062_v46, %v6062_v46  ;;  %5093 = vmatprep.subr.bf16.mxu0 %v5092_v37 }
 0x181   :  { %6904 = vst [vmem:[#allocation21_spill] sm:$0xff] %v6064_v48  ;;  %v4633_v50 = vpop.f32.mrb[10].mxu0  ;;  %v405_v54 = vmul.f32 %v6064_v48, %v6064_v48  ;;  %5095 = vmatpush3.bf16.msra.mxu0 %v5092_v37 }
 0x182   :  { %v6068_v51 = vsub.f32 %v4621_v39, %v4633_v50  ;;  %v368_v52 = vpop.f32.mrb[11].mxu0  ;;  %v417_v53 = vsel %vm413_vm1, %v406_v49, 0.0  ;;  %v6131_v49 = vld [vmem:[#allocation3 + $0x10] sm:$0xff]  ;;  %v6133_v50 = vld [vmem:[#allocation3 + $0x18] sm:$0xff] }
 0x183   :  { %v6073_v55 = vsub.f32 %v328_v40, %v368_v52  ;;  %418 = vadd.xlane.f32.xlu0 %v417_v53  ;;  %v414_v60 = vsel %vm413_vm1, %v405_v54, 0.0  ;;  %v459_v39 = vpop.permute.xlu1 %458  ;;  %v455_v40 = vpop.permute.xlu0 %454  ;;  %v5088_v53 = vpack.c.bf16 %v6133_v50, %v6131_v49 }
 0x184   :  { %6905 = vst [vmem:[#allocation22_spill] sm:$0xff] %v6068_v51  ;;  %v408_v56 = vmul.f32 %v6068_v51, %v6068_v51 }
 0x185   :  { %6906 = vst [vmem:[#allocation23_spill] sm:$0xff] %v6073_v55  ;;  %v4636_v57 = vpop.f32.mrb[12].mxu0  ;;  %v407_v62 = vmul.f32 %v6073_v55, %v6073_v55 }
 0x186   :  { %v6077_v58 = vsub.f32 %v4624_v41, %v4636_v57  ;;  %v378_v59 = vpop.f32.mrb[13].mxu0  ;;  %v423_v61 = vsel %vm413_vm1, %v408_v56, 0.0 }
 0x187   :  { %v6083_v63 = vsub.f32 %v338_v42, %v378_v59  ;;  %415 = vadd.xlane.f32.xlu0 %v414_v60  ;;  %424 = vadd.xlane.f32.xlu1 %v423_v61  ;;  %v420_v4 = vsel %vm413_vm1, %v407_v62, 0.0  ;;  %v461_v41 = vpop.permute.xlu1 %460  ;;  %v463_v42 = vpop.permute.xlu0 %462 }
 0x188   :  { %6907 = vst [vmem:[#allocation24_spill] sm:$0xff] %v6077_v58  ;;  %v410_v5 = vmul.f32 %v6077_v58, %v6077_v58 }
 0x189   :  { %6908 = vst [vmem:[#allocation25_spill] sm:$0xff] %v6083_v63  ;;  %v4639_v0 = vpop.f32.mrb[14].mxu0  ;;  %v409_v1 = vmul.f32 %v6083_v63, %v6083_v63 }
 0x18a   :  { %v6087_v2 = vsub.f32 %v4627_v43, %v4639_v0  ;;  %v388_v3 = vpop.f32.mrb[15].mxu0  ;;  %v429_v10 = vsel %vm413_vm1, %v410_v5, 0.0 }
 0x18b   :  { %v6092_v6 = vsub.f32 %v348_v44, %v388_v3  ;;  %421 = vadd.xlane.f32.xlu1 %v420_v4  ;;  %v426_v7 = vsel %vm413_vm1, %v409_v1, 0.0  ;;  %v465_v43 = vpop.permute.xlu1 %464 }
 0x18c   :  { %6909 = vst [vmem:[#allocation26_spill] sm:$0xff] %v6087_v2  ;;  %427 = vadd.xlane.f32.xlu0 %v426_v7  ;;  %v412_v11 = vmul.f32 %v6087_v2, %v6087_v2 }
 0x18d   :  { %6910 = vst [vmem:[#allocation27_spill] sm:$0xff] %v6092_v6  ;;  %v411_v9 = vmul.f32 %v6092_v6, %v6092_v6 }
 0x18e   :  { %v435_v14 = vsel %vm413_vm1, %v412_v11, 0.0  ;;  %v770_v11 = vld [vmem:[%s6911_s15 + $0x18] sm:$0xff] }
 0x18f   :  { %430 = vadd.xlane.f32.xlu1 %v429_v10  ;;  %v432_v12 = vsel %vm413_vm1, %v411_v9, 0.0  ;;  %v769_v10 = vld [vmem:[%s6911_s15 + $0x10] sm:$0xff] }
 0x190   :  { %433 = vadd.xlane.f32.xlu0 %v432_v12  ;;  %v5096_v12 = vpack.c.bf16 %v770_v11, %v769_v10 }
 0x192   :  { %5097 = vmatprep.subr.bf16.mxu0 %v5096_v12 }
 0x193   :  { %436 = vadd.xlane.f32.xlu1 %v435_v14  ;;  %5099 = vmatpush3.bf16.msra.mxu0 %v5096_v12 }
 0x1a4   :  { %468 = vrot.lane.b32.xlu1 %v445_v17, %s5711_s30 }
 0x1a6   :  { %466 = vrot.lane.b32.xlu0 %v444_v27, %s5711_s30 }
 0x210   :  { %v6125_v44 = vpop.xlane.xlu0 %418 }
 0x211   :  { %v480_v54 = vsel %vm478_vm3, %v6125_v44, %v457_v38  ;;  %vm3744_vm6 = vcmp.eq.f32.partialorder %v6125_v44, inf  ;;  %vm3746_vm8 = vcmp.eq.f32.partialorder %v6125_v44, 0.0 }
 0x214   :  { %v6127_v45 = vpop.xlane.xlu0 %415  ;;  %v6129_v47 = vpop.xlane.xlu1 %424 }
 0x215   :  { %v479_v52 = vsel %vm478_vm3, %v6127_v45, %v455_v40  ;;  %v482_v61 = vsel %vm478_vm3, %v6129_v47, %v461_v41  ;;  %vm3737_vm7 = vcmp.eq.f32.partialorder %v6127_v45, inf  ;;  %vm3739_vm9 = vcmp.eq.f32.partialorder %v6127_v45, 0.0 }
 0x216   :  { %4642 = vmatprep.mubr.msk.f32.mxu1 %vm488_vm4, %v479_v52  ;;  %vm3758_vm10 = vcmp.eq.f32.partialorder %v6129_v47, inf  ;;  %vm3760_vm12 = vcmp.eq.f32.partialorder %v6129_v47, 0.0 }
 0x217   :  { %4643 = vmatmul.mubr.msk.f32.vlgmr.msra.gmra.mrb[0].mxu1 %vm488_vm4, %v480_v54 }
 0x218   :  { %v6142_v56 = vpop.xlane.xlu1 %421  ;;  %5087 = vmatpush3.bf16.msra.mxu1 %v5084_v24 }
 0x219   :  { %v6145_v57 = vpop.xlane.xlu0 %427  ;;  %v481_v59 = vsel %vm478_vm3, %v6142_v56, %v459_v39  ;;  %5089 = vmatprep.subr.bf16.mxu1 %v5088_v53  ;;  %vm3751_vm11 = vcmp.eq.f32.partialorder %v6142_v56, inf  ;;  %vm3753_vm13 = vcmp.eq.f32.partialorder %v6142_v56, 0.0 }
 0x21a   :  { %6912 = vst [vmem:[#allocation28_spill] sm:$0xff] %v6145_v57  ;;  %v483_v60 = vsel %vm478_vm3, %v6145_v57, %v463_v42  ;;  %4645 = vmatprep.mubr.msk.f32.mxu1 %vm488_vm4, %v481_v59 }
 0x21b   :  { %4646 = vmatmul.mubr.msk.f32.gmra.mrb[2].mxu1 %vm488_vm4, %v482_v61 }
 0x21c   :  { %v6154_v62 = vpop.xlane.xlu1 %430  ;;  %4648 = vmatprep.mubr.msk.f32.mxu1 %vm488_vm4, %v483_v60  ;;  %5091 = vmatpush3.bf16.msra.mxu1 %v5088_v53 }
 0x21d   :  { %v6157_v0 = vpop.xlane.xlu0 %433  ;;  %v484_v1 = vsel %vm478_vm3, %v6154_v62, %v465_v43  ;;  %vm3772_vm14 = vcmp.eq.f32.partialorder %v6154_v62, inf }
 0x21e   :  { %6913 = vst [vmem:[#allocation29_spill] sm:$0xff] %v6157_v0 }
 0x21f   :  { %4649 = vmatmul.mubr.msk.f32.gmra.mrb[4].mxu1 %vm488_vm4, %v484_v1 }
 0x220   :  { %v6162_v3 = vpop.xlane.xlu1 %436 }
 0x221   :  { %6914 = vst [vmem:[#allocation30_spill] sm:$0xff] %v6162_v3  ;;  %v467_v4 = vpop.permute.xlu0 %466 }
 0x222   :  { %v485_v5 = vsel %vm478_vm3, %v6157_v0, %v467_v4 }
 0x223   :  { %4651 = vmatprep.mubr.msk.f32.mxu1 %vm488_vm4, %v485_v5 }
 0x224   :  { %v469_v7 = vpop.permute.xlu1 %468 }
 0x225   :  { %v486_v9 = vsel %vm478_vm3, %v6162_v3, %v469_v7 }
 0x226   :  { %4652 = vmatmul.mubr.msk.f32.gmra.mrb[6].mxu1 %vm488_vm4, %v486_v9 }
 0x227   :  { %4662 = vmatprep.mubr.msk.f32.mxu1 %vm203_vm0, %v5953_v8 }
 0x22a   :  { %4663 = vmatmul.mubr.msk.f32.vlgmr.msra.gmra.mrb[8].mxu1 %vm203_vm0, %v5971_v13 }
 0x22b   :  { %4665 = vmatprep.mubr.msk.f32.mxu1 %vm203_vm0, %v5976_v15 }
 0x22e   :  { %4666 = vmatmul.mubr.msk.f32.gmra.mrb[10].mxu1 %vm203_vm0, %v5988_v18 }
 0x22f   :  { %4668 = vmatprep.mubr.msk.f32.mxu1 %vm203_vm0, %v5992_v19 }
 0x232   :  { %4669 = vmatmul.mubr.msk.f32.gmra.mrb[12].mxu1 %vm203_vm0, %v6003_v22 }
 0x233   :  { %4671 = vmatprep.mubr.msk.f32.mxu1 %vm203_vm0, %v6007_v23 }
 0x236   :  { %4672 = vmatmul.mubr.msk.f32.gmra.mrb[14].mxu1 %vm203_vm0, %v6015_v25 }
 0x237   :  { %4674 = vmatprep.mubr.msk.f32.mxu1 %vm203_vm0, %v6019_v26 }
 0x23a   :  { %4675 = vmatmul.mubr.msk.f32.gmra.mrb[16].mxu1 %vm203_vm0, %v6026_v28 }
 0x23b   :  { %4677 = vmatprep.mubr.msk.f32.mxu1 %vm203_vm0, %v6030_v29 }
 0x23e   :  { %4678 = vmatmul.mubr.msk.f32.gmra.mrb[18].mxu1 %vm203_vm0, %v6037_v31 }
 0x23f   :  { %4680 = vmatprep.mubr.msk.f32.mxu1 %vm203_vm0, %v6041_v32 }
 0x242   :  { %4681 = vmatmul.mubr.msk.f32.gmra.mrb[20].mxu1 %vm203_vm0, %v6048_v34 }
 0x243   :  { %4683 = vmatprep.mubr.msk.f32.mxu1 %vm203_vm0, %v6052_v35 }
 0x246   :  { %4684 = vmatmul.mubr.msk.f32.gmra.mrb[22].mxu1 %vm203_vm0, %v6056_v36 }
 0x2ea   :  { %v6209_v14 = vpop.f32.mrb[0].mxu1 }
 0x2eb   :  { %v6211_v16 = vpop.f32.mrb[1].mxu1 }
 0x2ee   :  { %v6213_v17 = vpop.f32.mrb[2].mxu1 }
 0x2ef   :  { %v6215_v24 = vpop.f32.mrb[3].mxu1 }
 0x2f2   :  { %v6217_v27 = vpop.f32.mrb[4].mxu1 }
 0x2f3   :  { %v6219_v30 = vpop.f32.mrb[5].mxu1 }
 0x2f9   :  { %v6221_v33 = vpop.f32.mrb[6].mxu1 }
 0x2fa   :  { %v6223_v37 = vpop.f32.mrb[7].mxu1 }
 0x2fd   :  { %v4664_v38 = vpop.f32.mrb[8].mxu1 }
 0x2fe   :  { %v688_v39 = vpop.f32.mrb[9].mxu1 }
 0x2ff   :  { %4694 = vmatprep.mubr.msk.f32.mxu0 %vm203_vm0, %v688_v39 }
 0x300   :  { %4695 = vmatmul.mubr.msk.f32.vlgmr.msra.gmra.mrb[16].mxu0 %vm203_vm0, %v4664_v38 }
 0x301   :  { %v4667_v40 = vpop.f32.mrb[10].mxu1 }
 0x302   :  { %v698_v41 = vpop.f32.mrb[11].mxu1 }
 0x303   :  { %4697 = vmatprep.mubr.msk.f32.mxu0 %vm203_vm0, %v698_v41 }
 0x304   :  { %4698 = vmatmul.mubr.msk.f32.gmra.mrb[18].mxu0 %vm203_vm0, %v4667_v40 }
 0x305   :  { %v4670_v42 = vpop.f32.mrb[12].mxu1 }
 0x306   :  { %v708_v43 = vpop.f32.mrb[13].mxu1 }
 0x307   :  { %4700 = vmatprep.mubr.msk.f32.mxu0 %vm203_vm0, %v708_v43 }
 0x308   :  { %4701 = vmatmul.mubr.msk.f32.gmra.mrb[20].mxu0 %vm203_vm0, %v4670_v42 }
 0x309   :  { %v4673_v52 = vpop.f32.mrb[14].mxu1 }
 0x30a   :  { %v718_v53 = vpop.f32.mrb[15].mxu1 }
 0x30b   :  { %4703 = vmatprep.mubr.msk.f32.mxu0 %vm203_vm0, %v718_v53 }
 0x30c   :  { %4704 = vmatmul.mubr.msk.f32.gmra.mrb[22].mxu0 %vm203_vm0, %v4673_v52 }
 0x30d   :  { %v4676_v54 = vpop.f32.mrb[16].mxu1 }
 0x30e   :  { %v728_v59 = vpop.f32.mrb[17].mxu1 }
 0x30f   :  { %4706 = vmatprep.mubr.msk.f32.mxu0 %vm203_vm0, %v728_v59 }
 0x310   :  { %4707 = vmatmul.mubr.msk.f32.gmra.mrb[24].mxu0 %vm203_vm0, %v4676_v54 }
 0x311   :  { %v4679_v60 = vpop.f32.mrb[18].mxu1 }
 0x312   :  { %v738_v61 = vpop.f32.mrb[19].mxu1 }
 0x313   :  { %4709 = vmatprep.mubr.msk.f32.mxu0 %vm203_vm0, %v738_v61 }
 0x314   :  { %4710 = vmatmul.mubr.msk.f32.gmra.mrb[26].mxu0 %vm203_vm0, %v4679_v60 }
 0x315   :  { %v4682_v1 = vpop.f32.mrb[20].mxu1 }
 0x316   :  { %v748_v4 = vpop.f32.mrb[21].mxu1 }
 0x317   :  { %4712 = vmatprep.mubr.msk.f32.mxu0 %vm203_vm0, %v748_v4  ;;  %v1084_v4 = vld [vmem:[%s6915_s29 + $0x8] sm:$0xff] }
 0x318   :  { %4713 = vmatmul.mubr.msk.f32.gmra.mrb[28].mxu0 %vm203_vm0, %v4682_v1  ;;  %v1083_v1 = vld [vmem:[%s6915_s29] sm:$0xff] }
 0x319   :  { %v4685_v5 = vpop.f32.mrb[22].mxu1 }
 0x31a   :  { %v758_v7 = vpop.f32.mrb[23].mxu1 }
 0x31b   :  { %4715 = vmatprep.mubr.msk.f32.mxu0 %vm203_vm0, %v758_v7  ;;  %v1085_v7 = vld [vmem:[%s6915_s29 + $0x10] sm:$0xff] }
 0x31c   :  { %4716 = vmatmul.mubr.msk.f32.gmra.mrb[30].mxu0 %vm203_vm0, %v4685_v5  ;;  %v5100_v5 = vpack.c.bf16 %v1084_v4, %v1083_v1 }
 0x31e   :  { %5101 = vmatprep.subr.bf16.mxu1 %v5100_v5 }
 0x31f   :  { %5103 = vmatpush3.bf16.msra.mxu1 %v5100_v5 }
 0x3d3   :  { %v4696_v9 = vpop.f32.mrb[16].mxu0 }
 0x3d4   :  { %v885_v10 = vpop.f32.mrb[17].mxu0 }
 0x3d7   :  { %v4699_v11 = vpop.f32.mrb[18].mxu0 }
 0x3d8   :  { %v895_v12 = vpop.f32.mrb[19].mxu0 }
 0x3db   :  { %v6241_v38 = vpop.f32.mrb[20].mxu0 }
 0x3dc   :  { %v6243_v39 = vpop.f32.mrb[21].mxu0 }
 0x3df   :  { %v6245_v40 = vpop.f32.mrb[22].mxu0 }
 0x3e0   :  { %v6247_v41 = vpop.f32.mrb[23].mxu0 }
 0x3e3   :  { %v4708_v42 = vpop.f32.mrb[24].mxu0 }
 0x3e4   :  { %974 = vrot.lane.b32.xlu1 %v4708_v42, %s5719_s1  ;;  %v925_v43 = vpop.f32.mrb[25].mxu0  ;;  %v1086_v42 = vld [vmem:[%s6915_s29 + $0x18] sm:$0xff] }
 0x3e5   :  { %972 = vrot.lane.b32.xlu0 %v925_v43, %s5719_s1  ;;  %v5104_v43 = vpack.c.bf16 %v1086_v42, %v1085_v7 }
 0x3e7   :  { %v4711_v52 = vpop.f32.mrb[26].mxu0  ;;  %5105 = vmatprep.subr.bf16.mxu1 %v5104_v43 }
 0x3e8   :  { %978 = vrot.lane.b32.xlu1 %v4711_v52, %s5719_s1  ;;  %v935_v53 = vpop.f32.mrb[27].mxu0  ;;  %5107 = vmatpush3.bf16.msra.mxu1 %v5104_v43 }
 0x3e9   :  { %976 = vrot.lane.b32.xlu0 %v935_v53, %s5719_s1 }
 0x3eb   :  { %v4714_v54 = vpop.f32.mrb[28].mxu0 }
 0x3ec   :  { %982 = vrot.lane.b32.xlu1 %v4714_v54, %s5719_s1  ;;  %v945_v59 = vpop.f32.mrb[29].mxu0 }
 0x3ed   :  { %980 = vrot.lane.b32.xlu0 %v945_v59, %s5719_s1  ;;  %v4069_v59 = vld [vmem:[#allocation6] ss:$0 sm:$0xff] }
 0x3ef   :  { %v4717_v60 = vpop.f32.mrb[30].mxu0 }
 0x3f0   :  { %986 = vrot.lane.b32.xlu1 %v4717_v60, %s5719_s1  ;;  %v955_v61 = vpop.f32.mrb[31].mxu0 }
 0x3f1   :  { %984 = vrot.lane.b32.xlu0 %v955_v61, %s5719_s1 }
 0x3f4   :  { %2161 = vrot.lane.b32.xlu1 %v6211_v16, %s5719_s1 }
 0x3f8   :  { %2163 = vrot.lane.b32.xlu1 %v6209_v14, %s5719_s1 }
 0x3fc   :  { %2165 = vrot.lane.b32.xlu1 %v6215_v24, %s5719_s1 }
 0x400   :  { %2167 = vrot.lane.b32.xlu1 %v6213_v17, %s5719_s1 }
 0x404   :  { %2169 = vrot.lane.b32.xlu1 %v6219_v30, %s5719_s1 }
 0x408   :  { %2171 = vrot.lane.b32.xlu1 %v6217_v27, %s5719_s1 }
 0x40f   :  { %1279 = vxpose.xlu0.b32.start [1/8] (short) (narrow) %v5953_v8, 32 }
 0x413   :  { %1280 = vxpose.xlu0.b32.cont [2/8] (short) (narrow) %v5971_v13, 32 }
 0x417   :  { %1281 = vxpose.xlu0.b32.cont [3/8] (short) (narrow) %v5976_v15, 32 }
 0x41b   :  { %1282 = vxpose.xlu0.b32.cont [4/8] (short) (narrow) %v5988_v18, 32 }
 0x41f   :  { %1283 = vxpose.xlu0.b32.cont [5/8] (short) (narrow) %v5992_v19, 32 }
 0x423   :  { %1284 = vxpose.xlu0.b32.cont [6/8] (short) (narrow) %v6003_v22, 32 }
 0x427   :  { %1285 = vxpose.xlu0.b32.cont [7/8] (short) (narrow) %v6007_v23, 32 }
 0x42b   :  { %1286 = vxpose.xlu0.b32.end [8/8] (short) (narrow) %v6015_v25, 32 }
 0x454   :  { %2173 = vrot.lane.b32.xlu0 %v6223_v37, %s5719_s1 }
 0x456   :  { %v975_v52 = vpop.permute.xlu1 %974 }
 0x457   :  { %v997_v53 = vadd.f32 %v4696_v9, %v975_v52  ;;  %v973_v54 = vpop.permute.xlu0 %972 }
 0x458   :  { %v996_v60 = vadd.f32 %v973_v54, %v885_v10  ;;  %3306 = vrot.lane.b32.xlu0 %v6217_v27, %s5720_s22 }
 0x459   :  { %v1005_v61 = vadd.f32 %v6209_v14, %v997_v53 }
 0x45a   :  { %v1004_v1 = vadd.f32 %v996_v60, %v6211_v16  ;;  %v979_v4 = vpop.permute.xlu1 %978 }
 0x45b   :  { %v6295_v5 = vadd.f32 %v4069_v59, %v1005_v61  ;;  %v999_v7 = vadd.f32 %v4699_v11, %v979_v4  ;;  %v977_v42 = vpop.permute.xlu0 %976 }
 0x45c   :  { %v1019_v43 = vadd.f32 %v4069_v59, %v1004_v1  ;;  %v998_v2 = vadd.f32 %v977_v42, %v895_v12 }
 0x45d   :  { %v4071_v9 = vmul.f32 -1.442695, %v6295_v5  ;;  %v1007_v52 = vadd.f32 %v6213_v17, %v999_v7 }
 0x45e   :  { %v4070_v10 = vmul.f32 -1.442695, %v1019_v43  ;;  %v1006_v54 = vadd.f32 %v998_v2, %v6215_v24  ;;  %v983_v6 = vpop.permute.xlu1 %982 }
 0x45f   :  { %5285 = vpow2.f32 %v4071_v9  ;;  %v6300_v58 = vadd.f32 %v4069_v59, %v1007_v52  ;;  %v1001_v53 = vadd.f32 %v6241_v38, %v983_v6  ;;  %v981_v60 = vpop.permute.xlu0 %980 }
 0x460   :  { %5287 = vpow2.f32 %v4070_v10  ;;  %v1021_v61 = vadd.f32 %v4069_v59, %v1006_v54  ;;  %v1000_v11 = vadd.f32 %v981_v60, %v6243_v39 }
 0x461   :  { %v4073_v12 = vmul.f32 -1.442695, %v6300_v58  ;;  %v1009_v1 = vadd.f32 %v6217_v27, %v1001_v53 }
 0x462   :  { %v4072_v4 = vmul.f32 -1.442695, %v1021_v61  ;;  %v1008_v7 = vadd.f32 %v1000_v11, %v6219_v30  ;;  %v987_v42 = vpop.permute.xlu1 %986 }
 0x463   :  { %5289 = vpow2.f32 %v4073_v12  ;;  %v1024_v2 = vadd.f32 %v4069_v59, %v1009_v1  ;;  %v1003_v9 = vadd.f32 %v6245_v40, %v987_v42  ;;  %v985_v52 = vpop.permute.xlu0 %984 }
 0x464   :  { %5291 = vpow2.f32 %v4072_v4  ;;  %v1023_v6 = vadd.f32 %v4069_v59, %v1008_v7  ;;  %v1002_v38 = vadd.f32 %v985_v52, %v6247_v41 }
 0x465   :  { %v4075_v10 = vmul.f32 -1.442695, %v1024_v2  ;;  %v1011_v39 = vadd.f32 %v6221_v33, %v1003_v9 }
 0x466   :  { %v4074_v54 = vmul.f32 -1.442695, %v1023_v6  ;;  %v1010_v60 = vadd.f32 %v1002_v38, %v6223_v37 }
 0x467   :  { %5293 = vpow2.f32 %v4075_v10  ;;  %v1026_v27 = vadd.f32 %v4069_v59, %v1011_v39 }
 0x468   :  { %5295 = vpow2.f32 %v4074_v54  ;;  %v1025_v53 = vadd.f32 %v4069_v59, %v1010_v60 }
 0x469   :  { %v5286_v11 = vpop.eup %5285  ;;  %v4077_v12 = vmul.f32 -1.442695, %v1026_v27 }
 0x46a   :  { %v5288_v1 = vpop.eup %5287  ;;  %v1052_v63 = vadd.f32 1.0, %v5286_v11  ;;  %v4076_v40 = vmul.f32 -1.442695, %v1025_v53 }
 0x46b   :  { %v1051_v42 = vadd.f32 1.0, %v5288_v1  ;;  %5297 = vpow2.f32 %v4077_v12 }
 0x46c   :  { %5299 = vrcp.f32 %v1052_v63 }
 0x46d   :  { %v5290_v4 = vpop.eup %5289  ;;  %5301 = vrcp.f32 %v1051_v42 }
 0x46e   :  { %v5292_v41 = vpop.eup %5291  ;;  %v1054_v7 = vadd.f32 1.0, %v5290_v4  ;;  %5303 = vpow2.f32 %v4076_v40 }
 0x46f   :  { %v1053_v9 = vadd.f32 1.0, %v5292_v41 }
 0x470   :  { %5305 = vrcp.f32 %v1054_v7 }
 0x471   :  { %v5294_v52 = vpop.eup %5293  ;;  %5307 = vrcp.f32 %v1053_v9 }
 0x472   :  { %v5296_v38 = vpop.eup %5295  ;;  %v1056_v10 = vadd.f32 1.0, %v5294_v52 }
 0x473   :  { %v1055_v59 = vadd.f32 1.0, %v5296_v38 }
 0x474   :  { %5309 = vrcp.f32 %v1056_v10 }
 0x475   :  { %v5298_v39 = vpop.eup %5297  ;;  %5311 = vrcp.f32 %v1055_v59 }
 0x476   :  { %v5300_v54 = vpop.eup %5299  ;;  %v1058_v60 = vadd.f32 1.0, %v5298_v39 }
 0x477   :  { %v5302_v11 = vpop.eup %5301  ;;  %v1076_v1 = vmul.f32 %v5300_v54, %v6295_v5 }
 0x478   :  { %v5304_v12 = vpop.eup %5303  ;;  %v1075_v63 = vmul.f32 %v5302_v11, %v1019_v43  ;;  %5313 = vrcp.f32 %v1058_v60  ;;  %v4078_v60 = vld [vmem:[#allocation8] ss:$0 sm:$0xff] }
 0x479   :  { %v1057_v42 = vadd.f32 1.0, %v5304_v12 }
 0x47a   :  { %v5306_v4 = vpop.eup %5305  ;;  %4726 = vmatprep.mubr.msk.f32.mxu1 %vm203_vm0, %v1075_v63 }
 0x47b   :  { %v5308_v40 = vpop.eup %5307  ;;  %5315 = vrcp.f32 %v1057_v42  ;;  %4727 = vmatmul.mubr.msk.f32.vlgmr.msra.gmra.mrb[24].mxu1 %vm203_vm0, %v1076_v1  ;;  %v1078_v7 = vmul.f32 %v5306_v4, %v6300_v58 }
 0x47c   :  { %v1077_v41 = vmul.f32 %v5308_v40, %v1021_v61  ;;  %v1417_v61 = vld [vmem:[%s6849_s12] sm:$0xff] }
 0x47e   :  { %v5310_v9 = vpop.eup %5309  ;;  %4729 = vmatprep.mubr.msk.f32.mxu1 %vm203_vm0, %v1077_v41 }
 0x47f   :  { %v5312_v52 = vpop.eup %5311  ;;  %4730 = vmatmul.mubr.msk.f32.gmra.mrb[26].mxu1 %vm203_vm0, %v1078_v7  ;;  %v1080_v5 = vmul.f32 %v5310_v9, %v1024_v2  ;;  %v1418_v2 = vld [vmem:[%s6849_s12 + $0x8] sm:$0xff] }
 0x480   :  { %v1079_v43 = vmul.f32 %v5312_v52, %v1023_v6  ;;  %v1419_v6 = vld [vmem:[%s6849_s12 + $0x10] sm:$0xff] }
 0x482   :  { %4732 = vmatprep.mubr.msk.f32.mxu1 %vm203_vm0, %v1079_v43  ;;  %v5314_v38 = vpop.eup %5313 }
 0x483   :  { %4733 = vmatmul.mubr.msk.f32.gmra.mrb[28].mxu1 %vm203_vm0, %v1080_v5  ;;  %v1082_v39 = vmul.f32 %v5314_v38, %v1026_v27  ;;  %v5124_v27 = vpack.c.bf16 %v1418_v2, %v1417_v61 }
 0x485   :  { %v5316_v10 = vpop.eup %5315  ;;  %5125 = vmatprep.subr.bf16.mxu0 %v5124_v27 }
 0x486   :  { %v1081_v59 = vmul.f32 %v5316_v10, %v1025_v53  ;;  %v1420_v53 = vld [vmem:[%s6849_s12 + $0x18] sm:$0xff]  ;;  %5127 = vmatpush3.bf16.msra.mxu0 %v5124_v27 }
 0x487   :  { %v5128_v54 = vpack.c.bf16 %v1420_v53, %v1419_v6 }
 0x488   :  { %4735 = vmatprep.mubr.msk.f32.mxu1 %vm203_vm0, %v1081_v59 }
 0x489   :  { %4736 = vmatmul.mubr.msk.f32.gmra.mrb[30].mxu1 %vm203_vm0, %v1082_v39  ;;  %5129 = vmatprep.subr.bf16.mxu0 %v5128_v54 }
 0x48a   :  { %5131 = vmatpush3.bf16.msra.mxu0 %v5128_v54 }
 0x48f   :  { %v6321_v58 = vpop.trf.xlu0 }
 0x490   :  { %4754 = vmatprep.mubr.msk.f32.mxu1 %vm1311_vm5, %v6321_v58 }
 0x54e   :  { %v4728_v11 = vpop.f32.mrb[24].mxu1 }
 0x54f   :  { %v1190_v12 = vadd.f32 %v4728_v11, %v4078_v60  ;;  %v1184_v63 = vpop.f32.mrb[25].mxu1 }
 0x550   :  { %v1185_v1 = vadd.f32 %v4078_v60, %v1184_v63 }
 0x551   :  { %v4088_v42 = vmul.f32 -1.442695, %v1190_v12 }
 0x552   :  { %v4087_v4 = vmul.f32 -1.442695, %v1185_v1  ;;  %v4731_v40 = vpop.f32.mrb[26].mxu1 }
 0x553   :  { %5317 = vpow2.f32 %v4088_v42  ;;  %v1200_v41 = vadd.f32 %v4731_v40, %v4078_v60  ;;  %v1194_v7 = vpop.f32.mrb[27].mxu1 }
 0x554   :  { %5319 = vpow2.f32 %v4087_v4  ;;  %v1195_v9 = vadd.f32 %v4078_v60, %v1194_v7 }
 0x555   :  { %v4090_v52 = vmul.f32 -1.442695, %v1200_v41 }
 0x556   :  { %v4089_v43 = vmul.f32 -1.442695, %v1195_v9  ;;  %v4734_v5 = vpop.f32.mrb[28].mxu1 }
 0x557   :  { %5321 = vpow2.f32 %v4090_v52  ;;  %v1210_v38 = vadd.f32 %v4734_v5, %v4078_v60  ;;  %v1204_v10 = vpop.f32.mrb[29].mxu1 }
 0x558   :  { %5323 = vpow2.f32 %v4089_v43  ;;  %v1205_v59 = vadd.f32 %v4078_v60, %v1204_v10 }
 0x559   :  { %v4092_v39 = vmul.f32 -1.442695, %v1210_v38 }
 0x55a   :  { %v4091_v61 = vmul.f32 -1.442695, %v1205_v59 }
 0x55b   :  { %5325 = vpow2.f32 %v4092_v39 }
 0x55c   :  { %5327 = vpow2.f32 %v4091_v61  ;;  %v4737_v2 = vpop.f32.mrb[30].mxu1 }
 0x55d   :  { %v5318_v6 = vpop.eup %5317  ;;  %v1220_v27 = vadd.f32 %v4737_v2, %v4078_v60  ;;  %v1214_v53 = vpop.f32.mrb[31].mxu1 }
 0x55e   :  { %v5320_v54 = vpop.eup %5319  ;;  %v1248_v11 = vadd.f32 1.0, %v5318_v6  ;;  %v1215_v63 = vadd.f32 %v4078_v60, %v1214_v53 }
 0x55f   :  { %v1247_v42 = vadd.f32 1.0, %v5320_v54  ;;  %v4094_v4 = vmul.f32 -1.442695, %v1220_v27 }
 0x560   :  { %5329 = vrcp.f32 %v1248_v11  ;;  %v4093_v40 = vmul.f32 -1.442695, %v1215_v63 }
 0x561   :  { %v5322_v7 = vpop.eup %5321  ;;  %5331 = vrcp.f32 %v1247_v42 }
 0x562   :  { %v5324_v52 = vpop.eup %5323  ;;  %v1250_v43 = vadd.f32 1.0, %v5322_v7  ;;  %5333 = vpow2.f32 %v4094_v4 }
 0x563   :  { %v1249_v5 = vadd.f32 1.0, %v5324_v52  ;;  %5335 = vpow2.f32 %v4093_v40 }
 0x564   :  { %5337 = vrcp.f32 %v1250_v43 }
 0x565   :  { %v5326_v10 = vpop.eup %5325  ;;  %5339 = vrcp.f32 %v1249_v5 }
 0x566   :  { %v5328_v39 = vpop.eup %5327  ;;  %v1252_v61 = vadd.f32 1.0, %v5326_v10 }
 0x567   :  { %v1251_v2 = vadd.f32 1.0, %v5328_v39 }
 0x568   :  { %5341 = vrcp.f32 %v1252_v61 }
 0x569   :  { %5343 = vrcp.f32 %v1251_v2 }
 0x56a   :  { %v5330_v60 = vpop.eup %5329 }
 0x56b   :  { %v5332_v6 = vpop.eup %5331  ;;  %v1272_v53 = vmul.f32 %v5330_v60, %v1190_v12  ;;  %v6337_v60 = vpop.trf.xlu0 }
 0x56c   :  { %v5334_v54 = vpop.eup %5333  ;;  %v1271_v11 = vmul.f32 %v5332_v6, %v1185_v1 }
 0x56d   :  { %v5336_v55 = vpop.eup %5335  ;;  %v1254_v42 = vadd.f32 1.0, %v5334_v54  ;;  %v1415_v54 = vld [vmem:[%s6848_s11 + $0x10] sm:$0xff] }
 0x56e   :  { %v5338_v51 = vpop.eup %5337  ;;  %v1253_v7 = vadd.f32 1.0, %v5336_v55  ;;  %v5108_v4 = vpack.c.bf16 %v1272_v53, %v1271_v11  ;;  %v1416_v11 = vld [vmem:[%s6848_s11 + $0x18] sm:$0xff] }
 0x56f   :  { %v5340_v52 = vpop.eup %5339  ;;  %v1274_v40 = vmul.f32 %v5338_v51, %v1200_v41  ;;  %5345 = vrcp.f32 %v1254_v42  ;;  %v6339_v6 = vpop.trf.xlu0 }
 0x570   :  { %v1273_v43 = vmul.f32 %v5340_v52, %v1195_v9  ;;  %5347 = vrcp.f32 %v1253_v7  ;;  %5109 = vmatprep.subr.bf16.mxu1 %v5108_v4  ;;  %v5136_v52 = vpack.c.bf16 %v1416_v11, %v1415_v54 }
 0x571   :  { %5111 = vmatpush3.bf16.msra.mxu1 %v5108_v4 }
 0x572   :  { %v5342_v5 = vpop.eup %5341  ;;  %v5112_v10 = vpack.c.bf16 %v1274_v40, %v1273_v43 }
 0x573   :  { %v5344_v39 = vpop.eup %5343  ;;  %v1276_v61 = vmul.f32 %v5342_v5, %v1210_v38  ;;  %v6345_v38 = vpop.trf.xlu0 }
 0x574   :  { %v1275_v2 = vmul.f32 %v5344_v39, %v1205_v59  ;;  %5113 = vmatprep.subr.bf16.mxu1 %v5112_v10  ;;  %v1413_v59 = vld [vmem:[%s6848_s11] sm:$0xff] }
 0x575   :  { %5115 = vmatpush3.bf16.msra.mxu1 %v5112_v10  ;;  %v1654_v39 = vld [vmem:[%s6851_s14] sm:$0xff] }
 0x576   :  { %v5116_v12 = vpack.c.bf16 %v1276_v61, %v1275_v2  ;;  %v1655_v61 = vld [vmem:[%s6851_s14 + $0x8] sm:$0xff] }
 0x577   :  { %v5140_v2 = vpack.c.bf16 %v1655_v61, %v1654_v39 }
 0x578   :  { %5117 = vmatprep.subr.bf16.mxu1 %v5116_v12 }
 0x579   :  { %v5346_v1 = vpop.eup %5345  ;;  %5119 = vmatpush3.bf16.msra.mxu1 %v5116_v12  ;;  %v1656_v12 = vld [vmem:[%s6851_s14 + $0x10] sm:$0xff] }
 0x57a   :  { %v5348_v55 = vpop.eup %5347  ;;  %v1278_v51 = vmul.f32 %v5346_v1, %v1220_v27  ;;  %v1414_v27 = vld [vmem:[%s6848_s11 + $0x8] sm:$0xff]  ;;  %v1657_v1 = vld [vmem:[%s6851_s14 + $0x18] sm:$0xff] }
 0x57b   :  { %v1277_v41 = vmul.f32 %v5348_v55, %v1215_v63  ;;  %v5132_v63 = vpack.c.bf16 %v1414_v27, %v1413_v59  ;;  %v5144_v55 = vpack.c.bf16 %v1657_v1, %v1656_v12 }
 0x57d   :  { %v5120_v9 = vpack.c.bf16 %v1278_v51, %v1277_v41  ;;  %5133 = vmatprep.subr.bf16.mxu0 %v5132_v63  ;;  %v4107_v51 = vld [vmem:[#allocation9] ss:$0 sm:$0xff] }
 0x57f   :  { %5121 = vmatprep.subr.bf16.mxu1 %v5120_v9 }
 0x580   :  { %5123 = vmatpush3.bf16.msra.mxu1 %v5120_v9 }
 0x581   :  { %5141 = vmatprep.subr.bf16.mxu1 %v5140_v2 }
 0x583   :  { %4755 = vmatmul.mubr.msk.f32.vlgmr.msra.gmra.mrb[32].mxu1 %vm1311_vm5, %v6337_v60 }
 0x584   :  { %4757 = vmatprep.mubr.msk.f32.mxu1 %vm1311_vm5, %v6339_v6  ;;  %5143 = vmatpush3.bf16.msra.mxu1 %v5140_v2 }
 0x585   :  { %5145 = vmatprep.subr.bf16.mxu1 %v5144_v55 }
 0x587   :  { %4758 = vmatmul.mubr.msk.f32.gmra.mrb[34].mxu1 %vm1311_vm5, %v6345_v38 }
 0x588   :  { %5147 = vmatpush3.bf16.msra.mxu1 %v5144_v55 }
 0x656   :  { %v4756_v53 = vpop.f32.mrb[32].mxu1 }
 0x657   :  { %v1390_v42 = vpop.f32.mrb[33].mxu1  ;;  %v1410_v4 = vmul.f32 0.01, %v4756_v53 }
 0x658   :  { %v1409_v7 = vmul.f32 0.01, %v1390_v42 }
 0x65a   :  { %v4759_v40 = vpop.f32.mrb[34].mxu1  ;;  %4768 = vmatprep.mubr.msk.f32.mxu0 %vm203_vm0, %v1409_v7 }
 0x65b   :  { %v1400_v43 = vpop.f32.mrb[35].mxu1  ;;  %4769 = vmatmul.mubr.msk.f32.vlgmr.msra.gmra.mrb[32].mxu0 %vm203_vm0, %v1410_v4  ;;  %v1412_v10 = vmul.f32 0.01, %v4759_v40 }
 0x65c   :  { %v1411_v5 = vmul.f32 0.01, %v1400_v43  ;;  %5135 = vmatpush3.bf16.msra.mxu0 %v5132_v63 }
 0x65d   :  { %5137 = vmatprep.subr.bf16.mxu0 %v5136_v52 }
 0x65e   :  { %4771 = vmatprep.mubr.msk.f32.mxu0 %vm203_vm0, %v1411_v5 }
 0x65f   :  { %4772 = vmatmul.mubr.msk.f32.gmra.mrb[34].mxu0 %vm203_vm0, %v1412_v10 }
 0x660   :  { %5139 = vmatpush3.bf16.msra.mxu0 %v5136_v52  ;;  %4782 = vmatprep.mubr.msk.f32.mxu0 %vm203_vm0, %v6108_v20 }
 0x663   :  { %4783 = vmatmul.mubr.msk.f32.vlgmr.msra.gmra.mrb[32].mxu0 %vm203_vm0, %v6110_v21 }
 0x664   :  { %4785 = vmatprep.mubr.msk.f32.mxu0 %vm203_vm0, %v6131_v49 }
 0x667   :  { %4786 = vmatmul.mubr.msk.f32.gmra.mrb[34].mxu0 %vm203_vm0, %v6133_v50 }
 0x736   :  { %v4784_v41 = vpop.f32.mrb[32].mxu0 }
 0x737   :  { %v1623_v9 = vadd.f32 %v4784_v41, %v4107_v51  ;;  %v1596_v59 = vpop.f32.mrb[33].mxu0 }
 0x738   :  { %v1622_v27 = vadd.f32 %v4107_v51, %v1596_v59 }
 0x739   :  { %v4109_v63 = vmul.f32 -1.442695, %v1623_v9 }
 0x73a   :  { %v4108_v53 = vmul.f32 -1.442695, %v1622_v27  ;;  %v4787_v54 = vpop.f32.mrb[34].mxu0 }
 0x73b   :  { %5349 = vpow2.f32 %v4109_v63  ;;  %v1625_v11 = vadd.f32 %v4787_v54, %v4107_v51  ;;  %v1606_v42 = vpop.f32.mrb[35].mxu0 }
 0x73c   :  { %5351 = vpow2.f32 %v4108_v53  ;;  %v1624_v7 = vadd.f32 %v4107_v51, %v1606_v42  ;;  %v4135_v42 = vld [vmem:[%s6911_s15 + $0x30] sm:$0xff] }
 0x73d   :  { %v4111_v4 = vmul.f32 -1.442695, %v1625_v11 }
 0x73e   :  { %v4110_v52 = vmul.f32 -1.442695, %v1624_v7 }
 0x73f   :  { %5353 = vpow2.f32 %v4111_v4 }
 0x740   :  { %5355 = vpow2.f32 %v4110_v52 }
 0x745   :  { %v5350_v40 = vpop.eup %5349 }
 0x746   :  { %v5352_v43 = vpop.eup %5351  ;;  %v1639_v5 = vadd.f32 1.0, %v5350_v40  ;;  %v4116_v40 = vld [vmem:[#allocation11] ss:$0 sm:$0xff] }
 0x747   :  { %v1638_v10 = vadd.f32 1.0, %v5352_v43 }
 0x748   :  { %5357 = vrcp.f32 %v1639_v5 }
 0x749   :  { %v5354_v39 = vpop.eup %5353  ;;  %5359 = vrcp.f32 %v1638_v10 }
 0x74a   :  { %v5356_v61 = vpop.eup %5355  ;;  %v1641_v2 = vadd.f32 1.0, %v5354_v39 }
 0x74b   :  { %v1640_v12 = vadd.f32 1.0, %v5356_v61 }
 0x74c   :  { %5361 = vrcp.f32 %v1641_v2 }
 0x74d   :  { %5363 = vrcp.f32 %v1640_v12 }
 0x752   :  { %v5358_v1 = vpop.eup %5357 }
 0x753   :  { %v5360_v55 = vpop.eup %5359  ;;  %v1651_v51 = vmul.f32 %v5358_v1, %v1623_v9  ;;  %v4134_v9 = vld [vmem:[%s6911_s15 + $0x28] sm:$0xff] }
 0x754   :  { %v1650_v41 = vmul.f32 %v5360_v55, %v1622_v27  ;;  %v4133_v27 = vld [vmem:[%s6911_s15 + $0x20] sm:$0xff] }
 0x756   :  { %v5362_v59 = vpop.eup %5361  ;;  %4796 = vmatprep.mubr.msk.f32.mxu1 %vm203_vm0, %v1650_v41 }
 0x757   :  { %v5364_v63 = vpop.eup %5363  ;;  %4797 = vmatmul.mubr.msk.f32.vlgmr.msra.gmra.mrb[36].mxu1 %vm203_vm0, %v1651_v51  ;;  %v1653_v54 = vmul.f32 %v5362_v59, %v1625_v11  ;;  %v5156_v11 = vpack.c.bf16 %v4134_v9, %v4133_v27 }
 0x758   :  { %v1652_v53 = vmul.f32 %v5364_v63, %v1624_v7  ;;  %v4136_v7 = vld [vmem:[%s6911_s15 + $0x38] sm:$0xff] }
 0x759   :  { %v5160_v4 = vpack.c.bf16 %v4136_v7, %v4135_v42  ;;  %5157 = vmatprep.subr.bf16.mxu0 %v5156_v11 }
 0x75a   :  { %4799 = vmatprep.mubr.msk.f32.mxu1 %vm203_vm0, %v1652_v53  ;;  %5159 = vmatpush3.bf16.msra.mxu0 %v5156_v11 }
 0x75b   :  { %4800 = vmatmul.mubr.msk.f32.gmra.mrb[38].mxu1 %vm203_vm0, %v1653_v54  ;;  %5161 = vmatprep.subr.bf16.mxu0 %v5160_v4 }
 0x75c   :  { %4810 = vmatprep.mubr.msk.f32.mxu1 %vm203_vm0, %v5953_v8 }
 0x75e   :  { %5163 = vmatpush3.bf16.msra.mxu0 %v5160_v4 }
 0x82a   :  { %v4798_v52 = vpop.f32.mrb[36].mxu1 }
 0x82b   :  { %v1756_v43 = vadd.f32 %v4798_v52, %v6110_v21  ;;  %v1736_v5 = vpop.f32.mrb[37].mxu1 }
 0x82c   :  { %v1755_v10 = vadd.f32 %v1736_v5, %v6108_v20 }
 0x82d   :  { %v6405_v39 = vadd.f32 %v4116_v40, %v1756_v43 }
 0x82e   :  { %v6407_v61 = vadd.f32 %v4116_v40, %v1755_v10  ;;  %v4801_v2 = vpop.f32.mrb[38].mxu1 }
 0x82f   :  { %v1758_v12 = vadd.f32 %v4801_v2, %v6133_v50  ;;  %v1746_v1 = vpop.f32.mrb[39].mxu1 }
 0x830   :  { %v1757_v55 = vadd.f32 %v1746_v1, %v6131_v49  ;;  %v5148_v41 = vpack.c.bf16 %v6405_v39, %v6407_v61 }
 0x831   :  { %v6413_v51 = vadd.f32 %v4116_v40, %v1758_v12 }
 0x832   :  { %v6415_v59 = vadd.f32 %v4116_v40, %v1757_v55  ;;  %5149 = vmatprep.subr.bf16.mxu1 %v5148_v41 }
 0x833   :  { %5151 = vmatpush3.bf16.msra.mxu1 %v5148_v41 }
 0x834   :  { %v5152_v20 = vpack.c.bf16 %v6413_v51, %v6415_v59 }
 0x836   :  { %5153 = vmatprep.subr.bf16.mxu1 %v5152_v20 }
 0x837   :  { %5155 = vmatpush3.bf16.msra.mxu1 %v5152_v20 }
 0x83a   :  { %4811 = vmatmul.mubr.msk.f32.vlgmr.msra.gmra.mrb[40].mxu1 %vm203_vm0, %v5971_v13 }
 0x83b   :  { %4813 = vmatprep.mubr.msk.f32.mxu1 %vm203_vm0, %v5976_v15 }
 0x83e   :  { %4814 = vmatmul.mubr.msk.f32.gmra.mrb[42].mxu1 %vm203_vm0, %v5988_v18 }
 0x83f   :  { %4816 = vmatprep.mubr.msk.f32.mxu1 %vm203_vm0, %v5992_v19 }
 0x842   :  { %4817 = vmatmul.mubr.msk.f32.gmra.mrb[44].mxu1 %vm203_vm0, %v6003_v22 }
 0x843   :  { %4819 = vmatprep.mubr.msk.f32.mxu1 %vm203_vm0, %v6007_v23 }
 0x846   :  { %4820 = vmatmul.mubr.msk.f32.gmra.mrb[46].mxu1 %vm203_vm0, %v6015_v25 }
 0x847   :  { %4822 = vmatprep.mubr.msk.f32.mxu1 %vm203_vm0, %v6019_v26 }
 0x84a   :  { %4823 = vmatmul.mubr.msk.f32.gmra.mrb[48].mxu1 %vm203_vm0, %v6026_v28 }
 0x84b   :  { %4825 = vmatprep.mubr.msk.f32.mxu1 %vm203_vm0, %v6030_v29 }
 0x84e   :  { %4826 = vmatmul.mubr.msk.f32.gmra.mrb[50].mxu1 %vm203_vm0, %v6037_v31 }
 0x84f   :  { %4828 = vmatprep.mubr.msk.f32.mxu1 %vm203_vm0, %v6041_v32 }
 0x852   :  { %4829 = vmatmul.mubr.msk.f32.gmra.mrb[52].mxu1 %vm203_vm0, %v6048_v34 }
 0x853   :  { %4831 = vmatprep.mubr.msk.f32.mxu1 %vm203_vm0, %v6052_v35 }
 0x856   :  { %4832 = vmatmul.mubr.msk.f32.gmra.mrb[54].mxu1 %vm203_vm0, %v6056_v36 }
 0x90d   :  { %v4812_v21 = vpop.f32.mrb[40].mxu1 }
 0x90e   :  { %v1836_v49 = vpop.f32.mrb[41].mxu1 }
 0x90f   :  { %4842 = vmatprep.mubr.msk.f32.mxu0 %vm203_vm0, %v1836_v49 }
 0x910   :  { %4843 = vmatmul.mubr.msk.f32.vlgmr.msra.gmra.mrb[36].mxu0 %vm203_vm0, %v4812_v21 }
 0x911   :  { %v4815_v50 = vpop.f32.mrb[42].mxu1 }
 0x912   :  { %v1846_v63 = vpop.f32.mrb[43].mxu1 }
 0x913   :  { %4845 = vmatprep.mubr.msk.f32.mxu0 %vm203_vm0, %v1846_v63 }
 0x914   :  { %4846 = vmatmul.mubr.msk.f32.gmra.mrb[38].mxu0 %vm203_vm0, %v4815_v50 }
 0x915   :  { %v4818_v53 = vpop.f32.mrb[44].mxu1 }
 0x916   :  { %v1856_v54 = vpop.f32.mrb[45].mxu1 }
 0x917   :  { %4848 = vmatprep.mubr.msk.f32.mxu0 %vm203_vm0, %v1856_v54 }
 0x918   :  { %4849 = vmatmul.mubr.msk.f32.gmra.mrb[40].mxu0 %vm203_vm0, %v4818_v53 }
 0x919   :  { %v4821_v27 = vpop.f32.mrb[46].mxu1 }
 0x91a   :  { %v1866_v9 = vpop.f32.mrb[47].mxu1 }
 0x91b   :  { %4851 = vmatprep.mubr.msk.f32.mxu0 %vm203_vm0, %v1866_v9 }
 0x91c   :  { %4852 = vmatmul.mubr.msk.f32.gmra.mrb[42].mxu0 %vm203_vm0, %v4821_v27 }
 0x91d   :  { %v4824_v42 = vpop.f32.mrb[48].mxu1 }
 0x91e   :  { %v1876_v11 = vpop.f32.mrb[49].mxu1 }
 0x91f   :  { %4854 = vmatprep.mubr.msk.f32.mxu0 %vm203_vm0, %v1876_v11  ;;  %v4162_v11 = vld [vmem:[%s6915_s29 + $0x20] sm:$0xff] }
 0x920   :  { %4855 = vmatmul.mubr.msk.f32.gmra.mrb[44].mxu0 %vm203_vm0, %v4824_v42 }
 0x921   :  { %v4827_v7 = vpop.f32.mrb[50].mxu1 }
 0x922   :  { %v1886_v4 = vpop.f32.mrb[51].mxu1 }
 0x923   :  { %4857 = vmatprep.mubr.msk.f32.mxu0 %vm203_vm0, %v1886_v4 }
 0x924   :  { %4858 = vmatmul.mubr.msk.f32.gmra.mrb[46].mxu0 %vm203_vm0, %v4827_v7  ;;  %v4163_v7 = vld [vmem:[%s6915_s29 + $0x28] sm:$0xff] }
 0x925   :  { %v4830_v52 = vpop.f32.mrb[52].mxu1  ;;  %v5164_v4 = vpack.c.bf16 %v4163_v7, %v4162_v11 }
 0x926   :  { %v1896_v40 = vpop.f32.mrb[53].mxu1 }
 0x927   :  { %4860 = vmatprep.mubr.msk.f32.mxu0 %vm203_vm0, %v1896_v40  ;;  %5165 = vmatprep.subr.bf16.mxu1 %v5164_v4  ;;  %v4165_v40 = vld [vmem:[%s6915_s29 + $0x38] sm:$0xff] }
 0x928   :  { %4861 = vmatmul.mubr.msk.f32.gmra.mrb[48].mxu0 %vm203_vm0, %v4830_v52  ;;  %5167 = vmatpush3.bf16.msra.mxu1 %v5164_v4  ;;  %v4164_v52 = vld [vmem:[%s6915_s29 + $0x30] sm:$0xff] }
 0x929   :  { %v4833_v43 = vpop.f32.mrb[54].mxu1 }
 0x92a   :  { %v1906_v5 = vpop.f32.mrb[55].mxu1 }
 0x92b   :  { %4863 = vmatprep.mubr.msk.f32.mxu0 %vm203_vm0, %v1906_v5  ;;  %v2162_v5 = vpop.permute.xlu1 %2161 }
 0x92c   :  { %4864 = vmatmul.mubr.msk.f32.gmra.mrb[50].mxu0 %vm203_vm0, %v4833_v43  ;;  %v5168_v43 = vpack.c.bf16 %v4165_v40, %v4164_v52 }
 0x92d   :  { %4902 = vmatprep.mubr.msk.f32.mxu0 %vm1311_vm5, %v6321_v58 }
 0x92e   :  { %5169 = vmatprep.subr.bf16.mxu1 %v5168_v43 }
 0x92f   :  { %5171 = vmatpush3.bf16.msra.mxu1 %v5168_v43 }
 0x9e3   :  { %v4844_v10 = vpop.f32.mrb[36].mxu0 }
 0x9e4   :  { %v2034_v2 = vpop.f32.mrb[37].mxu0 }
 0x9e7   :  { %v4847_v12 = vpop.f32.mrb[38].mxu0 }
 0x9e8   :  { %v2044_v1 = vpop.f32.mrb[39].mxu0 }
 0x9eb   :  { %v6467_v55 = vpop.f32.mrb[40].mxu0 }
 0x9ec   :  { %v6469_v41 = vpop.f32.mrb[41].mxu0 }
 0x9ef   :  { %v6471_v20 = vpop.f32.mrb[42].mxu0 }
 0x9f0   :  { %v6473_v21 = vpop.f32.mrb[43].mxu0 }
 0x9f3   :  { %v4856_v49 = vpop.f32.mrb[44].mxu0 }
 0x9f4   :  { %2123 = vrot.lane.b32.xlu1 %v4856_v49, %s5719_s1  ;;  %v2074_v50 = vpop.f32.mrb[45].mxu0  ;;  %v2164_v49 = vpop.permute.xlu1 %2163 }
 0x9f7   :  { %v4859_v63 = vpop.f32.mrb[46].mxu0 }
 0x9f8   :  { %2121 = vrot.lane.b32.xlu1 %v2074_v50, %s5719_s1  ;;  %v2084_v53 = vpop.f32.mrb[47].mxu0  ;;  %v2166_v50 = vpop.permute.xlu1 %2165 }
 0x9fb   :  { %v4862_v54 = vpop.f32.mrb[48].mxu0 }
 0x9fc   :  { %2127 = vrot.lane.b32.xlu1 %v4859_v63, %s5719_s1  ;;  %v2094_v27 = vpop.f32.mrb[49].mxu0  ;;  %v2168_v63 = vpop.permute.xlu1 %2167 }
 0x9ff   :  { %v4865_v9 = vpop.f32.mrb[50].mxu0 }
 0xa00   :  { %2125 = vrot.lane.b32.xlu1 %v2084_v53, %s5719_s1  ;;  %v2104_v42 = vpop.f32.mrb[51].mxu0  ;;  %v2170_v53 = vpop.permute.xlu1 %2169 }
 0xa04   :  { %2131 = vrot.lane.b32.xlu1 %v4862_v54, %s5719_s1  ;;  %v2172_v54 = vpop.permute.xlu1 %2171 }
 0xa08   :  { %2129 = vrot.lane.b32.xlu1 %v2094_v27, %s5719_s1 }
 0xa0c   :  { %2135 = vrot.lane.b32.xlu1 %v4865_v9, %s5719_s1  ;;  %v4153_v9 = vld [vmem:[#allocation6 + $0x1] ss:$0 sm:$0xff] }
 0xa10   :  { %2133 = vrot.lane.b32.xlu1 %v2104_v42, %s5719_s1 }
 0xa14   :  { %2175 = vrot.lane.b32.xlu1 %v6221_v33, %s5719_s1 }
 0xa18   :  { %3296 = vrot.lane.b32.xlu1 %v6211_v16, %s5720_s22 }
 0xa1c   :  { %3298 = vrot.lane.b32.xlu1 %v6209_v14, %s5720_s22 }
 0xa20   :  { %3300 = vrot.lane.b32.xlu1 %v6215_v24, %s5720_s22 }
 0xa24   :  { %3302 = vrot.lane.b32.xlu1 %v6213_v17, %s5720_s22 }
 0xa28   :  { %3304 = vrot.lane.b32.xlu1 %v6219_v30, %s5720_s22 }
 0xa66   :  { %v2124_v27 = vpop.permute.xlu1 %2123 }
 0xa67   :  { %v2146_v16 = vadd.f32 %v4844_v10, %v2124_v27 }
 0xa69   :  { %v2186_v42 = vadd.f32 %v2164_v49, %v2146_v16 }
 0xa6a   :  { %v2122_v14 = vpop.permute.xlu1 %2121 }
 0xa6b   :  { %v2202_v11 = vadd.f32 %v4153_v9, %v2186_v42  ;;  %v2145_v7 = vadd.f32 %v2122_v14, %v2034_v2 }
 0xa6d   :  { %v4155_v24 = vmul.f32 -1.442695, %v2202_v11  ;;  %v2185_v4 = vadd.f32 %v2162_v5, %v2145_v7 }
 0xa6e   :  { %v2128_v52 = vpop.permute.xlu1 %2127 }
 0xa6f   :  { %5365 = vpow2.f32 %v4155_v24  ;;  %v2201_v17 = vadd.f32 %v4153_v9, %v2185_v4  ;;  %v2148_v40 = vadd.f32 %v4847_v12, %v2128_v52  ;;  %v2174_v52 = vpop.permute.xlu0 %2173 }
 0xa71   :  { %v4154_v30 = vmul.f32 -1.442695, %v2201_v17  ;;  %v2188_v43 = vadd.f32 %v2168_v63, %v2148_v40 }
 0xa72   :  { %v2126_v48 = vpop.permute.xlu1 %2125 }
 0xa73   :  { %5367 = vpow2.f32 %v4154_v30  ;;  %v2204_v46 = vadd.f32 %v4153_v9, %v2188_v43  ;;  %v2147_v0 = vadd.f32 %v2126_v48, %v2044_v1 }
 0xa75   :  { %v4157_v3 = vmul.f32 -1.442695, %v2204_v46  ;;  %v2187_v57 = vadd.f32 %v2166_v50, %v2147_v0 }
 0xa76   :  { %v2132_v10 = vpop.permute.xlu1 %2131 }
 0xa77   :  { %5369 = vpow2.f32 %v4157_v3  ;;  %v2203_v49 = vadd.f32 %v4153_v9, %v2187_v57  ;;  %v2150_v27 = vadd.f32 %v6467_v55, %v2132_v10 }
 0xa79   :  { %v5366_v2 = vpop.eup %5365  ;;  %v4156_v16 = vmul.f32 -1.442695, %v2203_v49  ;;  %v2190_v5 = vadd.f32 %v2172_v54, %v2150_v27 }
 0xa7a   :  { %v2234_v42 = vadd.f32 1.0, %v5366_v2  ;;  %v2130_v14 = vpop.permute.xlu1 %2129 }
 0xa7b   :  { %5371 = vpow2.f32 %v4156_v16  ;;  %v2206_v12 = vadd.f32 %v4153_v9, %v2190_v5  ;;  %v2149_v63 = vadd.f32 %v2130_v14, %v6469_v41 }
 0xa7c   :  { %5373 = vrcp.f32 %v2234_v42 }
 0xa7d   :  { %v5368_v7 = vpop.eup %5367  ;;  %v4159_v24 = vmul.f32 -1.442695, %v2206_v12  ;;  %v2189_v4 = vadd.f32 %v2170_v53, %v2149_v63 }
 0xa7e   :  { %v2233_v48 = vadd.f32 1.0, %v5368_v7  ;;  %v2136_v0 = vpop.permute.xlu1 %2135 }
 0xa7f   :  { %5375 = vpow2.f32 %v4159_v24  ;;  %v2205_v3 = vadd.f32 %v4153_v9, %v2189_v4  ;;  %v2152_v41 = vadd.f32 %v6471_v20, %v2136_v0 }
 0xa80   :  { %5377 = vrcp.f32 %v2233_v48 }
 0xa81   :  { %v5370_v57 = vpop.eup %5369  ;;  %v4158_v1 = vmul.f32 -1.442695, %v2205_v3 }
 0xa82   :  { %v2134_v55 = vpop.permute.xlu1 %2133  ;;  %v2236_v50 = vadd.f32 1.0, %v5370_v57 }
 0xa83   :  { %5379 = vpow2.f32 %v4158_v1  ;;  %v2151_v54 = vadd.f32 %v2134_v55, %v6473_v21 }
 0xa84   :  { %5381 = vrcp.f32 %v2236_v50 }
 0xa85   :  { %v5372_v40 = vpop.eup %5371  ;;  %v2191_v30 = vadd.f32 %v2174_v52, %v2151_v54 }
 0xa86   :  { %v2235_v43 = vadd.f32 1.0, %v5372_v40  ;;  %v2176_v53 = vpop.permute.xlu1 %2175  ;;  %v5374_v2 = vpop.eup %5373 }
 0xa87   :  { %v2207_v10 = vadd.f32 %v4153_v9, %v2191_v30  ;;  %v2192_v27 = vadd.f32 %v2176_v53, %v2152_v41  ;;  %v2258_v24 = vmul.f32 %v5374_v2, %v2202_v11 }
 0xa88   :  { %5383 = vrcp.f32 %v2235_v43  ;;  %v4166_v43 = vld [vmem:[#allocation8 + $0x1] ss:$0 sm:$0xff] }
 0xa89   :  { %v5376_v16 = vpop.eup %5375  ;;  %v4160_v5 = vmul.f32 -1.442695, %v2207_v10  ;;  %v2208_v42 = vadd.f32 %v4153_v9, %v2192_v27 }
 0xa8a   :  { %v5378_v14 = vpop.eup %5377  ;;  %v2238_v7 = vadd.f32 1.0, %v5376_v16 }
 0xa8b   :  { %v2257_v63 = vmul.f32 %v5378_v14, %v2201_v17  ;;  %5385 = vpow2.f32 %v4160_v5  ;;  %v4161_v21 = vmul.f32 -1.442695, %v2208_v42 }
 0xa8d   :  { %v5380_v4 = vpop.eup %5379  ;;  %5387 = vpow2.f32 %v4161_v21  ;;  %4874 = vmatprep.mubr.msk.f32.mxu1 %vm203_vm0, %v2257_v63 }
 0xa8e   :  { %v2237_v20 = vadd.f32 1.0, %v5380_v4  ;;  %4875 = vmatmul.mubr.msk.f32.vlgmr.msra.gmra.mrb[56].mxu1 %vm203_vm0, %v2258_v24  ;;  %5389 = vrcp.f32 %v2238_v7  ;;  %v5382_v48 = vpop.eup %5381 }
 0xa8f   :  { %v2260_v1 = vmul.f32 %v5382_v48, %v2204_v46 }
 0xa90   :  { %5391 = vrcp.f32 %v2237_v20 }
 0xa92   :  { %v5384_v0 = vpop.eup %5383 }
 0xa93   :  { %v2259_v57 = vmul.f32 %v5384_v0, %v2203_v49 }
 0xa95   :  { %v5386_v9 = vpop.eup %5385  ;;  %4877 = vmatprep.mubr.msk.f32.mxu1 %vm203_vm0, %v2259_v57 }
 0xa96   :  { %v2239_v17 = vadd.f32 1.0, %v5386_v9  ;;  %4878 = vmatmul.mubr.msk.f32.gmra.mrb[58].mxu1 %vm203_vm0, %v2260_v1 }
 0xa97   :  { %v5388_v11 = vpop.eup %5387 }
 0xa98   :  { %5393 = vrcp.f32 %v2239_v17  ;;  %v2240_v55 = vadd.f32 1.0, %v5388_v11  ;;  %v5390_v50 = vpop.eup %5389 }
 0xa99   :  { %v2262_v40 = vmul.f32 %v5390_v50, %v2206_v12 }
 0xa9a   :  { %v5392_v54 = vpop.eup %5391  ;;  %5395 = vrcp.f32 %v2240_v55 }
 0xa9b   :  { %v2261_v52 = vmul.f32 %v5392_v54, %v2205_v3 }
 0xa9d   :  { %4880 = vmatprep.mubr.msk.f32.mxu1 %vm203_vm0, %v2261_v52 }
 0xa9e   :  { %4881 = vmatmul.mubr.msk.f32.gmra.mrb[60].mxu1 %vm203_vm0, %v2262_v40 }
 0xaa2   :  { %v5394_v49 = vpop.eup %5393 }
 0xaa3   :  { %v2263_v46 = vmul.f32 %v5394_v49, %v2207_v10 }
 0xaa4   :  { %v5396_v41 = vpop.eup %5395 }
 0xaa5   :  { %v2264_v30 = vmul.f32 %v5396_v41, %v2208_v42  ;;  %4883 = vmatprep.mubr.msk.f32.mxu1 %vm203_vm0, %v2263_v46 }
 0xaa7   :  { %4884 = vmatmul.mubr.msk.f32.gmra.mrb[62].mxu1 %vm203_vm0, %v2264_v30 }
 0xb61   :  { %v4876_v53 = vpop.f32.mrb[56].mxu1 }
 0xb62   :  { %v2374_v27 = vadd.f32 %v4876_v53, %v4166_v43  ;;  %v2368_v2 = vpop.f32.mrb[57].mxu1 }
 0xb63   :  { %v2369_v16 = vadd.f32 %v4166_v43, %v2368_v2 }
 0xb64   :  { %v4176_v5 = vmul.f32 -1.442695, %v2374_v27 }
 0xb65   :  { %v4175_v3 = vmul.f32 -1.442695, %v2369_v16 }
 0xb66   :  { %5397 = vpow2.f32 %v4176_v5 }
 0xb67   :  { %5399 = vpow2.f32 %v4175_v3 }
 0xb69   :  { %v4879_v12 = vpop.f32.mrb[58].mxu1 }
 0xb6a   :  { %v2384_v14 = vadd.f32 %v4879_v12, %v4166_v43  ;;  %v2378_v63 = vpop.f32.mrb[59].mxu1 }
 0xb6b   :  { %v2379_v7 = vadd.f32 %v4166_v43, %v2378_v63 }
 0xb6c   :  { %v4178_v10 = vmul.f32 -1.442695, %v2384_v14 }
 0xb6d   :  { %v4177_v21 = vmul.f32 -1.442695, %v2379_v7 }
 0xb6e   :  { %5401 = vpow2.f32 %v4178_v10 }
 0xb6f   :  { %5403 = vpow2.f32 %v4177_v21 }
 0xb70   :  { %v5398_v42 = vpop.eup %5397 }
 0xb71   :  { %v5400_v24 = vpop.eup %5399  ;;  %v2432_v4 = vadd.f32 1.0, %v5398_v42  ;;  %v4882_v20 = vpop.f32.mrb[60].mxu1 }
 0xb72   :  { %v2431_v48 = vadd.f32 1.0, %v5400_v24  ;;  %v2394_v0 = vadd.f32 %v4882_v20, %v4166_v43  ;;  %v2388_v57 = vpop.f32.mrb[61].mxu1 }
 0xb73   :  { %5405 = vrcp.f32 %v2432_v4  ;;  %v2389_v1 = vadd.f32 %v4166_v43, %v2388_v57 }
 0xb74   :  { %5407 = vrcp.f32 %v2431_v48  ;;  %v4180_v9 = vmul.f32 -1.442695, %v2394_v0 }
 0xb75   :  { %v4179_v17 = vmul.f32 -1.442695, %v2389_v1 }
 0xb76   :  { %5409 = vpow2.f32 %v4180_v9 }
 0xb77   :  { %5411 = vpow2.f32 %v4179_v17 }
 0xb78   :  { %v5402_v11 = vpop.eup %5401 }
 0xb79   :  { %v5404_v55 = vpop.eup %5403  ;;  %v2434_v50 = vadd.f32 1.0, %v5402_v11 }
 0xb7a   :  { %v2433_v54 = vadd.f32 1.0, %v5404_v55  ;;  %v4885_v52 = vpop.f32.mrb[62].mxu1 }
 0xb7b   :  { %5413 = vrcp.f32 %v2434_v50  ;;  %v2404_v40 = vadd.f32 %v4885_v52, %v4166_v43  ;;  %v2398_v49 = vpop.f32.mrb[63].mxu1 }
 0xb7c   :  { %5415 = vrcp.f32 %v2433_v54  ;;  %v2399_v46 = vadd.f32 %v4166_v43, %v2398_v49 }
 0xb7d   :  { %v5406_v41 = vpop.eup %5405  ;;  %v4182_v30 = vmul.f32 -1.442695, %v2404_v40 }
 0xb7e   :  { %v5408_v53 = vpop.eup %5407  ;;  %v2456_v2 = vmul.f32 %v5406_v41, %v2374_v27  ;;  %v4181_v5 = vmul.f32 -1.442695, %v2399_v46  ;;  %v4192_v41 = vld [vmem:[%s6849_s12 + $0x28] sm:$0xff] }
 0xb7f   :  { %v2455_v3 = vmul.f32 %v5408_v53, %v2369_v16  ;;  %5417 = vpow2.f32 %v4182_v30 }
 0xb80   :  { %v5410_v12 = vpop.eup %5409  ;;  %5419 = vpow2.f32 %v4181_v5  ;;  %v4188_v5 = vld [vmem:[%s6848_s11 + $0x28] sm:$0xff] }
 0xb81   :  { %v5412_v63 = vpop.eup %5411  ;;  %v2436_v10 = vadd.f32 1.0, %v5410_v12  ;;  %v5172_v21 = vpack.c.bf16 %v2456_v2, %v2455_v3 }
 0xb82   :  { %v2435_v42 = vadd.f32 1.0, %v5412_v63  ;;  %v4189_v63 = vld [vmem:[%s6848_s11 + $0x30] sm:$0xff] }
 0xb83   :  { %5421 = vrcp.f32 %v2436_v10  ;;  %5173 = vmatprep.subr.bf16.mxu0 %v5172_v21  ;;  %v4190_v10 = vld [vmem:[%s6848_s11 + $0x38] sm:$0xff] }
 0xb84   :  { %5423 = vrcp.f32 %v2435_v42  ;;  %5175 = vmatpush3.bf16.msra.mxu0 %v5172_v21 }
 0xb85   :  { %v5414_v24 = vpop.eup %5413 }
 0xb86   :  { %v5416_v4 = vpop.eup %5415  ;;  %v2458_v43 = vmul.f32 %v5414_v24, %v2384_v14 }
 0xb87   :  { %v2457_v20 = vmul.f32 %v5416_v4, %v2379_v7  ;;  %v4191_v7 = vld [vmem:[%s6849_s12 + $0x20] sm:$0xff]  ;;  %v5200_v4 = vpack.c.bf16 %v4190_v10, %v4189_v63 }
 0xb88   :  { %v5188_v2 = vpack.c.bf16 %v4192_v41, %v4191_v7 }
 0xb89   :  { %v5418_v48 = vpop.eup %5417  ;;  %v5176_v57 = vpack.c.bf16 %v2458_v43, %v2457_v20 }
 0xb8a   :  { %v5420_v27 = vpop.eup %5419  ;;  %v2438_v9 = vadd.f32 1.0, %v5418_v48 }
 0xb8b   :  { %v2437_v16 = vadd.f32 1.0, %v5420_v27  ;;  %5177 = vmatprep.subr.bf16.mxu0 %v5176_v57  ;;  %v4208_v27 = vld [vmem:[%s6851_s14 + $0x20] sm:$0xff] }
 0xb8c   :  { %5425 = vrcp.f32 %v2438_v9  ;;  %5179 = vmatpush3.bf16.msra.mxu0 %v5176_v57  ;;  %v4209_v9 = vld [vmem:[%s6851_s14 + $0x28] sm:$0xff] }
 0xb8d   :  { %v5422_v17 = vpop.eup %5421  ;;  %5427 = vrcp.f32 %v2437_v16  ;;  %v5204_v16 = vpack.c.bf16 %v4209_v9, %v4208_v27 }
 0xb8e   :  { %v5424_v11 = vpop.eup %5423  ;;  %v2460_v55 = vmul.f32 %v5422_v17, %v2394_v0  ;;  %v4193_v0 = vld [vmem:[%s6849_s12 + $0x30] sm:$0xff] }
 0xb8f   :  { %v2459_v50 = vmul.f32 %v5424_v11, %v2389_v1  ;;  %v4194_v1 = vld [vmem:[%s6849_s12 + $0x38] sm:$0xff]  ;;  %5205 = vmatprep.subr.bf16.mxu1 %v5204_v16  ;;  %v4210_v17 = vld [vmem:[%s6851_s14 + $0x30] sm:$0xff] }
 0xb90   :  { %5207 = vmatpush3.bf16.msra.mxu1 %v5204_v16  ;;  %v4211_v11 = vld [vmem:[%s6851_s14 + $0x38] sm:$0xff]  ;;  %v3059_v16 = vld [vmem:[%s6853_s16] sm:$0xff] }
 0xb91   :  { %v5180_v54 = vpack.c.bf16 %v2460_v55, %v2459_v50  ;;  %v5208_v55 = vpack.c.bf16 %v4211_v11, %v4210_v17  ;;  %v4203_v50 = vld [vmem:[#allocation9 + $0x1] ss:$0 sm:$0xff]  ;;  %v3060_v17 = vld [vmem:[%s6853_s16 + $0x8] sm:$0xff]  ;;  %v3061_v11 = vld [vmem:[%s6853_s16 + $0x10] sm:$0xff] }
 0xb93   :  { %5181 = vmatprep.subr.bf16.mxu0 %v5180_v54  ;;  %5209 = vmatprep.subr.bf16.mxu1 %v5208_v55 }
 0xb94   :  { %5183 = vmatpush3.bf16.msra.mxu0 %v5180_v54  ;;  %5211 = vmatpush3.bf16.msra.mxu1 %v5208_v55  ;;  %v5220_v55 = vpack.c.bf16 %v3060_v17, %v3059_v16  ;;  %v3399_v16 = vld [vmem:[%s6855_s18] sm:$0xff]  ;;  %v3400_v17 = vld [vmem:[%s6855_s18 + $0x8] sm:$0xff] }
 0xb96   :  { %v5426_v52 = vpop.eup %5425 }
 0xb97   :  { %v5428_v49 = vpop.eup %5427  ;;  %v2462_v14 = vmul.f32 %v5426_v52, %v2404_v40  ;;  %v5192_v40 = vpack.c.bf16 %v4194_v1, %v4193_v0 }
 0xb98   :  { %v2461_v30 = vmul.f32 %v5428_v49, %v2399_v46  ;;  %v4187_v46 = vld [vmem:[%s6848_s11 + $0x20] sm:$0xff] }
 0xb99   :  { %v5196_v3 = vpack.c.bf16 %v4188_v5, %v4187_v46 }
 0xb9a   :  { %v5184_v53 = vpack.c.bf16 %v2462_v14, %v2461_v30 }
 0xb9c   :  { %5185 = vmatprep.subr.bf16.mxu0 %v5184_v53 }
 0xb9d   :  { %5187 = vmatpush3.bf16.msra.mxu0 %v5184_v53 }
 0xb9e   :  { %5189 = vmatprep.subr.bf16.mxu0 %v5188_v2 }
 0xba0   :  { %4903 = vmatmul.mubr.msk.f32.vlgmr.msra.gmra.mrb[52].mxu0 %vm1311_vm5, %v6337_v60 }
 0xba1   :  { %4905 = vmatprep.mubr.msk.f32.mxu0 %vm1311_vm5, %v6339_v6  ;;  %5191 = vmatpush3.bf16.msra.mxu0 %v5188_v2 }
 0xba2   :  { %5193 = vmatprep.subr.bf16.mxu0 %v5192_v40 }
 0xba4   :  { %4906 = vmatmul.mubr.msk.f32.gmra.mrb[54].mxu0 %vm1311_vm5, %v6345_v38 }
 0xba5   :  { %5195 = vmatpush3.bf16.msra.mxu0 %v5192_v40 }
 0xba6   :  { %5197 = vmatprep.subr.bf16.mxu0 %v5196_v3 }
 0xc73   :  { %v4904_v12 = vpop.f32.mrb[52].mxu0 }
 0xc74   :  { %v2529_v21 = vpop.f32.mrb[53].mxu0  ;;  %v2549_v24 = vmul.f32 0.01, %v4904_v12 }
 0xc75   :  { %v2548_v42 = vmul.f32 0.01, %v2529_v21 }
 0xc77   :  { %v4907_v43 = vpop.f32.mrb[54].mxu0  ;;  %4916 = vmatprep.mubr.msk.f32.mxu0 %vm203_vm0, %v2548_v42 }
 0xc78   :  { %v2539_v20 = vpop.f32.mrb[55].mxu0  ;;  %4917 = vmatmul.mubr.msk.f32.vlgmr.msra.gmra.mrb[56].mxu0 %vm203_vm0, %v2549_v24  ;;  %v2551_v57 = vmul.f32 0.01, %v4907_v43 }
 0xc79   :  { %v2550_v48 = vmul.f32 0.01, %v2539_v20  ;;  %5199 = vmatpush3.bf16.msra.mxu0 %v5196_v3 }
 0xc7a   :  { %5201 = vmatprep.subr.bf16.mxu0 %v5200_v4 }
 0xc7b   :  { %4919 = vmatprep.mubr.msk.f32.mxu0 %vm203_vm0, %v2550_v48 }
 0xc7c   :  { %4920 = vmatmul.mubr.msk.f32.gmra.mrb[58].mxu0 %vm203_vm0, %v2551_v57 }
 0xc7d   :  { %5203 = vmatpush3.bf16.msra.mxu0 %v5200_v4  ;;  %4930 = vmatprep.mubr.msk.f32.mxu0 %vm203_vm0, %v6407_v61 }
 0xc7e   :  { %5221 = vmatprep.subr.bf16.mxu0 %v5220_v55 }
 0xc80   :  { %4931 = vmatmul.mubr.msk.f32.vlgmr.msra.gmra.mrb[56].mxu0 %vm203_vm0, %v6405_v39 }
 0xc81   :  { %4933 = vmatprep.mubr.msk.f32.mxu0 %vm203_vm0, %v6415_v59  ;;  %5223 = vmatpush3.bf16.msra.mxu0 %v5220_v55  ;;  %v3401_v55 = vld [vmem:[%s6855_s18 + $0x10] sm:$0xff] }
 0xc84   :  { %4934 = vmatmul.mubr.msk.f32.gmra.mrb[58].mxu0 %vm203_vm0, %v6413_v51 }
 0xd53   :  { %v4932_v54 = vpop.f32.mrb[56].mxu0 }
 0xd54   :  { %v2765_v52 = vadd.f32 %v4932_v54, %v4203_v50  ;;  %v2737_v49 = vpop.f32.mrb[57].mxu0 }
 0xd55   :  { %v2764_v14 = vadd.f32 %v4203_v50, %v2737_v49 }
 0xd56   :  { %v4205_v7 = vmul.f32 -1.442695, %v2765_v52 }
 0xd57   :  { %v4204_v41 = vmul.f32 -1.442695, %v2764_v14  ;;  %v4935_v30 = vpop.f32.mrb[58].mxu0 }
 0xd58   :  { %5429 = vpow2.f32 %v4205_v7  ;;  %v2767_v53 = vadd.f32 %v4935_v30, %v4203_v50  ;;  %v2747_v2 = vpop.f32.mrb[59].mxu0 }
 0xd59   :  { %5431 = vpow2.f32 %v4204_v41  ;;  %v2766_v0 = vadd.f32 %v4203_v50, %v2747_v2  ;;  %v3062_v50 = vld [vmem:[%s6853_s16 + $0x18] sm:$0xff] }
 0xd5a   :  { %v4207_v1 = vmul.f32 -1.442695, %v2767_v53  ;;  %v5224_v54 = vpack.c.bf16 %v3062_v50, %v3061_v11  ;;  %v5228_v11 = vpack.c.bf16 %v3400_v17, %v3399_v16 }
 0xd5b   :  { %v4206_v40 = vmul.f32 -1.442695, %v2766_v0 }
 0xd5c   :  { %5433 = vpow2.f32 %v4207_v1  ;;  %5225 = vmatprep.subr.bf16.mxu0 %v5224_v54 }
 0xd5d   :  { %5435 = vpow2.f32 %v4206_v40  ;;  %5227 = vmatpush3.bf16.msra.mxu0 %v5224_v54  ;;  %v3297_v54 = vpop.permute.xlu1 %3296 }
 0xd62   :  { %v5430_v46 = vpop.eup %5429 }
 0xd63   :  { %v5432_v5 = vpop.eup %5431  ;;  %v2781_v3 = vadd.f32 1.0, %v5430_v46 }
 0xd64   :  { %v2780_v12 = vadd.f32 1.0, %v5432_v5 }
 0xd65   :  { %5437 = vrcp.f32 %v2781_v3 }
 0xd66   :  { %v5434_v63 = vpop.eup %5433  ;;  %5439 = vrcp.f32 %v2780_v12 }
 0xd67   :  { %v5436_v10 = vpop.eup %5435  ;;  %v2783_v21 = vadd.f32 1.0, %v5434_v63 }
 0xd68   :  { %v2782_v42 = vadd.f32 1.0, %v5436_v10 }
 0xd69   :  { %5441 = vrcp.f32 %v2783_v21 }
 0xd6a   :  { %5443 = vrcp.f32 %v2782_v42 }
 0xd6f   :  { %v5438_v24 = vpop.eup %5437 }
 0xd70   :  { %v5440_v4 = vpop.eup %5439  ;;  %v2793_v20 = vmul.f32 %v5438_v24, %v2765_v52  ;;  %v4216_v52 = vld [vmem:[#allocation11 + $0x1] ss:$0 sm:$0xff] }
 0xd71   :  { %v2792_v43 = vmul.f32 %v5440_v4, %v2764_v14 }
 0xd73   :  { %v5442_v48 = vpop.eup %5441  ;;  %4944 = vmatprep.mubr.msk.f32.mxu1 %vm203_vm0, %v2792_v43 }
 0xd74   :  { %v5444_v57 = vpop.eup %5443  ;;  %4945 = vmatmul.mubr.msk.f32.vlgmr.msra.gmra.mrb[64].mxu1 %vm203_vm0, %v2793_v20  ;;  %v2795_v9 = vmul.f32 %v5442_v48, %v2767_v53 }
 0xd75   :  { %v2794_v27 = vmul.f32 %v5444_v57, %v2766_v0 }
 0xd77   :  { %4947 = vmatprep.mubr.msk.f32.mxu1 %vm203_vm0, %v2794_v27 }
 0xd78   :  { %4948 = vmatmul.mubr.msk.f32.gmra.mrb[66].mxu1 %vm203_vm0, %v2795_v9 }
 0xd79   :  { %4958 = vmatprep.mubr.msk.f32.mxu1 %vm203_vm0, %v5953_v8 }
 0xe47   :  { %v4946_v8 = vpop.f32.mrb[64].mxu1 }
 0xe48   :  { %v2899_v49 = vadd.f32 %v4946_v8, %v6405_v39  ;;  %v2879_v14 = vpop.f32.mrb[65].mxu1  ;;  %v3299_v8 = vpop.permute.xlu1 %3298 }
 0xe49   :  { %v2898_v7 = vadd.f32 %v2879_v14, %v6407_v61 }
 0xe4a   :  { %v2911_v41 = vadd.f32 %v4216_v52, %v2899_v49 }
 0xe4b   :  { %v2910_v30 = vadd.f32 %v4216_v52, %v2898_v7  ;;  %v4949_v53 = vpop.f32.mrb[66].mxu1 }
 0xe4c   :  { %3985 = vst.msk [vmem:[#allocation14 + $0x8] sm:$0xff] %vm203_vm0, %v2911_v41  ;;  %v2901_v2 = vadd.f32 %v4949_v53, %v6413_v51  ;;  %v2889_v0 = vpop.f32.mrb[67].mxu1 }
 0xe4d   :  { %3984 = vst.msk [vmem:[#allocation14] sm:$0xff] %vm203_vm0, %v2910_v30  ;;  %v2900_v1 = vadd.f32 %v2889_v0, %v6415_v59  ;;  %v5212_v40 = vpack.c.bf16 %v2911_v41, %v2910_v30  ;;  %v4249_v30 = vld [vmem:[#allocation12] ss:$0 sm:$0xff] }
 0xe4e   :  { %v2913_v46 = vadd.f32 %v4216_v52, %v2901_v2  ;;  %v3307_v2 = vpop.permute.xlu0 %3306 }
 0xe4f   :  { %v2912_v5 = vadd.f32 %v4216_v52, %v2900_v1  ;;  %5213 = vmatprep.subr.bf16.mxu1 %v5212_v40  ;;  %v3301_v52 = vpop.permute.xlu1 %3300 }
 0xe50   :  { %3987 = vst.msk [vmem:[#allocation14 + $0x18] sm:$0xff] %vm203_vm0, %v2913_v46  ;;  %5215 = vmatpush3.bf16.msra.mxu1 %v5212_v40 }
 0xe51   :  { %3986 = vst.msk [vmem:[#allocation14 + $0x10] sm:$0xff] %vm203_vm0, %v2912_v5  ;;  %v5216_v39 = vpack.c.bf16 %v2913_v46, %v2912_v5 }
 0xe53   :  { %5217 = vmatprep.subr.bf16.mxu1 %v5216_v39  ;;  %v3303_v49 = vpop.permute.xlu1 %3302 }
 0xe54   :  { %5219 = vmatpush3.bf16.msra.mxu1 %v5216_v39 }
 0xe55   :  { %5229 = vmatprep.subr.bf16.mxu1 %v5228_v11 }
 0xe57   :  { %4959 = vmatmul.mubr.msk.f32.vlgmr.msra.gmra.mrb[68].mxu1 %vm203_vm0, %v5971_v13  ;;  %v3305_v14 = vpop.permute.xlu1 %3304 }
 0xe58   :  { %4961 = vmatprep.mubr.msk.f32.mxu1 %vm203_vm0, %v5976_v15  ;;  %5231 = vmatpush3.bf16.msra.mxu1 %v5228_v11 }
 0xe5b   :  { %4962 = vmatmul.mubr.msk.f32.gmra.mrb[70].mxu1 %vm203_vm0, %v5988_v18 }
 0xe5c   :  { %4964 = vmatprep.mubr.msk.f32.mxu1 %vm203_vm0, %v5992_v19 }
 0xe5f   :  { %4965 = vmatmul.mubr.msk.f32.gmra.mrb[72].mxu1 %vm203_vm0, %v6003_v22 }
 0xe60   :  { %4967 = vmatprep.mubr.msk.f32.mxu1 %vm203_vm0, %v6007_v23 }
 0xe63   :  { %4968 = vmatmul.mubr.msk.f32.gmra.mrb[74].mxu1 %vm203_vm0, %v6015_v25 }
 0xe64   :  { %4970 = vmatprep.mubr.msk.f32.mxu1 %vm203_vm0, %v6019_v26 }
 0xe67   :  { %4971 = vmatmul.mubr.msk.f32.gmra.mrb[76].mxu1 %vm203_vm0, %v6026_v28 }
 0xe68   :  { %4973 = vmatprep.mubr.msk.f32.mxu1 %vm203_vm0, %v6030_v29 }
 0xe6b   :  { %4974 = vmatmul.mubr.msk.f32.gmra.mrb[78].mxu1 %vm203_vm0, %v6037_v31 }
 0xe6c   :  { %4976 = vmatprep.mubr.msk.f32.mxu1 %vm203_vm0, %v6041_v32 }
 0xe6f   :  { %4977 = vmatmul.mubr.msk.f32.gmra.mrb[80].mxu1 %vm203_vm0, %v6048_v34 }
 0xe70   :  { %4979 = vmatprep.mubr.msk.f32.mxu1 %vm203_vm0, %v6052_v35 }
 0xe73   :  { %4980 = vmatmul.mubr.msk.f32.gmra.mrb[82].mxu1 %vm203_vm0, %v6056_v36 }
 0xf2a   :  { %v4960_v13 = vpop.f32.mrb[68].mxu1 }
 0xf2b   :  { %v2980_v15 = vpop.f32.mrb[69].mxu1 }
 0xf2c   :  { %4990 = vmatprep.mubr.msk.f32.mxu0 %vm203_vm0, %v2980_v15 }
 0xf2d   :  { %4991 = vmatmul.mubr.msk.f32.vlgmr.msra.gmra.mrb[60].mxu0 %vm203_vm0, %v4960_v13 }
 0xf2e   :  { %v4963_v18 = vpop.f32.mrb[70].mxu1 }
 0xf2f   :  { %v2990_v19 = vpop.f32.mrb[71].mxu1 }
 0xf30   :  { %4993 = vmatprep.mubr.msk.f32.mxu0 %vm203_vm0, %v2990_v19 }
 0xf31   :  { %4994 = vmatmul.mubr.msk.f32.gmra.mrb[62].mxu0 %vm203_vm0, %v4963_v18 }
 0xf32   :  { %v4966_v22 = vpop.f32.mrb[72].mxu1 }
 0xf33   :  { %v3000_v23 = vpop.f32.mrb[73].mxu1 }
 0xf34   :  { %4996 = vmatprep.mubr.msk.f32.mxu0 %vm203_vm0, %v3000_v23 }
 0xf35   :  { %4997 = vmatmul.mubr.msk.f32.gmra.mrb[64].mxu0 %vm203_vm0, %v4966_v22 }
 0xf36   :  { %v4969_v25 = vpop.f32.mrb[74].mxu1 }
 0xf37   :  { %v3010_v26 = vpop.f32.mrb[75].mxu1 }
 0xf38   :  { %4999 = vmatprep.mubr.msk.f32.mxu0 %vm203_vm0, %v3010_v26 }
 0xf39   :  { %5000 = vmatmul.mubr.msk.f32.gmra.mrb[66].mxu0 %vm203_vm0, %v4969_v25 }
 0xf3a   :  { %v4972_v28 = vpop.f32.mrb[76].mxu1 }
 0xf3b   :  { %v3020_v29 = vpop.f32.mrb[77].mxu1 }
 0xf3c   :  { %5002 = vmatprep.mubr.msk.f32.mxu0 %vm203_vm0, %v3020_v29 }
 0xf3d   :  { %5003 = vmatmul.mubr.msk.f32.gmra.mrb[68].mxu0 %vm203_vm0, %v4972_v28 }
 0xf3e   :  { %v4975_v31 = vpop.f32.mrb[78].mxu1 }
 0xf3f   :  { %v3030_v32 = vpop.f32.mrb[79].mxu1 }
 0xf40   :  { %5005 = vmatprep.mubr.msk.f32.mxu0 %vm203_vm0, %v3030_v32 }
 0xf41   :  { %5006 = vmatmul.mubr.msk.f32.gmra.mrb[70].mxu0 %vm203_vm0, %v4975_v31 }
 0xf42   :  { %v4978_v34 = vpop.f32.mrb[80].mxu1 }
 0xf43   :  { %v3040_v35 = vpop.f32.mrb[81].mxu1 }
 0xf44   :  { %5008 = vmatprep.mubr.msk.f32.mxu0 %vm203_vm0, %v3040_v35 }
 0xf45   :  { %5009 = vmatmul.mubr.msk.f32.gmra.mrb[72].mxu0 %vm203_vm0, %v4978_v34 }
 0xf46   :  { %v4981_v36 = vpop.f32.mrb[82].mxu1 }
 0xf47   :  { %v3050_v61 = vpop.f32.mrb[83].mxu1 }
 0xf48   :  { %5011 = vmatprep.mubr.msk.f32.mxu0 %vm203_vm0, %v3050_v61 }
 0xf49   :  { %5012 = vmatmul.mubr.msk.f32.gmra.mrb[74].mxu0 %vm203_vm0, %v4981_v36 }
0x1000   :  { %v4992_v51 = vpop.f32.mrb[60].mxu0 }
0x1001   :  { %v3177_v59 = vpop.f32.mrb[61].mxu0 }
0x1004   :  { %v4995_v3 = vpop.f32.mrb[62].mxu0 }
0x1005   :  { %v3187_v12 = vpop.f32.mrb[63].mxu0 }
0x1008   :  { %v4998_v63 = vpop.f32.mrb[64].mxu0 }
0x1009   :  { %v6645_v10 = vpop.f32.mrb[65].mxu0 }
0x100c   :  { %v5001_v21 = vpop.f32.mrb[66].mxu0 }
0x100d   :  { %v6647_v42 = vpop.f32.mrb[67].mxu0 }
0x1010   :  { %v5004_v24 = vpop.f32.mrb[68].mxu0 }
0x1011   :  { %3266 = vrot.lane.b32.xlu1 %v5004_v24, %s5719_s1  ;;  %v3217_v4 = vpop.f32.mrb[69].mxu0 }
0x1014   :  { %v5007_v43 = vpop.f32.mrb[70].mxu0 }
0x1015   :  { %3264 = vrot.lane.b32.xlu1 %v3217_v4, %s5719_s1  ;;  %v3227_v20 = vpop.f32.mrb[71].mxu0 }
0x1018   :  { %v5010_v48 = vpop.f32.mrb[72].mxu0 }
0x1019   :  { %3270 = vrot.lane.b32.xlu1 %v5007_v43, %s5719_s1  ;;  %3274 = vrot.lane.b32.xlu0 %v5010_v48, %s5719_s1  ;;  %v3237_v57 = vpop.f32.mrb[73].mxu0 }
0x101c   :  { %v5013_v27 = vpop.f32.mrb[74].mxu0 }
0x101d   :  { %3268 = vrot.lane.b32.xlu1 %v3227_v20, %s5719_s1  ;;  %3278 = vrot.lane.b32.xlu0 %v5013_v27, %s5719_s1  ;;  %v3247_v9 = vpop.f32.mrb[75].mxu0 }
0x1021   :  { %3272 = vrot.lane.b32.xlu1 %v3237_v57, %s5719_s1  ;;  %3310 = vrot.lane.b32.xlu0 %v6221_v33, %s5720_s22  ;;  %v3402_v33 = vld [vmem:[%s6855_s18 + $0x18] sm:$0xff] }
0x1022   :  { %v5232_v50 = vpack.c.bf16 %v3402_v33, %v3401_v55 }
0x1024   :  { %5233 = vmatprep.subr.bf16.mxu1 %v5232_v50 }
0x1025   :  { %3276 = vrot.lane.b32.xlu1 %v3247_v9, %s5719_s1  ;;  %5235 = vmatpush3.bf16.msra.mxu1 %v5232_v50 }
0x1029   :  { %3308 = vrot.lane.b32.xlu1 %v6223_v37, %s5720_s22 }
0x1083   :  { %v3267_v7 = vpop.permute.xlu1 %3266 }
0x1084   :  { %v3289_v41 = vadd.f32 %v4992_v51, %v3267_v7 }
0x1086   :  { %v3321_v53 = vadd.f32 %v3299_v8, %v3289_v41 }
0x1087   :  { %v3265_v0 = vpop.permute.xlu1 %3264 }
0x1088   :  { %v6673_v1 = vadd.f32 %v4249_v30, %v3321_v53  ;;  %v3288_v40 = vadd.f32 %v3265_v0, %v3177_v59 }
0x108a   :  { %v4251_v46 = vmul.f32 -1.442695, %v6673_v1  ;;  %v3320_v5 = vadd.f32 %v3297_v54, %v3288_v40 }
0x108b   :  { %v3271_v39 = vpop.permute.xlu1 %3270  ;;  %v3275_v37 = vpop.permute.xlu0 %3274 }
0x108c   :  { %5445 = vpow2.f32 %v4251_v46  ;;  %v3335_v13 = vadd.f32 %v4249_v30, %v3320_v5  ;;  %v3291_v15 = vadd.f32 %v4995_v3, %v3271_v39  ;;  %v3293_v18 = vadd.f32 %v4998_v63, %v3275_v37 }
0x108e   :  { %v4250_v19 = vmul.f32 -1.442695, %v3335_v13  ;;  %v3323_v22 = vadd.f32 %v3303_v49, %v3291_v15  ;;  %v3325_v23 = vadd.f32 %v3307_v2, %v3293_v18 }
0x108f   :  { %v3269_v25 = vpop.permute.xlu1 %3268  ;;  %v3279_v26 = vpop.permute.xlu0 %3278 }
0x1090   :  { %5447 = vpow2.f32 %v4250_v19  ;;  %v6676_v28 = vadd.f32 %v4249_v30, %v3323_v22  ;;  %v6678_v29 = vadd.f32 %v4249_v30, %v3325_v23  ;;  %v3290_v31 = vadd.f32 %v3269_v25, %v3187_v12 }
0x1091   :  { %v3295_v35 = vadd.f32 %v5001_v21, %v3279_v26 }
0x1092   :  { %v4253_v32 = vmul.f32 -1.442695, %v6676_v28  ;;  %v3322_v34 = vadd.f32 %v3301_v52, %v3290_v31  ;;  %v4255_v36 = vmul.f32 -1.442695, %v6678_v29 }
0x1093   :  { %v3273_v61 = vpop.permute.xlu1 %3272  ;;  %v3311_v51 = vpop.permute.xlu0 %3310 }
0x1094   :  { %5449 = vpow2.f32 %v4253_v32  ;;  %v3337_v59 = vadd.f32 %v4249_v30, %v3322_v34  ;;  %v3292_v3 = vadd.f32 %v3273_v61, %v6645_v10  ;;  %v3327_v63 = vadd.f32 %v3311_v51, %v3295_v35  ;;  %v3597_v34 = vld [vmem:[%s6857_s20 + $0x10] sm:$0xff]  ;;  %v3598_v35 = vld [vmem:[%s6857_s20 + $0x18] sm:$0xff] }
0x1095   :  { %5451 = vpow2.f32 %v4255_v36  ;;  %v4258_v36 = vld [vmem:[%s6856_s19] ss:$0 sm:$0xff] }
0x1096   :  { %v5446_v24 = vpop.eup %5445  ;;  %v4252_v4 = vmul.f32 -1.442695, %v3337_v59  ;;  %v3324_v43 = vadd.f32 %v3305_v14, %v3292_v3  ;;  %v3342_v20 = vadd.f32 %v4249_v30, %v3327_v63 }
0x1097   :  { %v3368_v48 = vadd.f32 1.0, %v5446_v24  ;;  %v3277_v12 = vpop.permute.xlu1 %3276 }
0x1098   :  { %5453 = vpow2.f32 %v4252_v4  ;;  %v3339_v57 = vadd.f32 %v4249_v30, %v3324_v43  ;;  %v4257_v9 = vmul.f32 -1.442695, %v3342_v20  ;;  %v3294_v16 = vadd.f32 %v3277_v12, %v6647_v42 }
0x1099   :  { %5455 = vrcp.f32 %v3368_v48 }
0x109a   :  { %v5448_v27 = vpop.eup %5447  ;;  %v4254_v21 = vmul.f32 -1.442695, %v3339_v57 }
0x109b   :  { %v3367_v17 = vadd.f32 1.0, %v5448_v27  ;;  %v3309_v11 = vpop.permute.xlu1 %3308 }
0x109c   :  { %5457 = vpow2.f32 %v4254_v21  ;;  %v3326_v10 = vadd.f32 %v3309_v11, %v3294_v16 }
0x109d   :  { %5459 = vrcp.f32 %v3367_v17 }
0x109e   :  { %v5450_v55 = vpop.eup %5449  ;;  %5461 = vpow2.f32 %v4257_v9  ;;  %v3341_v33 = vadd.f32 %v4249_v30, %v3326_v10 }
0x109f   :  { %v3370_v50 = vadd.f32 1.0, %v5450_v55  ;;  %v5452_v8 = vpop.eup %5451 }
0x10a0   :  { %v4256_v54 = vmul.f32 -1.442695, %v3341_v33  ;;  %v3372_v14 = vadd.f32 1.0, %v5452_v8 }
0x10a2   :  { %v5454_v52 = vpop.eup %5453  ;;  %5463 = vpow2.f32 %v4256_v54 }
0x10a3   :  { %v3369_v49 = vadd.f32 1.0, %v5454_v52  ;;  %5465 = vrcp.f32 %v3370_v50  ;;  %v5456_v7 = vpop.eup %5455 }
0x10a4   :  { %v3392_v40 = vmul.f32 %v5456_v7, %v6673_v1 }
0x10a5   :  { %5467 = vrcp.f32 %v3369_v49 }
0x10a6   :  { %v5458_v42 = vpop.eup %5457  ;;  %5469 = vrcp.f32 %v3372_v14 }
0x10a7   :  { %v5460_v41 = vpop.eup %5459  ;;  %v3371_v53 = vadd.f32 1.0, %v5458_v42 }
0x10a8   :  { %v5462_v2 = vpop.eup %5461  ;;  %v3391_v0 = vmul.f32 %v5460_v41, %v3335_v13 }
0x10a9   :  { %5471 = vrcp.f32 %v3371_v53  ;;  %v3374_v30 = vadd.f32 1.0, %v5462_v2 }
0x10aa   :  { %5022 = vmatprep.mubr.msk.f32.mxu1 %vm203_vm0, %v3391_v0 }
0x10ab   :  { %5023 = vmatmul.mubr.msk.f32.vlgmr.msra.gmra.mrb[84].mxu1 %vm203_vm0, %v3392_v40  ;;  %5473 = vrcp.f32 %v3374_v30 }
0x10ac   :  { %v5464_v46 = vpop.eup %5463 }
0x10ad   :  { %v5466_v5 = vpop.eup %5465  ;;  %v3373_v39 = vadd.f32 1.0, %v5464_v46 }
0x10ae   :  { %v3394_v18 = vmul.f32 %v5466_v5, %v6676_v28  ;;  %v3595_v28 = vld [vmem:[%s6857_s20] sm:$0xff] }
0x10af   :  { %v5468_v37 = vpop.eup %5467  ;;  %5475 = vrcp.f32 %v3373_v39 }
0x10b0   :  { %v3393_v15 = vmul.f32 %v5468_v37, %v3337_v59  ;;  %v5470_v19 = vpop.eup %5469 }
0x10b1   :  { %v3396_v22 = vmul.f32 %v5470_v19, %v6678_v29  ;;  %v3596_v29 = vld [vmem:[%s6857_s20 + $0x8] sm:$0xff] }
0x10b2   :  { %5025 = vmatprep.mubr.msk.f32.mxu1 %vm203_vm0, %v3393_v15  ;;  %v5236_v32 = vpack.c.bf16 %v3596_v29, %v3595_v28 }
0x10b3   :  { %v5472_v13 = vpop.eup %5471  ;;  %5026 = vmatmul.mubr.msk.f32.gmra.mrb[86].mxu1 %vm203_vm0, %v3394_v18 }
0x10b4   :  { %v3395_v1 = vmul.f32 %v5472_v13, %v3339_v57  ;;  %5237 = vmatprep.subr.bf16.mxu0 %v5236_v32 }
0x10b5   :  { %v5474_v23 = vpop.eup %5473  ;;  %5239 = vmatpush3.bf16.msra.mxu0 %v5236_v32 }
0x10b6   :  { %5028 = vmatprep.mubr.msk.f32.mxu1 %vm203_vm0, %v3395_v1  ;;  %v3398_v31 = vmul.f32 %v5474_v23, %v3342_v20 }
0x10b7   :  { %5029 = vmatmul.mubr.msk.f32.gmra.mrb[88].mxu1 %vm203_vm0, %v3396_v22 }
0x10b9   :  { %v5476_v25 = vpop.eup %5475 }
0x10ba   :  { %v3397_v26 = vmul.f32 %v5476_v25, %v3341_v33 }
0x10bc   :  { %5031 = vmatprep.mubr.msk.f32.mxu1 %vm203_vm0, %v3397_v26 }
0x10bd   :  { %5032 = vmatmul.mubr.msk.f32.gmra.mrb[90].mxu1 %vm203_vm0, %v3398_v31 }
0x10be   :  { %5070 = vmatprep.mubr.msk.f32.mxu1 %vm1311_vm5, %v6321_v58  ;;  %v5240_v58 = vpack.c.bf16 %v3598_v35, %v3597_v34 }
0x10c0   :  { %5241 = vmatprep.subr.bf16.mxu0 %v5240_v58 }
0x10c1   :  { %5243 = vmatpush3.bf16.msra.mxu0 %v5240_v58 }
0x117e   :  { %v5024_v61 = vpop.f32.mrb[84].mxu1 }
0x117f   :  { %v3506_v51 = vadd.f32 %v5024_v61, %v4258_v36  ;;  %v3500_v59 = vpop.f32.mrb[85].mxu1  ;;  %v5721_v61 = vmov 0  }
0x1180   :  { %v3501_v3 = vadd.f32 %v4258_v36, %v3500_v59  ;;  %5283 = vset.pattern.permute.xlu0 %v5721_v61  ;;  %5284 = vset.pattern.permute.xlu1 %v5721_v61 }
0x1181   :  { %v4268_v63 = vmul.f32 -1.442695, %v3506_v51 }
0x1182   :  { %v4267_v24 = vmul.f32 -1.442695, %v3501_v3 }
0x1183   :  { %5477 = vpow2.f32 %v4268_v63 }
0x1184   :  { %5479 = vpow2.f32 %v4267_v24  ;;  %v6916_v24 = vld [vmem:[#allocation28_spill] sm:$0xff] }
0x1185   :  { %vm3765_vm15 = vcmp.eq.f32.partialorder %v6916_v24, inf  ;;  %vm3767_vm2 = vcmp.eq.f32.partialorder %v6916_v24, 0.0 }
0x1186   :  { %v5027_v4 = vpop.f32.mrb[86].mxu1 }
0x1187   :  { %v3516_v43 = vadd.f32 %v5027_v4, %v4258_v36  ;;  %v3510_v20 = vpop.f32.mrb[87].mxu1 }
0x1188   :  { %v3511_v48 = vadd.f32 %v4258_v36, %v3510_v20  ;;  %v3747_v20 = vand.u32 2147483648, %v6125_v44 }
0x1189   :  { %v4270_v12 = vmul.f32 -1.442695, %v3516_v43 }
0x118a   :  { %v4269_v57 = vmul.f32 -1.442695, %v3511_v48  ;;  %v5030_v27 = vpop.f32.mrb[88].mxu1 }
0x118b   :  { %5481 = vpow2.f32 %v4270_v12  ;;  %v3526_v21 = vadd.f32 %v5030_v27, %v4258_v36  ;;  %v3520_v9 = vpop.f32.mrb[89].mxu1  ;;  %v6917_v27 = vld [vmem:[#allocation30_spill] sm:$0xff] }
0x118c   :  { %5483 = vpow2.f32 %v4269_v57  ;;  %v3521_v16 = vadd.f32 %v4258_v36, %v3520_v9  ;;  %v3740_v57 = vand.u32 2147483648, %v6127_v45  ;;  %vm3786_vm3 = vcmp.eq.f32.partialorder %v6917_v27, inf }
0x118d   :  { %v5478_v17 = vpop.eup %5477  ;;  %v4272_v11 = vmul.f32 -1.442695, %v3526_v21 }
0x118e   :  { %v5480_v10 = vpop.eup %5479  ;;  %v3564_v55 = vadd.f32 1.0, %v5478_v17  ;;  %v4271_v33 = vmul.f32 -1.442695, %v3521_v16 }
0x118f   :  { %v3563_v50 = vadd.f32 1.0, %v5480_v10  ;;  %5485 = vpow2.f32 %v4272_v11 }
0x1190   :  { %5487 = vrcp.f32 %v3564_v55  ;;  %v5033_v54 = vpop.f32.mrb[90].mxu1 }
0x1191   :  { %5489 = vrcp.f32 %v3563_v50  ;;  %v3536_v8 = vadd.f32 %v5033_v54, %v4258_v36  ;;  %v3530_v52 = vpop.f32.mrb[91].mxu1 }
0x1192   :  { %5491 = vpow2.f32 %v4271_v33  ;;  %v3531_v49 = vadd.f32 %v4258_v36, %v3530_v52 }
0x1193   :  { %v4274_v14 = vmul.f32 -1.442695, %v3536_v8 }
0x1194   :  { %v4273_v42 = vmul.f32 -1.442695, %v3531_v49 }
0x1195   :  { %v5482_v7 = vpop.eup %5481  ;;  %5493 = vpow2.f32 %v4274_v14 }
0x1196   :  { %v5484_v41 = vpop.eup %5483  ;;  %v3566_v53 = vadd.f32 1.0, %v5482_v7  ;;  %5495 = vpow2.f32 %v4273_v42 }
0x1197   :  { %v3565_v2 = vadd.f32 1.0, %v5484_v41 }
0x1198   :  { %5497 = vrcp.f32 %v3566_v53 }
0x1199   :  { %v5486_v0 = vpop.eup %5485  ;;  %5499 = vrcp.f32 %v3565_v2 }
0x119a   :  { %v5488_v40 = vpop.eup %5487  ;;  %v3568_v30 = vadd.f32 1.0, %v5486_v0  ;;  %v3775_v0 = vand.u32 2147483648, %v6154_v62 }
0x119b   :  { %v5490_v46 = vpop.eup %5489  ;;  %v3588_v37 = vmul.f32 %v5488_v40, %v3506_v51 }
0x119c   :  { %v5492_v5 = vpop.eup %5491  ;;  %v3587_v39 = vmul.f32 %v5490_v46, %v3501_v3  ;;  %5501 = vrcp.f32 %v3568_v30  ;;  %v3768_v30 = vand.u32 2147483648, %v6916_v24 }
0x119d   :  { %v3567_v15 = vadd.f32 1.0, %v5492_v5  ;;  %v4275_v5 = vld [vmem:[#allocation2] ss:$0 sm:$0xff] }
0x119e   :  { %5042 = vmatprep.mubr.msk.f32.mxu0 %vm203_vm0, %v3587_v39 }
0x119f   :  { %5503 = vrcp.f32 %v3567_v15  ;;  %5043 = vmatmul.mubr.msk.f32.vlgmr.msra.gmra.mrb[76].mxu0 %vm203_vm0, %v3588_v37  ;;  %v5494_v18 = vpop.eup %5493 }
0x11a0   :  { %v5496_v19 = vpop.eup %5495  ;;  %v3570_v13 = vadd.f32 1.0, %v5494_v18 }
0x11a1   :  { %v3569_v22 = vadd.f32 1.0, %v5496_v19 }
0x11a2   :  { %v5498_v1 = vpop.eup %5497  ;;  %5505 = vrcp.f32 %v3570_v13 }
0x11a3   :  { %v5500_v23 = vpop.eup %5499  ;;  %5507 = vrcp.f32 %v3569_v22  ;;  %v3590_v26 = vmul.f32 %v5498_v1, %v3516_v43  ;;  %v3789_v22 = vand.u32 2147483648, %v6917_v27 }
0x11a4   :  { %v3589_v25 = vmul.f32 %v5500_v23, %v3511_v48  ;;  %5509 = vrsqrt.f32 %v6125_v44 }
0x11a5   :  { %5511 = vrsqrt.f32 %v6127_v45 }
0x11a6   :  { %5045 = vmatprep.mubr.msk.f32.mxu0 %vm203_vm0, %v3589_v25  ;;  %v5502_v31 = vpop.eup %5501  ;;  %5513 = vrsqrt.f32 %v6129_v47 }
0x11a7   :  { %5046 = vmatmul.mubr.msk.f32.gmra.mrb[78].mxu0 %vm203_vm0, %v3590_v26  ;;  %v3592_v32 = vmul.f32 %v5502_v31, %v3526_v21  ;;  %5515 = vrsqrt.f32 %v6142_v56  ;;  %v6918_v21 = vld [vmem:[#allocation29_spill] sm:$0xff] }
0x11a8   :  { %5517 = vrsqrt.f32 %v6154_v62  ;;  %vm3779_vm4 = vcmp.eq.f32.partialorder %v6918_v21, inf  ;;  %v3782_v31 = vand.u32 2147483648, %v6918_v21 }
0x11a9   :  { %v5504_v28 = vpop.eup %5503  ;;  %5519 = vrsqrt.f32 %v6916_v24 }
0x11aa   :  { %v3591_v29 = vmul.f32 %v5504_v28, %v3521_v16  ;;  %5521 = vrsqrt.f32 %v6917_v27 }
0x11ab   :  { %5523 = vrsqrt.f32 %v6918_v21 }
0x11ac   :  { %5048 = vmatprep.mubr.msk.f32.mxu0 %vm203_vm0, %v3591_v29  ;;  %v5506_v34 = vpop.eup %5505 }
0x11ad   :  { %5049 = vmatmul.mubr.msk.f32.gmra.mrb[80].mxu0 %vm203_vm0, %v3592_v32  ;;  %v5508_v35 = vpop.eup %5507  ;;  %v3594_v36 = vmul.f32 %v5506_v34, %v3536_v8  ;;  %v3754_v8 = vand.u32 2147483648, %v6142_v56 }
0x11ae   :  { %v3593_v58 = vmul.f32 %v5508_v35, %v3531_v49  ;;  %v5510_v51 = vpop.eup %5509 }
0x11af   :  { %v5512_v59 = vpop.eup %5511  ;;  %v3743_v3 = vmul.f32 %v5510_v51, %v6125_v44 }
0x11b0   :  { %5051 = vmatprep.mubr.msk.f32.mxu0 %vm203_vm0, %v3593_v58  ;;  %v3736_v63 = vmul.f32 %v5512_v59, %v6127_v45  ;;  %v5514_v43 = vpop.eup %5513 }
0x11b1   :  { %5052 = vmatmul.mubr.msk.f32.gmra.mrb[82].mxu0 %vm203_vm0, %v3594_v36  ;;  %v3745_v4 = vsel %vm3744_vm6, %v6125_v44, %v3743_v3  ;;  %v5516_v12 = vpop.eup %5515  ;;  %v3757_v16 = vmul.f32 %v5514_v43, %v6129_v47  ;;  %vm3774_vm0 = vcmp.eq.f32.partialorder %v6154_v62, 0.0  ;;  %vm3788_vm6 = vcmp.eq.f32.partialorder %v6917_v27, 0.0 }
0x11b2   :  { %v3738_v48 = vsel %vm3737_vm7, %v6127_v45, %v3736_v63  ;;  %v3748_v9 = vsel %vm3746_vm8, %v3747_v20, %v3745_v4  ;;  %v3750_v11 = vmul.f32 %v5516_v12, %v6142_v56  ;;  %v5518_v55 = vpop.eup %5517  ;;  %v3761_v45 = vand.u32 2147483648, %v6129_v47 }
0x11b3   :  { %v3741_v17 = vsel %vm3739_vm9, %v3740_v57, %v3738_v48  ;;  %v3792_v10 = vadd.f32 1.0, %v3748_v9  ;;  %v5520_v44 = vpop.eup %5519  ;;  %v3759_v50 = vsel %vm3758_vm10, %v6129_v47, %v3757_v16  ;;  %v3771_v52 = vmul.f32 %v5518_v55, %v6154_v62 }
0x11b4   :  { %v3791_v33 = vadd.f32 1.0, %v3741_v17  ;;  %v3752_v54 = vsel %vm3751_vm11, %v6142_v56, %v3750_v11  ;;  %v3764_v49 = vmul.f32 %v5520_v44, %v6916_v24  ;;  %v3762_v14 = vsel %vm3760_vm12, %v3761_v45, %v3759_v50  ;;  %v5522_v7 = vpop.eup %5521 }
0x11b5   :  { %5525 = vrcp.f32 %v3792_v10  ;;  %v3755_v42 = vsel %vm3753_vm13, %v3754_v8, %v3752_v54  ;;  %v5524_v41 = vpop.eup %5523  ;;  %v3773_v47 = vsel %vm3772_vm14, %v6154_v62, %v3771_v52  ;;  %v3794_v53 = vadd.f32 1.0, %v3762_v14  ;;  %v167_v54 = vld [vmem:[%s6919_s3] sm:$0xff]  ;;  %v168_v8 = vld [vmem:[%s6919_s3 + $0x8] sm:$0xff]  ;;  %v169_v52 = vld [vmem:[%s6919_s3 + $0x10] sm:$0xff] }
0x11b6   :  { %5527 = vrcp.f32 %v3791_v33  ;;  %v3766_v2 = vsel %vm3765_vm15, %v6916_v24, %v3764_v49  ;;  %v3785_v56 = vmul.f32 %v5522_v7, %v6917_v27  ;;  %v3793_v40 = vadd.f32 1.0, %v3755_v42  ;;  %v170_v49 = vld [vmem:[%s6919_s3 + $0x18] sm:$0xff]  ;;  %v6920_v7 = vld [vmem:[#allocation20_spill] sm:$0xff] }
0x11b7   :  { %v3778_v46 = vmul.f32 %v5524_v41, %v6918_v21  ;;  %v3776_v39 = vsel %vm3774_vm0, %v3775_v0, %v3773_v47  ;;  %5529 = vrcp.f32 %v3794_v53  ;;  %v3769_v15 = vsel %vm3767_vm2, %v3768_v30, %v3766_v2  ;;  %v6921_v47 = vld [vmem:[#allocation21_spill] sm:$0xff] }
0x11b8   :  { %v3787_v18 = vsel %vm3786_vm3, %v6917_v27, %v3785_v56  ;;  %5531 = vrcp.f32 %v3793_v40  ;;  %v3796_v25 = vadd.f32 1.0, %v3776_v39  ;;  %v3795_v29 = vadd.f32 1.0, %v3769_v15  ;;  %v6922_v40 = vld [vmem:[#allocation22_spill] sm:$0xff] }
0x11b9   :  { %v3780_v62 = vsel %vm3779_vm4, %v6918_v21, %v3778_v46  ;;  %vm3781_vm7 = vcmp.eq.f32.partialorder %v6918_v21, 0.0  ;;  %v3790_v34 = vsel %vm3788_vm6, %v3789_v22, %v3787_v18  ;;  %v6923_v46 = vld [vmem:[#allocation23_spill] sm:$0xff]  ;;  %v6924_v18 = vld [vmem:[#allocation25_spill] sm:$0xff] }
0x11ba   :  { %v3783_v35 = vsel %vm3781_vm7, %v3782_v31, %v3780_v62  ;;  %5533 = vrcp.f32 %v3796_v25  ;;  %v3798_v58 = vadd.f32 1.0, %v3790_v34  ;;  %v6926_v25 = vld [vmem:[#allocation27_spill] sm:$0xff]  ;;  %v6927_v31 = vld [vmem:[#allocation26_spill] sm:$0xff] }
0x11bb   :  { %5535 = vrcp.f32 %v3795_v29  ;;  %v3797_v61 = vadd.f32 1.0, %v3783_v35 }
0x11bc   :  { %5537 = vrcp.f32 %v3798_v58 }
0x11bd   :  { %5539 = vrcp.f32 %v3797_v61 }
0x11bf   :  { %v5526_v1 = vpop.eup %5525 }
0x11c0   :  { %v5528_v26 = vpop.eup %5527 }
0x11c1   :  { %v5530_v3 = vpop.eup %5529 }
0x11c2   :  { %v5532_v24 = vpop.eup %5531 }
0x11c4   :  { %v5534_v57 = vpop.eup %5533 }
0x11c5   :  { %v5536_v21 = vpop.eup %5535 }
0x11c6   :  { %v5538_v55 = vpop.eup %5537 }
0x11c7   :  { %v5540_v44 = vpop.eup %5539 }
0x1272   :  { %v5044_v37 = vpop.f32.mrb[76].mxu0 }
0x1273   :  { %v3702_v19 = vadd.f32 %v5044_v37, %v4275_v5  ;;  %v3696_v13 = vpop.f32.mrb[77].mxu0 }
0x1274   :  { %v3697_v23 = vadd.f32 %v4275_v5, %v3696_v13  ;;  %v6925_v13 = vld [vmem:[#allocation24_spill] sm:$0xff] }
0x1275   :  { %v3808_v28 = vmul.f32 %v5526_v1, %v3702_v19 }
0x1276   :  { %v3807_v32 = vmul.f32 %v5528_v26, %v3697_v23 }
0x1277   :  { %3822 = vperm.xlu0 %5283, %v3808_v28  }
0x1278   :  { %3817 = vperm.xlu1 %5284, %v3807_v32  }
0x127a   :  { %v5047_v36 = vpop.f32.mrb[78].mxu0 }
0x127b   :  { %v3712_v51 = vadd.f32 %v5047_v36, %v4275_v5  ;;  %v3706_v59 = vpop.f32.mrb[79].mxu0 }
0x127c   :  { %v3707_v63 = vadd.f32 %v4275_v5, %v3706_v59 }
0x127d   :  { %v3810_v4 = vmul.f32 %v5530_v3, %v3712_v51 }
0x127e   :  { %v3809_v43 = vmul.f32 %v5532_v24, %v3707_v63 }
0x127f   :  { %3832 = vperm.xlu1 %5284, %v3810_v4  }
0x1280   :  { %v5050_v20 = vpop.f32.mrb[80].mxu0 }
0x1281   :  { %v3722_v48 = vadd.f32 %v5050_v20, %v4275_v5  ;;  %v3716_v12 = vpop.f32.mrb[81].mxu0 }
0x1282   :  { %v3717_v27 = vadd.f32 %v4275_v5, %v3716_v12 }
0x1283   :  { %v3812_v9 = vmul.f32 %v5534_v57, %v3722_v48  ;;  %3827 = vperm.xlu1 %5284, %v3809_v43  }
0x1284   :  { %v3811_v16 = vmul.f32 %v5536_v21, %v3717_v27  ;;  %v5053_v17 = vpop.f32.mrb[82].mxu0 }
0x1285   :  { %v3732_v11 = vadd.f32 %v5053_v17, %v4275_v5  ;;  %v3726_v10 = vpop.f32.mrb[83].mxu0 }
0x1286   :  { %3837 = vperm.xlu0 %5283, %v3811_v16   ;;  %v3727_v33 = vadd.f32 %v4275_v5, %v3726_v10 }
0x1287   :  { %3842 = vperm.xlu1 %5284, %v3812_v9   ;;  %v3814_v50 = vmul.f32 %v5538_v55, %v3732_v11 }
0x1288   :  { %v3813_v45 = vmul.f32 %v5540_v44, %v3727_v33 }
0x128a   :  { %3847 = vperm.xlu0 %5283, %v3813_v45  }
0x128b   :  { %3852 = vperm.xlu1 %5284, %v3814_v50  }
0x128e   :  { %3954 = vperm.xlu0 %5283, %v167_v54  }
0x128f   :  { %3959 = vperm.xlu1 %5284, %v168_v8  }
0x1292   :  { %3964 = vperm.xlu0 %5283, %v169_v52  }
0x1293   :  { %3969 = vperm.xlu1 %5284, %v170_v49  }
0x12f6   :  { %v3823_v14 = vpop.permute.xlu0 %3822 }
0x12f7   :  { %v3856_v42 = vmul.f32 %v3823_v14, %v6920_v7  ;;  %v3818_v41 = vpop.permute.xlu1 %3817 }
0x12f8   :  { %v3855_v53 = vmul.f32 %v3818_v41, %v6921_v47 }
0x12fa   :  { %v5244_v2 = vpack.c.bf16 %v3856_v42, %v3855_v53 }
0x12fc   :  { %5245 = vmatprep.subr.bf16.mxu1 %v5244_v2 }
0x12fd   :  { %5247 = vmatpush3.bf16.msra.mxu1 %v5244_v2 }
0x12fe   :  { %v3833_v0 = vpop.permute.xlu1 %3832 }
0x12ff   :  { %v3858_v30 = vmul.f32 %v3833_v0, %v6922_v40 }
0x1302   :  { %v3828_v56 = vpop.permute.xlu1 %3827 }
0x1303   :  { %v3857_v5 = vmul.f32 %v3828_v56, %v6923_v46 }
0x1305   :  { %v5248_v39 = vpack.c.bf16 %v3858_v30, %v3857_v5  ;;  %v3838_v37 = vpop.permute.xlu0 %3837 }
0x1306   :  { %v3843_v15 = vpop.permute.xlu1 %3842  ;;  %v3859_v19 = vmul.f32 %v3838_v37, %v6924_v18 }
0x1307   :  { %v3860_v1 = vmul.f32 %v3843_v15, %v6925_v13  ;;  %5249 = vmatprep.subr.bf16.mxu1 %v5248_v39 }
0x1308   :  { %5251 = vmatpush3.bf16.msra.mxu1 %v5248_v39 }
0x1309   :  { %v5252_v62 = vpack.c.bf16 %v3860_v1, %v3859_v19  ;;  %v3848_v22 = vpop.permute.xlu0 %3847 }
0x130a   :  { %v3853_v23 = vpop.permute.xlu1 %3852  ;;  %v3861_v26 = vmul.f32 %v3848_v22, %v6926_v25 }
0x130b   :  { %v3862_v28 = vmul.f32 %v3853_v23, %v6927_v31  ;;  %5253 = vmatprep.subr.bf16.mxu1 %v5252_v62 }
0x130c   :  { %5255 = vmatpush3.bf16.msra.mxu1 %v5252_v62 }
0x130d   :  { %v5256_v29 = vpack.c.bf16 %v3862_v28, %v3861_v26 }
0x130f   :  { %5257 = vmatprep.subr.bf16.mxu1 %v5256_v29 }
0x1310   :  { %5259 = vmatpush3.bf16.msra.mxu1 %v5256_v29 }
0x1313   :  { %5071 = vmatmul.mubr.msk.f32.vlgmr.msra.gmra.mrb[92].mxu1 %vm1311_vm5, %v6337_v60 }
0x1314   :  { %5073 = vmatprep.mubr.msk.f32.mxu1 %vm1311_vm5, %v6339_v6 }
0x1317   :  { %5074 = vmatmul.mubr.msk.f32.gmra.mrb[94].mxu1 %vm1311_vm5, %v6345_v38 }
0x1318   :  { %5688 = shalt.err (!%p5685_p10)
}
0x1319   :  { %s5689_s2 = scalar_lea.hbm %s6860_s23, 512 }
0x131a   :  { %p5690_p11 = scmp.ne.s32.totalorder %s6860_s23, %s5689_s2  ;;  %p5693_p12 = scmp.lt.u32.totalorder %s5689_s2, %s6860_s23 }
0x131c   :  { %p5695_p13 = pnand %p5693_p12, %p5690_p11 }
0x131e   :  { %5698 = shalt.err (!%p5695_p13)
}
0x131f   :  { %3999 = dma.vmem_to_hbm [thread:$0]  %s3994_s27, 512, %s6860_s23, [#allocation5], %s5714_s13, %s5714_s13, %s5715_s4   ;;  %v3960_v60 = vpop.permute.xlu1 %3959  ;;  %v3955_v38 = vpop.permute.xlu0 %3954 }
0x1320   :  { %v5541_v51 = vld [vmem:[%s6900_s6 + $0x8] sm:$0xff]  ;;  %v5542_v4 = vld [vmem:[%s6900_s6] sm:$0xff]  ;;  %v5543_v27 = vld [vmem:[%s6900_s6 + $0x18] sm:$0xff] }
0x1321   :  { %v5544_v9 = vld [vmem:[%s6900_s6 + $0x10] sm:$0xff] }
0x1323   :  { %v3970_v24 = vpop.permute.xlu1 %3969  ;;  %v3965_v48 = vpop.permute.xlu0 %3964 }
0x13e6   :  { %v5072_v6 = vpop.f32.mrb[92].mxu1 }
0x13e7   :  { %v3949_v32 = vmul.f32 0.01, %v5072_v6  ;;  %v3929_v34 = vpop.f32.mrb[93].mxu1 }
0x13e8   :  { %v3948_v35 = vmul.f32 0.01, %v3929_v34 }
0x13e9   :  { %v3973_v58 = vmul.f32 %v3960_v60, %v3949_v32 }
0x13ea   :  { %v3972_v36 = vmul.f32 %v3955_v38, %v3948_v35  ;;  %v5075_v61 = vpop.f32.mrb[94].mxu1 }
0x13eb   :  { %v3977_v59 = vadd.f32 %v5541_v51, %v3973_v58  ;;  %v3951_v3 = vmul.f32 0.01, %v5075_v61  ;;  %v3939_v63 = vpop.f32.mrb[95].mxu1 }
0x13ec   :  { %v3976_v43 = vadd.f32 %v5542_v4, %v3972_v36  ;;  %v3950_v20 = vmul.f32 0.01, %v3939_v63 }
0x13ed   :  { %3981 = vst.msk [vmem:[%s6861_s24 + $0x8] sm:$0xff] %vm413_vm1, %v3977_v59  ;;  %v3975_v12 = vmul.f32 %v3970_v24, %v3951_v3 }
0x13ee   :  { %3980 = vst.msk [vmem:[%s6861_s24] sm:$0xff] %vm413_vm1, %v3976_v43  ;;  %v3974_v57 = vmul.f32 %v3965_v48, %v3950_v20 }
0x13ef   :  { %v3979_v21 = vadd.f32 %v5543_v27, %v3975_v12 }
0x13f0   :  { %v3978_v16 = vadd.f32 %v5544_v9, %v3974_v57 }
0x13f1   :  { %3983 = vst.msk [vmem:[%s6861_s24 + $0x18] sm:$0xff] %vm413_vm1, %v3979_v21 }
0x13f2   :  { %3982 = vst.msk [vmem:[%s6861_s24 + $0x10] sm:$0xff] %vm413_vm1, %v3978_v16 }
0x13f3   :  { %5707 = dma.done.wait [#allocation5], 512  }
0x13f4   :  { %5708 = vsyncadd [#allocation5], 4294966784 }
0x13f5   :  { %4007 = vsyncpa [#allocation4], 1 }
0x13f6   :  { %4008 = vsyncpa [#allocation7], 1 }
0x13f7   :  { %4009 = vsyncpa [#allocation10], 1 }
0x13f8   :  { %4010 = vsyncpa [#allocation13], 1 }
0x13f9   :  { %4011 = vsyncpa [#allocation5], 1 }

</bundles_post_ra>
